<compile_context>
chip_gen: v7x
topology: tpu7x:2x2x1
jax: 0.10.0
libtpu: 0.0.40
codegen_flags: <defaults>
</compile_context>

<pallas_src>
import functools

import jax
import jax.numpy as jnp
from jax.experimental import pallas as pl
from jax.experimental.pallas import tpu as pltpu


# -----------------------------------------------------------------------------
# Fused Pallas kernel: 3 x (DCLS conv -> folded BN -> Leaky LIF), one batch tile
# -----------------------------------------------------------------------------
def _make_fused_kernel(K, left_pad, L1, L2, L3, B_tile, beta, threshold):
    beta = float(beta)
    threshold = float(threshold)
    pad_rows = left_pad * B_tile

    def lif_scan(acc, L, want_mem=False):
        """Unrolled Leaky-LIF scan (snntorch 'subtract' reset) over L timesteps.
        acc: (L*B_tile, C) f32 pre-activations, rows ordered (t, b).
        Returns lists of per-timestep (B_tile, C) spike / membrane slabs."""
        C = acc.shape[1]
        mem = jnp.zeros((B_tile, C), jnp.float32)
        spk = jnp.zeros((B_tile, C), jnp.float32)      # reset term for t = 0
        spk_rows, mem_rows = [], []
        for t in range(L):
            # reset_t = Heaviside(mem_{t-1} - thr) == spk_{t-1}  ('subtract')
            mem = beta * mem + acc[t * B_tile:(t + 1) * B_tile, :] - threshold * spk
            spk = (mem > threshold).astype(jnp.float32)
            spk_rows.append(spk)
            if want_mem:
                mem_rows.append(mem)
        return spk_rows, mem_rows

    def lif_to_slab(acc, L):
        """LIF scan -> left-padded bf16 spike slab ((left_pad+L)*B_tile, C),
        built in registers and meant for a single dense store."""
        spk_rows, _ = lif_scan(acc, L)
        C = acc.shape[1]
        slab = jnp.concatenate(
            [jnp.zeros((pad_rows, C), jnp.float32)] + spk_rows, axis=0)
        return slab.astype(jnp.bfloat16)

    def conv_taps(src_ref, w_ref, b_ref, L_out):
        """a = sum_k dot(src[k*B_tile : (k+L_out)*B_tile], w[k]) + b
        K accumulated MXU matmuls (no lane concat)."""
        acc = jnp.dot(src_ref[0:L_out * B_tile, :], w_ref[0],
                      preferred_element_type=jnp.float32)
        for k in range(1, K):
            acc = acc + jnp.dot(
                src_ref[k * B_tile:(k + L_out) * B_tile, :], w_ref[k],
                preferred_element_type=jnp.float32)
        return acc + b_ref[...]

    def kernel(xi1_ref, w1_ref, b1_ref, w2_ref, b2_ref, w3_ref, b3_ref,
               spk_ref, mem_ref, s1_ref, s2_ref):
        # ---- layer 1: im2col pre-done in the wrapper -> single bf16 MXU matmul
        a1 = jnp.dot(xi1_ref[...], w1_ref[...],
                     preferred_element_type=jnp.float32) + b1_ref[...]
        s1_ref[...] = lif_to_slab(a1, L1)          # one dense bulk store

        # ---- layer 2: K accumulated tap matmuls over the bf16 spike slab
        a2 = conv_taps(s1_ref, w2_ref, b2_ref, L2)
        s2_ref[...] = lif_to_slab(a2, L2)

        # ---- layer 3 (no BN): spikes + membranes straight to the output refs
        a3 = conv_taps(s2_ref, w3_ref, b3_ref, L3)
        spk3, mem3 = lif_scan(a3, L3, want_mem=True)
        spk_ref[...] = jnp.concatenate(spk3, axis=0)
        mem_ref[...] = jnp.concatenate(mem3, axis=0)

    return kernel


def snn_delay_forward(data, w1, b1, w2, b2, w3, b3, *, left_pad, K, c_out,
                      beta, threshold, batch_tile=None):
    """data: (B, T, C_in).
    w1: (C1_pad, H) bf16   -- layer-1 BN folded, im2col-flattened (row = k*C_in+c)
    w2: (K, H, H) bf16     -- layer-2 BN folded, per-tap
    w3: (K, H, C3_pad) bf16
    b*: (1, C) f32.
    Returns (spk_rec, mem_rec) of shape (L3, B, c_out), like torch.stack(dim=0)."""
    B, T, c_in = data.shape
    c1p = w1.shape[0]
    h1 = w1.shape[1]
    h2 = w2.shape[2]
    c3p = w3.shape[2]
    if batch_tile is None:
        batch_tile = min(B, 8)
    assert B % batch_tile == 0, "batch must be divisible by batch_tile"
    n_tiles = B // batch_tile

    Lp1 = T + left_pad
    L1 = Lp1 - K + 1
    L2 = L1 + left_pad - K + 1
    L3 = L2 + left_pad - K + 1

    # ---- layer-1 im2col in XLA (outside the kernel): left-pad time, unfold the
    # K delay taps, pad the flattened contraction once (K*C_in -> c1p), stack
    # batch_tile elements into the matmul M dim (time-major rows), cast bf16.
    xp = jnp.pad(data, ((0, 0), (left_pad, 0), (0, 0)))
    xi1 = jnp.concatenate([xp[:, k:k + L1, :] for k in range(K)], axis=-1)
    xi1 = jnp.pad(xi1, ((0, 0), (0, 0), (0, c1p - K * c_in)))
    xi1 = xi1.reshape(n_tiles, batch_tile, L1, c1p).transpose(0, 2, 1, 3)
    xi1 = xi1.reshape(n_tiles, L1 * batch_tile, c1p).astype(jnp.bfloat16)

    kernel = _make_fused_kernel(K, left_pad, L1, L2, L3, batch_tile,
                                beta, threshold)

    def const_spec(arr):
        nd = arr.ndim
        return pl.BlockSpec(arr.shape, lambda i, _n=nd: (0,) * _n)

    out_spec = pl.BlockSpec((None, L3 * batch_tile, c3p), lambda i: (i, 0, 0))
    out_sds = jax.ShapeDtypeStruct((n_tiles, L3 * batch_tile, c3p), jnp.float32)

    spk_pad, mem_pad = pl.pallas_call(
        kernel,
        grid=(n_tiles,),
        in_specs=[
            pl.BlockSpec((None, L1 * batch_tile, c1p), lambda i: (i, 0, 0)),
            const_spec(w1), const_spec(b1),
            const_spec(w2), const_spec(b2),
            const_spec(w3), const_spec(b3),
        ],
        out_specs=(out_spec, out_spec),
        out_shape=(out_sds, out_sds),
        scratch_shapes=[
            pltpu.VMEM(((left_pad + L1) * batch_tile, h1), jnp.bfloat16),
            pltpu.VMEM(((left_pad + L2) * batch_tile, h2), jnp.bfloat16),
        ],
        compiler_params=pltpu.CompilerParams(
            dimension_semantics=("parallel",),
            vmem_limit_bytes=32 * 1024 * 1024),
    )(xi1, w1, b1, w2, b2, w3, b3)

    # kernel rows are (t, b) within each tile; tiny XLA reshape/transpose gives
    # the time-major (L3, B, c_out) outputs, dropping the C_out lane padding.
    def unpack(y):
        y = y.reshape(n_tiles, L3, batch_tile, c3p)[..., :c_out]
        return y.transpose(1, 0, 2, 3).reshape(L3, B, c_out)

    return unpack(spk_pad), unpack(mem_pad)


# -----------------------------------------------------------------------------
# DCLS 'gauss' kernel construction + parameter prep (plain JAX glue)
# -----------------------------------------------------------------------------
def build_dcls_gauss_kernel(W, P, SIG, K):
    """W: (C_out,C_in,1), P/SIG: (1,C_out,C_in,1).  Returns (K, C_in, C_out):
    weight spread over K delay taps by a normalized Gaussian (DCLS 'gauss')."""
    idx = jnp.arange(K, dtype=jnp.float32)
    mu = P[0, :, :, 0] + (K - 1) / 2.0
    sig = SIG[0, :, :, 0]
    g = jnp.exp(-0.5 * ((idx[None, None, :] - mu[..., None]) / sig[..., None]) ** 2)
    g = g / (jnp.sum(g, axis=-1, keepdims=True) + 1e-7)
    kern = W[:, :, 0][..., None] * g                              # (C_out, C_in, K)
    return jnp.transpose(kern, (2, 1, 0))                         # (K, C_in, C_out)


def init_dcls(kw, kp, kb, c_in, c_out, max_delay, siginit):
    W = jax.random.normal(kw, (c_out, c_in, 1), jnp.float32) / jnp.sqrt(c_in)
    half = max_delay // 2
    P = jax.random.uniform(kp, (1, c_out, c_in, 1), jnp.float32,
                           minval=-half, maxval=half)
    P = jnp.clip(P, -half, half)                                   # clamp_parameters()
    SIG = jnp.full((1, c_out, c_in, 1), float(siginit), jnp.float32)
    bias = jax.random.uniform(kb, (1, c_out), jnp.float32, minval=-0.05, maxval=0.05)
    w = build_dcls_gauss_kernel(W, P, SIG, max_delay)
    return w, bias


def bn_params(c):   # eval-mode BatchNorm1d default init: (gamma, beta, mean, var)
    return (jnp.ones((1, c), jnp.float32), jnp.zeros((1, c), jnp.float32),
            jnp.zeros((1, c), jnp.float32), jnp.ones((1, c), jnp.float32))


def _fold_bn(w, bias, bn, eps=1e-5):
    if bn is None:
        return w, bias
    gamma, bn_beta, mean, var = bn
    scale = gamma / jnp.sqrt(var + eps)                            # (1, C_out)
    return w * scale, (bias - mean) * scale + bn_beta


def prep_layer1(w, bias, bn, *, c1_pad):
    """Layer 1: fold BN, flatten (K, C_in, C_out) -> (K*C_in, C_out) in the same
    im2col column order used by the wrapper, pad the contraction to c1_pad."""
    K, c_in, c_out = w.shape
    w, bias = _fold_bn(w, bias, bn)
    w = w.reshape(K * c_in, c_out)
    w = jnp.pad(w, ((0, c1_pad - K * c_in), (0, 0)))
    return w.astype(jnp.bfloat16), bias.astype(jnp.float32)


def prep_layer_taps(w, bias, bn, *, cout_pad):
    """Layers 2/3: fold BN (if any), keep per-tap (K, C_in, C_out_pad) layout."""
    K, c_in, c_out = w.shape
    w, bias = _fold_bn(w, bias, bn)
    w = jnp.pad(w, ((0, 0), (0, 0), (0, cout_pad - c_out)))
    bias = jnp.pad(bias, ((0, 0), (0, cout_pad - c_out)))
    return w.astype(jnp.bfloat16), bias.astype(jnp.float32)


# -----------------------------------------------------------------------------
if __name__ == "__main__":
    # Module hyper-parameters
    beta, threshold = 0.9, 1.0
    time_step = 50
    left_pad = 250 // time_step                                      # 5
    max_delay = 250 // time_step
    max_delay = max_delay if max_delay % 2 == 1 else max_delay + 1   # 5
    siginit = max_delay // 2                                         # 2

    # Small deterministic shapes (batch chosen so M >= 128 per matmul and the
    # grid still has 2 parallel steps for v7x's two TensorCores).
    B, T, C_IN = 16, 16, 140
    H, C_OUT = 256, 20
    C1_PAD = ((max_delay * C_IN + 127) // 128) * 128                 # 700 -> 768
    C3_PAD = 128                                                     # lane-dense out
    BATCH_TILE = 8                                                   # grid = (2,)

    key = jax.random.PRNGKey(0)
    k = jax.random.split(key, 10)
    data = (jax.random.uniform(k[0], (B, T, C_IN)) < 0.3).astype(jnp.float32)

    w1, b1 = init_dcls(k[1], k[2], k[3], C_IN, H, max_delay, siginit)
    w2, b2 = init_dcls(k[4], k[5], k[6], H, H, max_delay, siginit)
    w3, b3 = init_dcls(k[7], k[8], k[9], H, C_OUT, max_delay, siginit)

    W1, B1 = prep_layer1(w1, b1, bn_params(H), c1_pad=C1_PAD)
    W2, B2 = prep_layer_taps(w2, b2, bn_params(H), cout_pad=H)
    W3, B3 = prep_layer_taps(w3, b3, None, cout_pad=C3_PAD)          # layer 3: no BN

    fwd = jax.jit(functools.partial(
        snn_delay_forward, left_pad=left_pad, K=max_delay, c_out=C_OUT,
        beta=beta, threshold=threshold, batch_tile=BATCH_TILE))
    spk_rec, mem_rec = fwd(data, W1, B1, W2, B2, W3, B3)
    jax.block_until_ready((spk_rec, mem_rec))

    L3 = T + 3 * (left_pad - max_delay + 1)                          # 16 + 3 = 19
    assert spk_rec.shape == (L3, B, C_OUT), spk_rec.shape
    assert mem_rec.shape == (L3, B, C_OUT), mem_rec.shape
    assert bool(jnp.all((spk_rec == 0.0) | (spk_rec == 1.0)))
    assert bool(jnp.all(jnp.isfinite(mem_rec)))
    print("KERNEL_OK")
</pallas_src>

<mosaic_0001>
module attributes {stable_mosaic.version = 11 : i64} {
  func.func @kernel(%arg0: i32, %arg1: memref<1x136x768xbf16, #tpu.memory_space<vmem>>, %arg2: memref<768x256xbf16, #tpu.memory_space<vmem>>, %arg3: memref<1x256xf32, #tpu.memory_space<vmem>>, %arg4: memref<5x256x256xbf16, #tpu.memory_space<vmem>>, %arg5: memref<1x256xf32, #tpu.memory_space<vmem>>, %arg6: memref<5x256x128xbf16, #tpu.memory_space<vmem>>, %arg7: memref<1x128xf32, #tpu.memory_space<vmem>>, %arg8: memref<1x152x128xf32, #tpu.memory_space<vmem>>, %arg9: memref<1x152x128xf32, #tpu.memory_space<vmem>>, %arg10: memref<176x256xbf16, #tpu.memory_space<vmem>>, %arg11: memref<184x256xbf16, #tpu.memory_space<vmem>>) attributes {dimension_semantics = [#tpu.dimension_semantics<parallel>], iteration_bounds = array<i64: 2>, scalar_prefetch = 0 : i64, scratch_operands = 2 : i64, tpu.core_type = #tpu.core_type<tc>, window_params = [{transform_indices = @transform_0, window_bounds = array<i64: 1, 136, 768>}, {pipeline_mode = #tpu.pipeline_mode<synchronous>, transform_indices = @transform_1, window_bounds = array<i64: 768, 256>}, {pipeline_mode = #tpu.pipeline_mode<synchronous>, transform_indices = @transform_2, window_bounds = array<i64: 1, 256>}, {pipeline_mode = #tpu.pipeline_mode<synchronous>, transform_indices = @transform_3, window_bounds = array<i64: 5, 256, 256>}, {pipeline_mode = #tpu.pipeline_mode<synchronous>, transform_indices = @transform_4, window_bounds = array<i64: 1, 256>}, {pipeline_mode = #tpu.pipeline_mode<synchronous>, transform_indices = @transform_5, window_bounds = array<i64: 5, 256, 128>}, {pipeline_mode = #tpu.pipeline_mode<synchronous>, transform_indices = @transform_6, window_bounds = array<i64: 1, 128>}, {transform_indices = @transform_7, window_bounds = array<i64: 1, 152, 128>}, {transform_indices = @transform_8, window_bounds = array<i64: 1, 152, 128>}]} {
    %c0 = arith.constant 0 : index
    %c0_0 = arith.constant 0 : index
    %c0_1 = arith.constant 0 : index
    %0 = vector.load %arg1[%c0, %c0_0, %c0_1] : memref<1x136x768xbf16, #tpu.memory_space<vmem>>, vector<1x136x768xbf16>
    %1 = vector.shape_cast %0 : vector<1x136x768xbf16> to vector<136x768xbf16>
    %c0_2 = arith.constant 0 : index
    %c0_3 = arith.constant 0 : index
    %2 = vector.load %arg2[%c0_2, %c0_3] : memref<768x256xbf16, #tpu.memory_space<vmem>>, vector<768x256xbf16>
    %cst = arith.constant dense<0.000000e+00> : vector<136x256xf32>
    %3 = tpu.matmul %1, %2, %cst {dimension_numbers = #tpu.dot_dimension_numbers<[1], [0], [0], [1], [0, 0, 1, 1], [], []>} : vector<136x768xbf16>, vector<768x256xbf16>, vector<136x256xf32> -> vector<136x256xf32>
    %c0_4 = arith.constant 0 : index
    %c0_5 = arith.constant 0 : index
    %4 = vector.load %arg3[%c0_4, %c0_5] : memref<1x256xf32, #tpu.memory_space<vmem>>, vector<1x256xf32>
    %5 = vector.broadcast %4 : vector<1x256xf32> to vector<136x256xf32>
    %6 = arith.addf %3, %5 : vector<136x256xf32>
    %cst_6 = arith.constant 0.000000e+00 : f32
    %7 = vector.broadcast %cst_6 : f32 to vector<8x256xf32>
    %cst_7 = arith.constant 0.000000e+00 : f32
    %8 = vector.broadcast %cst_7 : f32 to vector<8x256xf32>
    %cst_8 = arith.constant 0.899999976 : f32
    %9 = vector.broadcast %cst_8 : f32 to vector<8x256xf32>
    %10 = arith.mulf %9, %7 : vector<8x256xf32>
    %11 = vector.extract_strided_slice %6 {offsets = [0, 0], sizes = [8, 256], strides = [1, 1]} : vector<136x256xf32> to vector<8x256xf32>
    %12 = arith.addf %10, %11 : vector<8x256xf32>
    %cst_9 = arith.constant 1.000000e+00 : f32
    %13 = vector.broadcast %cst_9 : f32 to vector<8x256xf32>
    %14 = arith.mulf %13, %8 : vector<8x256xf32>
    %15 = arith.subf %12, %14 : vector<8x256xf32>
    %cst_10 = arith.constant 1.000000e+00 : f32
    %16 = vector.broadcast %cst_10 : f32 to vector<8x256xf32>
    %17 = arith.cmpf ogt, %15, %16 : vector<8x256xf32>
    %18 = arith.extui %17 : vector<8x256xi1> to vector<8x256xi32>
    %19 = arith.sitofp %18 : vector<8x256xi32> to vector<8x256xf32>
    %cst_11 = arith.constant 0.899999976 : f32
    %20 = vector.broadcast %cst_11 : f32 to vector<8x256xf32>
    %21 = arith.mulf %20, %15 : vector<8x256xf32>
    %22 = vector.extract_strided_slice %6 {offsets = [8, 0], sizes = [8, 256], strides = [1, 1]} : vector<136x256xf32> to vector<8x256xf32>
    %23 = arith.addf %21, %22 : vector<8x256xf32>
    %cst_12 = arith.constant 1.000000e+00 : f32
    %24 = vector.broadcast %cst_12 : f32 to vector<8x256xf32>
    %25 = arith.mulf %24, %19 : vector<8x256xf32>
    %26 = arith.subf %23, %25 : vector<8x256xf32>
    %cst_13 = arith.constant 1.000000e+00 : f32
    %27 = vector.broadcast %cst_13 : f32 to vector<8x256xf32>
    %28 = arith.cmpf ogt, %26, %27 : vector<8x256xf32>
    %29 = arith.extui %28 : vector<8x256xi1> to vector<8x256xi32>
    %30 = arith.sitofp %29 : vector<8x256xi32> to vector<8x256xf32>
    %cst_14 = arith.constant 0.899999976 : f32
    %31 = vector.broadcast %cst_14 : f32 to vector<8x256xf32>
    %32 = arith.mulf %31, %26 : vector<8x256xf32>
    %33 = vector.extract_strided_slice %6 {offsets = [16, 0], sizes = [8, 256], strides = [1, 1]} : vector<136x256xf32> to vector<8x256xf32>
    %34 = arith.addf %32, %33 : vector<8x256xf32>
    %cst_15 = arith.constant 1.000000e+00 : f32
    %35 = vector.broadcast %cst_15 : f32 to vector<8x256xf32>
    %36 = arith.mulf %35, %30 : vector<8x256xf32>
    %37 = arith.subf %34, %36 : vector<8x256xf32>
    %cst_16 = arith.constant 1.000000e+00 : f32
    %38 = vector.broadcast %cst_16 : f32 to vector<8x256xf32>
    %39 = arith.cmpf ogt, %37, %38 : vector<8x256xf32>
    %40 = arith.extui %39 : vector<8x256xi1> to vector<8x256xi32>
    %41 = arith.sitofp %40 : vector<8x256xi32> to vector<8x256xf32>
    %cst_17 = arith.constant 0.899999976 : f32
    %42 = vector.broadcast %cst_17 : f32 to vector<8x256xf32>
    %43 = arith.mulf %42, %37 : vector<8x256xf32>
    %44 = vector.extract_strided_slice %6 {offsets = [24, 0], sizes = [8, 256], strides = [1, 1]} : vector<136x256xf32> to vector<8x256xf32>
    %45 = arith.addf %43, %44 : vector<8x256xf32>
    %cst_18 = arith.constant 1.000000e+00 : f32
    %46 = vector.broadcast %cst_18 : f32 to vector<8x256xf32>
    %47 = arith.mulf %46, %41 : vector<8x256xf32>
    %48 = arith.subf %45, %47 : vector<8x256xf32>
    %cst_19 = arith.constant 1.000000e+00 : f32
    %49 = vector.broadcast %cst_19 : f32 to vector<8x256xf32>
    %50 = arith.cmpf ogt, %48, %49 : vector<8x256xf32>
    %51 = arith.extui %50 : vector<8x256xi1> to vector<8x256xi32>
    %52 = arith.sitofp %51 : vector<8x256xi32> to vector<8x256xf32>
    %cst_20 = arith.constant 0.899999976 : f32
    %53 = vector.broadcast %cst_20 : f32 to vector<8x256xf32>
    %54 = arith.mulf %53, %48 : vector<8x256xf32>
    %55 = vector.extract_strided_slice %6 {offsets = [32, 0], sizes = [8, 256], strides = [1, 1]} : vector<136x256xf32> to vector<8x256xf32>
    %56 = arith.addf %54, %55 : vector<8x256xf32>
    %cst_21 = arith.constant 1.000000e+00 : f32
    %57 = vector.broadcast %cst_21 : f32 to vector<8x256xf32>
    %58 = arith.mulf %57, %52 : vector<8x256xf32>
    %59 = arith.subf %56, %58 : vector<8x256xf32>
    %cst_22 = arith.constant 1.000000e+00 : f32
    %60 = vector.broadcast %cst_22 : f32 to vector<8x256xf32>
    %61 = arith.cmpf ogt, %59, %60 : vector<8x256xf32>
    %62 = arith.extui %61 : vector<8x256xi1> to vector<8x256xi32>
    %63 = arith.sitofp %62 : vector<8x256xi32> to vector<8x256xf32>
    %cst_23 = arith.constant 0.899999976 : f32
    %64 = vector.broadcast %cst_23 : f32 to vector<8x256xf32>
    %65 = arith.mulf %64, %59 : vector<8x256xf32>
    %66 = vector.extract_strided_slice %6 {offsets = [40, 0], sizes = [8, 256], strides = [1, 1]} : vector<136x256xf32> to vector<8x256xf32>
    %67 = arith.addf %65, %66 : vector<8x256xf32>
    %cst_24 = arith.constant 1.000000e+00 : f32
    %68 = vector.broadcast %cst_24 : f32 to vector<8x256xf32>
    %69 = arith.mulf %68, %63 : vector<8x256xf32>
    %70 = arith.subf %67, %69 : vector<8x256xf32>
    %cst_25 = arith.constant 1.000000e+00 : f32
    %71 = vector.broadcast %cst_25 : f32 to vector<8x256xf32>
    %72 = arith.cmpf ogt, %70, %71 : vector<8x256xf32>
    %73 = arith.extui %72 : vector<8x256xi1> to vector<8x256xi32>
    %74 = arith.sitofp %73 : vector<8x256xi32> to vector<8x256xf32>
    %cst_26 = arith.constant 0.899999976 : f32
    %75 = vector.broadcast %cst_26 : f32 to vector<8x256xf32>
    %76 = arith.mulf %75, %70 : vector<8x256xf32>
    %77 = vector.extract_strided_slice %6 {offsets = [48, 0], sizes = [8, 256], strides = [1, 1]} : vector<136x256xf32> to vector<8x256xf32>
    %78 = arith.addf %76, %77 : vector<8x256xf32>
    %cst_27 = arith.constant 1.000000e+00 : f32
    %79 = vector.broadcast %cst_27 : f32 to vector<8x256xf32>
    %80 = arith.mulf %79, %74 : vector<8x256xf32>
    %81 = arith.subf %78, %80 : vector<8x256xf32>
    %cst_28 = arith.constant 1.000000e+00 : f32
    %82 = vector.broadcast %cst_28 : f32 to vector<8x256xf32>
    %83 = arith.cmpf ogt, %81, %82 : vector<8x256xf32>
    %84 = arith.extui %83 : vector<8x256xi1> to vector<8x256xi32>
    %85 = arith.sitofp %84 : vector<8x256xi32> to vector<8x256xf32>
    %cst_29 = arith.constant 0.899999976 : f32
    %86 = vector.broadcast %cst_29 : f32 to vector<8x256xf32>
    %87 = arith.mulf %86, %81 : vector<8x256xf32>
    %88 = vector.extract_strided_slice %6 {offsets = [56, 0], sizes = [8, 256], strides = [1, 1]} : vector<136x256xf32> to vector<8x256xf32>
    %89 = arith.addf %87, %88 : vector<8x256xf32>
    %cst_30 = arith.constant 1.000000e+00 : f32
    %90 = vector.broadcast %cst_30 : f32 to vector<8x256xf32>
    %91 = arith.mulf %90, %85 : vector<8x256xf32>
    %92 = arith.subf %89, %91 : vector<8x256xf32>
    %cst_31 = arith.constant 1.000000e+00 : f32
    %93 = vector.broadcast %cst_31 : f32 to vector<8x256xf32>
    %94 = arith.cmpf ogt, %92, %93 : vector<8x256xf32>
    %95 = arith.extui %94 : vector<8x256xi1> to vector<8x256xi32>
    %96 = arith.sitofp %95 : vector<8x256xi32> to vector<8x256xf32>
    %cst_32 = arith.constant 0.899999976 : f32
    %97 = vector.broadcast %cst_32 : f32 to vector<8x256xf32>
    %98 = arith.mulf %97, %92 : vector<8x256xf32>
    %99 = vector.extract_strided_slice %6 {offsets = [64, 0], sizes = [8, 256], strides = [1, 1]} : vector<136x256xf32> to vector<8x256xf32>
    %100 = arith.addf %98, %99 : vector<8x256xf32>
    %cst_33 = arith.constant 1.000000e+00 : f32
    %101 = vector.broadcast %cst_33 : f32 to vector<8x256xf32>
    %102 = arith.mulf %101, %96 : vector<8x256xf32>
    %103 = arith.subf %100, %102 : vector<8x256xf32>
    %cst_34 = arith.constant 1.000000e+00 : f32
    %104 = vector.broadcast %cst_34 : f32 to vector<8x256xf32>
    %105 = arith.cmpf ogt, %103, %104 : vector<8x256xf32>
    %106 = arith.extui %105 : vector<8x256xi1> to vector<8x256xi32>
    %107 = arith.sitofp %106 : vector<8x256xi32> to vector<8x256xf32>
    %cst_35 = arith.constant 0.899999976 : f32
    %108 = vector.broadcast %cst_35 : f32 to vector<8x256xf32>
    %109 = arith.mulf %108, %103 : vector<8x256xf32>
    %110 = vector.extract_strided_slice %6 {offsets = [72, 0], sizes = [8, 256], strides = [1, 1]} : vector<136x256xf32> to vector<8x256xf32>
    %111 = arith.addf %109, %110 : vector<8x256xf32>
    %cst_36 = arith.constant 1.000000e+00 : f32
    %112 = vector.broadcast %cst_36 : f32 to vector<8x256xf32>
    %113 = arith.mulf %112, %107 : vector<8x256xf32>
    %114 = arith.subf %111, %113 : vector<8x256xf32>
    %cst_37 = arith.constant 1.000000e+00 : f32
    %115 = vector.broadcast %cst_37 : f32 to vector<8x256xf32>
    %116 = arith.cmpf ogt, %114, %115 : vector<8x256xf32>
    %117 = arith.extui %116 : vector<8x256xi1> to vector<8x256xi32>
    %118 = arith.sitofp %117 : vector<8x256xi32> to vector<8x256xf32>
    %cst_38 = arith.constant 0.899999976 : f32
    %119 = vector.broadcast %cst_38 : f32 to vector<8x256xf32>
    %120 = arith.mulf %119, %114 : vector<8x256xf32>
    %121 = vector.extract_strided_slice %6 {offsets = [80, 0], sizes = [8, 256], strides = [1, 1]} : vector<136x256xf32> to vector<8x256xf32>
    %122 = arith.addf %120, %121 : vector<8x256xf32>
    %cst_39 = arith.constant 1.000000e+00 : f32
    %123 = vector.broadcast %cst_39 : f32 to vector<8x256xf32>
    %124 = arith.mulf %123, %118 : vector<8x256xf32>
    %125 = arith.subf %122, %124 : vector<8x256xf32>
    %cst_40 = arith.constant 1.000000e+00 : f32
    %126 = vector.broadcast %cst_40 : f32 to vector<8x256xf32>
    %127 = arith.cmpf ogt, %125, %126 : vector<8x256xf32>
    %128 = arith.extui %127 : vector<8x256xi1> to vector<8x256xi32>
    %129 = arith.sitofp %128 : vector<8x256xi32> to vector<8x256xf32>
    %cst_41 = arith.constant 0.899999976 : f32
    %130 = vector.broadcast %cst_41 : f32 to vector<8x256xf32>
    %131 = arith.mulf %130, %125 : vector<8x256xf32>
    %132 = vector.extract_strided_slice %6 {offsets = [88, 0], sizes = [8, 256], strides = [1, 1]} : vector<136x256xf32> to vector<8x256xf32>
    %133 = arith.addf %131, %132 : vector<8x256xf32>
    %cst_42 = arith.constant 1.000000e+00 : f32
    %134 = vector.broadcast %cst_42 : f32 to vector<8x256xf32>
    %135 = arith.mulf %134, %129 : vector<8x256xf32>
    %136 = arith.subf %133, %135 : vector<8x256xf32>
    %cst_43 = arith.constant 1.000000e+00 : f32
    %137 = vector.broadcast %cst_43 : f32 to vector<8x256xf32>
    %138 = arith.cmpf ogt, %136, %137 : vector<8x256xf32>
    %139 = arith.extui %138 : vector<8x256xi1> to vector<8x256xi32>
    %140 = arith.sitofp %139 : vector<8x256xi32> to vector<8x256xf32>
    %cst_44 = arith.constant 0.899999976 : f32
    %141 = vector.broadcast %cst_44 : f32 to vector<8x256xf32>
    %142 = arith.mulf %141, %136 : vector<8x256xf32>
    %143 = vector.extract_strided_slice %6 {offsets = [96, 0], sizes = [8, 256], strides = [1, 1]} : vector<136x256xf32> to vector<8x256xf32>
    %144 = arith.addf %142, %143 : vector<8x256xf32>
    %cst_45 = arith.constant 1.000000e+00 : f32
    %145 = vector.broadcast %cst_45 : f32 to vector<8x256xf32>
    %146 = arith.mulf %145, %140 : vector<8x256xf32>
    %147 = arith.subf %144, %146 : vector<8x256xf32>
    %cst_46 = arith.constant 1.000000e+00 : f32
    %148 = vector.broadcast %cst_46 : f32 to vector<8x256xf32>
    %149 = arith.cmpf ogt, %147, %148 : vector<8x256xf32>
    %150 = arith.extui %149 : vector<8x256xi1> to vector<8x256xi32>
    %151 = arith.sitofp %150 : vector<8x256xi32> to vector<8x256xf32>
    %cst_47 = arith.constant 0.899999976 : f32
    %152 = vector.broadcast %cst_47 : f32 to vector<8x256xf32>
    %153 = arith.mulf %152, %147 : vector<8x256xf32>
    %154 = vector.extract_strided_slice %6 {offsets = [104, 0], sizes = [8, 256], strides = [1, 1]} : vector<136x256xf32> to vector<8x256xf32>
    %155 = arith.addf %153, %154 : vector<8x256xf32>
    %cst_48 = arith.constant 1.000000e+00 : f32
    %156 = vector.broadcast %cst_48 : f32 to vector<8x256xf32>
    %157 = arith.mulf %156, %151 : vector<8x256xf32>
    %158 = arith.subf %155, %157 : vector<8x256xf32>
    %cst_49 = arith.constant 1.000000e+00 : f32
    %159 = vector.broadcast %cst_49 : f32 to vector<8x256xf32>
    %160 = arith.cmpf ogt, %158, %159 : vector<8x256xf32>
    %161 = arith.extui %160 : vector<8x256xi1> to vector<8x256xi32>
    %162 = arith.sitofp %161 : vector<8x256xi32> to vector<8x256xf32>
    %cst_50 = arith.constant 0.899999976 : f32
    %163 = vector.broadcast %cst_50 : f32 to vector<8x256xf32>
    %164 = arith.mulf %163, %158 : vector<8x256xf32>
    %165 = vector.extract_strided_slice %6 {offsets = [112, 0], sizes = [8, 256], strides = [1, 1]} : vector<136x256xf32> to vector<8x256xf32>
    %166 = arith.addf %164, %165 : vector<8x256xf32>
    %cst_51 = arith.constant 1.000000e+00 : f32
    %167 = vector.broadcast %cst_51 : f32 to vector<8x256xf32>
    %168 = arith.mulf %167, %162 : vector<8x256xf32>
    %169 = arith.subf %166, %168 : vector<8x256xf32>
    %cst_52 = arith.constant 1.000000e+00 : f32
    %170 = vector.broadcast %cst_52 : f32 to vector<8x256xf32>
    %171 = arith.cmpf ogt, %169, %170 : vector<8x256xf32>
    %172 = arith.extui %171 : vector<8x256xi1> to vector<8x256xi32>
    %173 = arith.sitofp %172 : vector<8x256xi32> to vector<8x256xf32>
    %cst_53 = arith.constant 0.899999976 : f32
    %174 = vector.broadcast %cst_53 : f32 to vector<8x256xf32>
    %175 = arith.mulf %174, %169 : vector<8x256xf32>
    %176 = vector.extract_strided_slice %6 {offsets = [120, 0], sizes = [8, 256], strides = [1, 1]} : vector<136x256xf32> to vector<8x256xf32>
    %177 = arith.addf %175, %176 : vector<8x256xf32>
    %cst_54 = arith.constant 1.000000e+00 : f32
    %178 = vector.broadcast %cst_54 : f32 to vector<8x256xf32>
    %179 = arith.mulf %178, %173 : vector<8x256xf32>
    %180 = arith.subf %177, %179 : vector<8x256xf32>
    %cst_55 = arith.constant 1.000000e+00 : f32
    %181 = vector.broadcast %cst_55 : f32 to vector<8x256xf32>
    %182 = arith.cmpf ogt, %180, %181 : vector<8x256xf32>
    %183 = arith.extui %182 : vector<8x256xi1> to vector<8x256xi32>
    %184 = arith.sitofp %183 : vector<8x256xi32> to vector<8x256xf32>
    %cst_56 = arith.constant 0.899999976 : f32
    %185 = vector.broadcast %cst_56 : f32 to vector<8x256xf32>
    %186 = arith.mulf %185, %180 : vector<8x256xf32>
    %187 = vector.extract_strided_slice %6 {offsets = [128, 0], sizes = [8, 256], strides = [1, 1]} : vector<136x256xf32> to vector<8x256xf32>
    %188 = arith.addf %186, %187 : vector<8x256xf32>
    %cst_57 = arith.constant 1.000000e+00 : f32
    %189 = vector.broadcast %cst_57 : f32 to vector<8x256xf32>
    %190 = arith.mulf %189, %184 : vector<8x256xf32>
    %191 = arith.subf %188, %190 : vector<8x256xf32>
    %cst_58 = arith.constant 1.000000e+00 : f32
    %192 = vector.broadcast %cst_58 : f32 to vector<8x256xf32>
    %193 = arith.cmpf ogt, %191, %192 : vector<8x256xf32>
    %194 = arith.extui %193 : vector<8x256xi1> to vector<8x256xi32>
    %195 = arith.sitofp %194 : vector<8x256xi32> to vector<8x256xf32>
    %cst_59 = arith.constant 0.000000e+00 : f32
    %196 = vector.broadcast %cst_59 : f32 to vector<40x256xf32>
    %197 = tpu.concatenate %196, %19, %30, %41, %52, %63, %74, %85, %96, %107, %118, %129, %140, %151, %162, %173 in 0 : vector<40x256xf32>, vector<8x256xf32>, vector<8x256xf32>, vector<8x256xf32>, vector<8x256xf32>, vector<8x256xf32>, vector<8x256xf32>, vector<8x256xf32>, vector<8x256xf32>, vector<8x256xf32>, vector<8x256xf32>, vector<8x256xf32>, vector<8x256xf32>, vector<8x256xf32>, vector<8x256xf32>, vector<8x256xf32> -> vector<160x256xf32>
    %198 = tpu.concatenate %184, %195 in 0 : vector<8x256xf32>, vector<8x256xf32> -> vector<16x256xf32>
    %199 = tpu.concatenate %197, %198 in 0 : vector<160x256xf32>, vector<16x256xf32> -> vector<176x256xf32>
    %200 = arith.truncf %199 : vector<176x256xf32> to vector<176x256xbf16>
    %c0_60 = arith.constant 0 : index
    %c0_61 = arith.constant 0 : index
    %201 = vector.load %arg10[%c0_60, %c0_61] : memref<176x256xbf16, #tpu.memory_space<vmem>>, vector<176x256xbf16>
    tpu.vector_store %arg10[%c0_60, %c0_61], %200 {strides = array<i32>} : memref<176x256xbf16, #tpu.memory_space<vmem>>, vector<176x256xbf16>,
    %c0_62 = arith.constant 0 : index
    %c0_63 = arith.constant 0 : index
    %202 = vector.load %arg10[%c0_62, %c0_63] : memref<176x256xbf16, #tpu.memory_space<vmem>>, vector<144x256xbf16>
    %c0_64 = arith.constant 0 : index
    %c0_65 = arith.constant 0 : index
    %c0_66 = arith.constant 0 : index
    %203 = vector.load %arg4[%c0_64, %c0_65, %c0_66] : memref<5x256x256xbf16, #tpu.memory_space<vmem>>, vector<1x256x256xbf16>
    %204 = vector.shape_cast %203 : vector<1x256x256xbf16> to vector<256x256xbf16>
    %cst_67 = arith.constant dense<0.000000e+00> : vector<144x256xf32>
    %205 = tpu.matmul %202, %204, %cst_67 {dimension_numbers = #tpu.dot_dimension_numbers<[1], [0], [0], [1], [0, 0, 1, 1], [], []>} : vector<144x256xbf16>, vector<256x256xbf16>, vector<144x256xf32> -> vector<144x256xf32>
    %c8 = arith.constant 8 : index
    %c0_68 = arith.constant 0 : index
    %206 = vector.load %arg10[%c8, %c0_68] : memref<176x256xbf16, #tpu.memory_space<vmem>>, vector<144x256xbf16>
    %c1 = arith.constant 1 : index
    %c0_69 = arith.constant 0 : index
    %c0_70 = arith.constant 0 : index
    %207 = vector.load %arg4[%c1, %c0_69, %c0_70] : memref<5x256x256xbf16, #tpu.memory_space<vmem>>, vector<1x256x256xbf16>
    %208 = vector.shape_cast %207 : vector<1x256x256xbf16> to vector<256x256xbf16>
    %cst_71 = arith.constant dense<0.000000e+00> : vector<144x256xf32>
    %209 = tpu.matmul %206, %208, %cst_71 {dimension_numbers = #tpu.dot_dimension_numbers<[1], [0], [0], [1], [0, 0, 1, 1], [], []>} : vector<144x256xbf16>, vector<256x256xbf16>, vector<144x256xf32> -> vector<144x256xf32>
    %210 = arith.addf %205, %209 : vector<144x256xf32>
    %c16 = arith.constant 16 : index
    %c0_72 = arith.constant 0 : index
    %211 = vector.load %arg10[%c16, %c0_72] : memref<176x256xbf16, #tpu.memory_space<vmem>>, vector<144x256xbf16>
    %c2 = arith.constant 2 : index
    %c0_73 = arith.constant 0 : index
    %c0_74 = arith.constant 0 : index
    %212 = vector.load %arg4[%c2, %c0_73, %c0_74] : memref<5x256x256xbf16, #tpu.memory_space<vmem>>, vector<1x256x256xbf16>
    %213 = vector.shape_cast %212 : vector<1x256x256xbf16> to vector<256x256xbf16>
    %cst_75 = arith.constant dense<0.000000e+00> : vector<144x256xf32>
    %214 = tpu.matmul %211, %213, %cst_75 {dimension_numbers = #tpu.dot_dimension_numbers<[1], [0], [0], [1], [0, 0, 1, 1], [], []>} : vector<144x256xbf16>, vector<256x256xbf16>, vector<144x256xf32> -> vector<144x256xf32>
    %215 = arith.addf %210, %214 : vector<144x256xf32>
    %c24 = arith.constant 24 : index
    %c0_76 = arith.constant 0 : index
    %216 = vector.load %arg10[%c24, %c0_76] : memref<176x256xbf16, #tpu.memory_space<vmem>>, vector<144x256xbf16>
    %c3 = arith.constant 3 : index
    %c0_77 = arith.constant 0 : index
    %c0_78 = arith.constant 0 : index
    %217 = vector.load %arg4[%c3, %c0_77, %c0_78] : memref<5x256x256xbf16, #tpu.memory_space<vmem>>, vector<1x256x256xbf16>
    %218 = vector.shape_cast %217 : vector<1x256x256xbf16> to vector<256x256xbf16>
    %cst_79 = arith.constant dense<0.000000e+00> : vector<144x256xf32>
    %219 = tpu.matmul %216, %218, %cst_79 {dimension_numbers = #tpu.dot_dimension_numbers<[1], [0], [0], [1], [0, 0, 1, 1], [], []>} : vector<144x256xbf16>, vector<256x256xbf16>, vector<144x256xf32> -> vector<144x256xf32>
    %220 = arith.addf %215, %219 : vector<144x256xf32>
    %c32 = arith.constant 32 : index
    %c0_80 = arith.constant 0 : index
    %221 = vector.load %arg10[%c32, %c0_80] : memref<176x256xbf16, #tpu.memory_space<vmem>>, vector<144x256xbf16>
    %c4 = arith.constant 4 : index
    %c0_81 = arith.constant 0 : index
    %c0_82 = arith.constant 0 : index
    %222 = vector.load %arg4[%c4, %c0_81, %c0_82] : memref<5x256x256xbf16, #tpu.memory_space<vmem>>, vector<1x256x256xbf16>
    %223 = vector.shape_cast %222 : vector<1x256x256xbf16> to vector<256x256xbf16>
    %cst_83 = arith.constant dense<0.000000e+00> : vector<144x256xf32>
    %224 = tpu.matmul %221, %223, %cst_83 {dimension_numbers = #tpu.dot_dimension_numbers<[1], [0], [0], [1], [0, 0, 1, 1], [], []>} : vector<144x256xbf16>, vector<256x256xbf16>, vector<144x256xf32> -> vector<144x256xf32>
    %225 = arith.addf %220, %224 : vector<144x256xf32>
    %c0_84 = arith.constant 0 : index
    %c0_85 = arith.constant 0 : index
    %226 = vector.load %arg5[%c0_84, %c0_85] : memref<1x256xf32, #tpu.memory_space<vmem>>, vector<1x256xf32>
    %227 = vector.broadcast %226 : vector<1x256xf32> to vector<144x256xf32>
    %228 = arith.addf %225, %227 : vector<144x256xf32>
    %cst_86 = arith.constant 0.000000e+00 : f32
    %229 = vector.broadcast %cst_86 : f32 to vector<8x256xf32>
    %cst_87 = arith.constant 0.000000e+00 : f32
    %230 = vector.broadcast %cst_87 : f32 to vector<8x256xf32>
    %cst_88 = arith.constant 0.899999976 : f32
    %231 = vector.broadcast %cst_88 : f32 to vector<8x256xf32>
    %232 = arith.mulf %231, %229 : vector<8x256xf32>
    %233 = vector.extract_strided_slice %228 {offsets = [0, 0], sizes = [8, 256], strides = [1, 1]} : vector<144x256xf32> to vector<8x256xf32>
    %234 = arith.addf %232, %233 : vector<8x256xf32>
    %cst_89 = arith.constant 1.000000e+00 : f32
    %235 = vector.broadcast %cst_89 : f32 to vector<8x256xf32>
    %236 = arith.mulf %235, %230 : vector<8x256xf32>
    %237 = arith.subf %234, %236 : vector<8x256xf32>
    %cst_90 = arith.constant 1.000000e+00 : f32
    %238 = vector.broadcast %cst_90 : f32 to vector<8x256xf32>
    %239 = arith.cmpf ogt, %237, %238 : vector<8x256xf32>
    %240 = arith.extui %239 : vector<8x256xi1> to vector<8x256xi32>
    %241 = arith.sitofp %240 : vector<8x256xi32> to vector<8x256xf32>
    %cst_91 = arith.constant 0.899999976 : f32
    %242 = vector.broadcast %cst_91 : f32 to vector<8x256xf32>
    %243 = arith.mulf %242, %237 : vector<8x256xf32>
    %244 = vector.extract_strided_slice %228 {offsets = [8, 0], sizes = [8, 256], strides = [1, 1]} : vector<144x256xf32> to vector<8x256xf32>
    %245 = arith.addf %243, %244 : vector<8x256xf32>
    %cst_92 = arith.constant 1.000000e+00 : f32
    %246 = vector.broadcast %cst_92 : f32 to vector<8x256xf32>
    %247 = arith.mulf %246, %241 : vector<8x256xf32>
    %248 = arith.subf %245, %247 : vector<8x256xf32>
    %cst_93 = arith.constant 1.000000e+00 : f32
    %249 = vector.broadcast %cst_93 : f32 to vector<8x256xf32>
    %250 = arith.cmpf ogt, %248, %249 : vector<8x256xf32>
    %251 = arith.extui %250 : vector<8x256xi1> to vector<8x256xi32>
    %252 = arith.sitofp %251 : vector<8x256xi32> to vector<8x256xf32>
    %cst_94 = arith.constant 0.899999976 : f32
    %253 = vector.broadcast %cst_94 : f32 to vector<8x256xf32>
    %254 = arith.mulf %253, %248 : vector<8x256xf32>
    %255 = vector.extract_strided_slice %228 {offsets = [16, 0], sizes = [8, 256], strides = [1, 1]} : vector<144x256xf32> to vector<8x256xf32>
    %256 = arith.addf %254, %255 : vector<8x256xf32>
    %cst_95 = arith.constant 1.000000e+00 : f32
    %257 = vector.broadcast %cst_95 : f32 to vector<8x256xf32>
    %258 = arith.mulf %257, %252 : vector<8x256xf32>
    %259 = arith.subf %256, %258 : vector<8x256xf32>
    %cst_96 = arith.constant 1.000000e+00 : f32
    %260 = vector.broadcast %cst_96 : f32 to vector<8x256xf32>
    %261 = arith.cmpf ogt, %259, %260 : vector<8x256xf32>
    %262 = arith.extui %261 : vector<8x256xi1> to vector<8x256xi32>
    %263 = arith.sitofp %262 : vector<8x256xi32> to vector<8x256xf32>
    %cst_97 = arith.constant 0.899999976 : f32
    %264 = vector.broadcast %cst_97 : f32 to vector<8x256xf32>
    %265 = arith.mulf %264, %259 : vector<8x256xf32>
    %266 = vector.extract_strided_slice %228 {offsets = [24, 0], sizes = [8, 256], strides = [1, 1]} : vector<144x256xf32> to vector<8x256xf32>
    %267 = arith.addf %265, %266 : vector<8x256xf32>
    %cst_98 = arith.constant 1.000000e+00 : f32
    %268 = vector.broadcast %cst_98 : f32 to vector<8x256xf32>
    %269 = arith.mulf %268, %263 : vector<8x256xf32>
    %270 = arith.subf %267, %269 : vector<8x256xf32>
    %cst_99 = arith.constant 1.000000e+00 : f32
    %271 = vector.broadcast %cst_99 : f32 to vector<8x256xf32>
    %272 = arith.cmpf ogt, %270, %271 : vector<8x256xf32>
    %273 = arith.extui %272 : vector<8x256xi1> to vector<8x256xi32>
    %274 = arith.sitofp %273 : vector<8x256xi32> to vector<8x256xf32>
    %cst_100 = arith.constant 0.899999976 : f32
    %275 = vector.broadcast %cst_100 : f32 to vector<8x256xf32>
    %276 = arith.mulf %275, %270 : vector<8x256xf32>
    %277 = vector.extract_strided_slice %228 {offsets = [32, 0], sizes = [8, 256], strides = [1, 1]} : vector<144x256xf32> to vector<8x256xf32>
    %278 = arith.addf %276, %277 : vector<8x256xf32>
    %cst_101 = arith.constant 1.000000e+00 : f32
    %279 = vector.broadcast %cst_101 : f32 to vector<8x256xf32>
    %280 = arith.mulf %279, %274 : vector<8x256xf32>
    %281 = arith.subf %278, %280 : vector<8x256xf32>
    %cst_102 = arith.constant 1.000000e+00 : f32
    %282 = vector.broadcast %cst_102 : f32 to vector<8x256xf32>
    %283 = arith.cmpf ogt, %281, %282 : vector<8x256xf32>
    %284 = arith.extui %283 : vector<8x256xi1> to vector<8x256xi32>
    %285 = arith.sitofp %284 : vector<8x256xi32> to vector<8x256xf32>
    %cst_103 = arith.constant 0.899999976 : f32
    %286 = vector.broadcast %cst_103 : f32 to vector<8x256xf32>
    %287 = arith.mulf %286, %281 : vector<8x256xf32>
    %288 = vector.extract_strided_slice %228 {offsets = [40, 0], sizes = [8, 256], strides = [1, 1]} : vector<144x256xf32> to vector<8x256xf32>
    %289 = arith.addf %287, %288 : vector<8x256xf32>
    %cst_104 = arith.constant 1.000000e+00 : f32
    %290 = vector.broadcast %cst_104 : f32 to vector<8x256xf32>
    %291 = arith.mulf %290, %285 : vector<8x256xf32>
    %292 = arith.subf %289, %291 : vector<8x256xf32>
    %cst_105 = arith.constant 1.000000e+00 : f32
    %293 = vector.broadcast %cst_105 : f32 to vector<8x256xf32>
    %294 = arith.cmpf ogt, %292, %293 : vector<8x256xf32>
    %295 = arith.extui %294 : vector<8x256xi1> to vector<8x256xi32>
    %296 = arith.sitofp %295 : vector<8x256xi32> to vector<8x256xf32>
    %cst_106 = arith.constant 0.899999976 : f32
    %297 = vector.broadcast %cst_106 : f32 to vector<8x256xf32>
    %298 = arith.mulf %297, %292 : vector<8x256xf32>
    %299 = vector.extract_strided_slice %228 {offsets = [48, 0], sizes = [8, 256], strides = [1, 1]} : vector<144x256xf32> to vector<8x256xf32>
    %300 = arith.addf %298, %299 : vector<8x256xf32>
    %cst_107 = arith.constant 1.000000e+00 : f32
    %301 = vector.broadcast %cst_107 : f32 to vector<8x256xf32>
    %302 = arith.mulf %301, %296 : vector<8x256xf32>
    %303 = arith.subf %300, %302 : vector<8x256xf32>
    %cst_108 = arith.constant 1.000000e+00 : f32
    %304 = vector.broadcast %cst_108 : f32 to vector<8x256xf32>
    %305 = arith.cmpf ogt, %303, %304 : vector<8x256xf32>
    %306 = arith.extui %305 : vector<8x256xi1> to vector<8x256xi32>
    %307 = arith.sitofp %306 : vector<8x256xi32> to vector<8x256xf32>
    %cst_109 = arith.constant 0.899999976 : f32
    %308 = vector.broadcast %cst_109 : f32 to vector<8x256xf32>
    %309 = arith.mulf %308, %303 : vector<8x256xf32>
    %310 = vector.extract_strided_slice %228 {offsets = [56, 0], sizes = [8, 256], strides = [1, 1]} : vector<144x256xf32> to vector<8x256xf32>
    %311 = arith.addf %309, %310 : vector<8x256xf32>
    %cst_110 = arith.constant 1.000000e+00 : f32
    %312 = vector.broadcast %cst_110 : f32 to vector<8x256xf32>
    %313 = arith.mulf %312, %307 : vector<8x256xf32>
    %314 = arith.subf %311, %313 : vector<8x256xf32>
    %cst_111 = arith.constant 1.000000e+00 : f32
    %315 = vector.broadcast %cst_111 : f32 to vector<8x256xf32>
    %316 = arith.cmpf ogt, %314, %315 : vector<8x256xf32>
    %317 = arith.extui %316 : vector<8x256xi1> to vector<8x256xi32>
    %318 = arith.sitofp %317 : vector<8x256xi32> to vector<8x256xf32>
    %cst_112 = arith.constant 0.899999976 : f32
    %319 = vector.broadcast %cst_112 : f32 to vector<8x256xf32>
    %320 = arith.mulf %319, %314 : vector<8x256xf32>
    %321 = vector.extract_strided_slice %228 {offsets = [64, 0], sizes = [8, 256], strides = [1, 1]} : vector<144x256xf32> to vector<8x256xf32>
    %322 = arith.addf %320, %321 : vector<8x256xf32>
    %cst_113 = arith.constant 1.000000e+00 : f32
    %323 = vector.broadcast %cst_113 : f32 to vector<8x256xf32>
    %324 = arith.mulf %323, %318 : vector<8x256xf32>
    %325 = arith.subf %322, %324 : vector<8x256xf32>
    %cst_114 = arith.constant 1.000000e+00 : f32
    %326 = vector.broadcast %cst_114 : f32 to vector<8x256xf32>
    %327 = arith.cmpf ogt, %325, %326 : vector<8x256xf32>
    %328 = arith.extui %327 : vector<8x256xi1> to vector<8x256xi32>
    %329 = arith.sitofp %328 : vector<8x256xi32> to vector<8x256xf32>
    %cst_115 = arith.constant 0.899999976 : f32
    %330 = vector.broadcast %cst_115 : f32 to vector<8x256xf32>
    %331 = arith.mulf %330, %325 : vector<8x256xf32>
    %332 = vector.extract_strided_slice %228 {offsets = [72, 0], sizes = [8, 256], strides = [1, 1]} : vector<144x256xf32> to vector<8x256xf32>
    %333 = arith.addf %331, %332 : vector<8x256xf32>
    %cst_116 = arith.constant 1.000000e+00 : f32
    %334 = vector.broadcast %cst_116 : f32 to vector<8x256xf32>
    %335 = arith.mulf %334, %329 : vector<8x256xf32>
    %336 = arith.subf %333, %335 : vector<8x256xf32>
    %cst_117 = arith.constant 1.000000e+00 : f32
    %337 = vector.broadcast %cst_117 : f32 to vector<8x256xf32>
    %338 = arith.cmpf ogt, %336, %337 : vector<8x256xf32>
    %339 = arith.extui %338 : vector<8x256xi1> to vector<8x256xi32>
    %340 = arith.sitofp %339 : vector<8x256xi32> to vector<8x256xf32>
    %cst_118 = arith.constant 0.899999976 : f32
    %341 = vector.broadcast %cst_118 : f32 to vector<8x256xf32>
    %342 = arith.mulf %341, %336 : vector<8x256xf32>
    %343 = vector.extract_strided_slice %228 {offsets = [80, 0], sizes = [8, 256], strides = [1, 1]} : vector<144x256xf32> to vector<8x256xf32>
    %344 = arith.addf %342, %343 : vector<8x256xf32>
    %cst_119 = arith.constant 1.000000e+00 : f32
    %345 = vector.broadcast %cst_119 : f32 to vector<8x256xf32>
    %346 = arith.mulf %345, %340 : vector<8x256xf32>
    %347 = arith.subf %344, %346 : vector<8x256xf32>
    %cst_120 = arith.constant 1.000000e+00 : f32
    %348 = vector.broadcast %cst_120 : f32 to vector<8x256xf32>
    %349 = arith.cmpf ogt, %347, %348 : vector<8x256xf32>
    %350 = arith.extui %349 : vector<8x256xi1> to vector<8x256xi32>
    %351 = arith.sitofp %350 : vector<8x256xi32> to vector<8x256xf32>
    %cst_121 = arith.constant 0.899999976 : f32
    %352 = vector.broadcast %cst_121 : f32 to vector<8x256xf32>
    %353 = arith.mulf %352, %347 : vector<8x256xf32>
    %354 = vector.extract_strided_slice %228 {offsets = [88, 0], sizes = [8, 256], strides = [1, 1]} : vector<144x256xf32> to vector<8x256xf32>
    %355 = arith.addf %353, %354 : vector<8x256xf32>
    %cst_122 = arith.constant 1.000000e+00 : f32
    %356 = vector.broadcast %cst_122 : f32 to vector<8x256xf32>
    %357 = arith.mulf %356, %351 : vector<8x256xf32>
    %358 = arith.subf %355, %357 : vector<8x256xf32>
    %cst_123 = arith.constant 1.000000e+00 : f32
    %359 = vector.broadcast %cst_123 : f32 to vector<8x256xf32>
    %360 = arith.cmpf ogt, %358, %359 : vector<8x256xf32>
    %361 = arith.extui %360 : vector<8x256xi1> to vector<8x256xi32>
    %362 = arith.sitofp %361 : vector<8x256xi32> to vector<8x256xf32>
    %cst_124 = arith.constant 0.899999976 : f32
    %363 = vector.broadcast %cst_124 : f32 to vector<8x256xf32>
    %364 = arith.mulf %363, %358 : vector<8x256xf32>
    %365 = vector.extract_strided_slice %228 {offsets = [96, 0], sizes = [8, 256], strides = [1, 1]} : vector<144x256xf32> to vector<8x256xf32>
    %366 = arith.addf %364, %365 : vector<8x256xf32>
    %cst_125 = arith.constant 1.000000e+00 : f32
    %367 = vector.broadcast %cst_125 : f32 to vector<8x256xf32>
    %368 = arith.mulf %367, %362 : vector<8x256xf32>
    %369 = arith.subf %366, %368 : vector<8x256xf32>
    %cst_126 = arith.constant 1.000000e+00 : f32
    %370 = vector.broadcast %cst_126 : f32 to vector<8x256xf32>
    %371 = arith.cmpf ogt, %369, %370 : vector<8x256xf32>
    %372 = arith.extui %371 : vector<8x256xi1> to vector<8x256xi32>
    %373 = arith.sitofp %372 : vector<8x256xi32> to vector<8x256xf32>
    %cst_127 = arith.constant 0.899999976 : f32
    %374 = vector.broadcast %cst_127 : f32 to vector<8x256xf32>
    %375 = arith.mulf %374, %369 : vector<8x256xf32>
    %376 = vector.extract_strided_slice %228 {offsets = [104, 0], sizes = [8, 256], strides = [1, 1]} : vector<144x256xf32> to vector<8x256xf32>
    %377 = arith.addf %375, %376 : vector<8x256xf32>
    %cst_128 = arith.constant 1.000000e+00 : f32
    %378 = vector.broadcast %cst_128 : f32 to vector<8x256xf32>
    %379 = arith.mulf %378, %373 : vector<8x256xf32>
    %380 = arith.subf %377, %379 : vector<8x256xf32>
    %cst_129 = arith.constant 1.000000e+00 : f32
    %381 = vector.broadcast %cst_129 : f32 to vector<8x256xf32>
    %382 = arith.cmpf ogt, %380, %381 : vector<8x256xf32>
    %383 = arith.extui %382 : vector<8x256xi1> to vector<8x256xi32>
    %384 = arith.sitofp %383 : vector<8x256xi32> to vector<8x256xf32>
    %cst_130 = arith.constant 0.899999976 : f32
    %385 = vector.broadcast %cst_130 : f32 to vector<8x256xf32>
    %386 = arith.mulf %385, %380 : vector<8x256xf32>
    %387 = vector.extract_strided_slice %228 {offsets = [112, 0], sizes = [8, 256], strides = [1, 1]} : vector<144x256xf32> to vector<8x256xf32>
    %388 = arith.addf %386, %387 : vector<8x256xf32>
    %cst_131 = arith.constant 1.000000e+00 : f32
    %389 = vector.broadcast %cst_131 : f32 to vector<8x256xf32>
    %390 = arith.mulf %389, %384 : vector<8x256xf32>
    %391 = arith.subf %388, %390 : vector<8x256xf32>
    %cst_132 = arith.constant 1.000000e+00 : f32
    %392 = vector.broadcast %cst_132 : f32 to vector<8x256xf32>
    %393 = arith.cmpf ogt, %391, %392 : vector<8x256xf32>
    %394 = arith.extui %393 : vector<8x256xi1> to vector<8x256xi32>
    %395 = arith.sitofp %394 : vector<8x256xi32> to vector<8x256xf32>
    %cst_133 = arith.constant 0.899999976 : f32
    %396 = vector.broadcast %cst_133 : f32 to vector<8x256xf32>
    %397 = arith.mulf %396, %391 : vector<8x256xf32>
    %398 = vector.extract_strided_slice %228 {offsets = [120, 0], sizes = [8, 256], strides = [1, 1]} : vector<144x256xf32> to vector<8x256xf32>
    %399 = arith.addf %397, %398 : vector<8x256xf32>
    %cst_134 = arith.constant 1.000000e+00 : f32
    %400 = vector.broadcast %cst_134 : f32 to vector<8x256xf32>
    %401 = arith.mulf %400, %395 : vector<8x256xf32>
    %402 = arith.subf %399, %401 : vector<8x256xf32>
    %cst_135 = arith.constant 1.000000e+00 : f32
    %403 = vector.broadcast %cst_135 : f32 to vector<8x256xf32>
    %404 = arith.cmpf ogt, %402, %403 : vector<8x256xf32>
    %405 = arith.extui %404 : vector<8x256xi1> to vector<8x256xi32>
    %406 = arith.sitofp %405 : vector<8x256xi32> to vector<8x256xf32>
    %cst_136 = arith.constant 0.899999976 : f32
    %407 = vector.broadcast %cst_136 : f32 to vector<8x256xf32>
    %408 = arith.mulf %407, %402 : vector<8x256xf32>
    %409 = vector.extract_strided_slice %228 {offsets = [128, 0], sizes = [8, 256], strides = [1, 1]} : vector<144x256xf32> to vector<8x256xf32>
    %410 = arith.addf %408, %409 : vector<8x256xf32>
    %cst_137 = arith.constant 1.000000e+00 : f32
    %411 = vector.broadcast %cst_137 : f32 to vector<8x256xf32>
    %412 = arith.mulf %411, %406 : vector<8x256xf32>
    %413 = arith.subf %410, %412 : vector<8x256xf32>
    %cst_138 = arith.constant 1.000000e+00 : f32
    %414 = vector.broadcast %cst_138 : f32 to vector<8x256xf32>
    %415 = arith.cmpf ogt, %413, %414 : vector<8x256xf32>
    %416 = arith.extui %415 : vector<8x256xi1> to vector<8x256xi32>
    %417 = arith.sitofp %416 : vector<8x256xi32> to vector<8x256xf32>
    %cst_139 = arith.constant 0.899999976 : f32
    %418 = vector.broadcast %cst_139 : f32 to vector<8x256xf32>
    %419 = arith.mulf %418, %413 : vector<8x256xf32>
    %420 = vector.extract_strided_slice %228 {offsets = [136, 0], sizes = [8, 256], strides = [1, 1]} : vector<144x256xf32> to vector<8x256xf32>
    %421 = arith.addf %419, %420 : vector<8x256xf32>
    %cst_140 = arith.constant 1.000000e+00 : f32
    %422 = vector.broadcast %cst_140 : f32 to vector<8x256xf32>
    %423 = arith.mulf %422, %417 : vector<8x256xf32>
    %424 = arith.subf %421, %423 : vector<8x256xf32>
    %cst_141 = arith.constant 1.000000e+00 : f32
    %425 = vector.broadcast %cst_141 : f32 to vector<8x256xf32>
    %426 = arith.cmpf ogt, %424, %425 : vector<8x256xf32>
    %427 = arith.extui %426 : vector<8x256xi1> to vector<8x256xi32>
    %428 = arith.sitofp %427 : vector<8x256xi32> to vector<8x256xf32>
    %cst_142 = arith.constant 0.000000e+00 : f32
    %429 = vector.broadcast %cst_142 : f32 to vector<40x256xf32>
    %430 = tpu.concatenate %429, %241, %252, %263, %274, %285, %296, %307, %318, %329, %340, %351, %362, %373, %384, %395 in 0 : vector<40x256xf32>, vector<8x256xf32>, vector<8x256xf32>, vector<8x256xf32>, vector<8x256xf32>, vector<8x256xf32>, vector<8x256xf32>, vector<8x256xf32>, vector<8x256xf32>, vector<8x256xf32>, vector<8x256xf32>, vector<8x256xf32>, vector<8x256xf32>, vector<8x256xf32>, vector<8x256xf32>, vector<8x256xf32> -> vector<160x256xf32>
    %431 = tpu.concatenate %406, %417, %428 in 0 : vector<8x256xf32>, vector<8x256xf32>, vector<8x256xf32> -> vector<24x256xf32>
    %432 = tpu.concatenate %430, %431 in 0 : vector<160x256xf32>, vector<24x256xf32> -> vector<184x256xf32>
    %433 = arith.truncf %432 : vector<184x256xf32> to vector<184x256xbf16>
    %c0_143 = arith.constant 0 : index
    %c0_144 = arith.constant 0 : index
    %434 = vector.load %arg11[%c0_143, %c0_144] : memref<184x256xbf16, #tpu.memory_space<vmem>>, vector<184x256xbf16>
    tpu.vector_store %arg11[%c0_143, %c0_144], %433 {strides = array<i32>} : memref<184x256xbf16, #tpu.memory_space<vmem>>, vector<184x256xbf16>,
    %c0_145 = arith.constant 0 : index
    %c0_146 = arith.constant 0 : index
    %435 = vector.load %arg11[%c0_145, %c0_146] : memref<184x256xbf16, #tpu.memory_space<vmem>>, vector<152x256xbf16>
    %c0_147 = arith.constant 0 : index
    %c0_148 = arith.constant 0 : index
    %c0_149 = arith.constant 0 : index
    %436 = vector.load %arg6[%c0_147, %c0_148, %c0_149] : memref<5x256x128xbf16, #tpu.memory_space<vmem>>, vector<1x256x128xbf16>
    %437 = vector.shape_cast %436 : vector<1x256x128xbf16> to vector<256x128xbf16>
    %cst_150 = arith.constant dense<0.000000e+00> : vector<152x128xf32>
    %438 = tpu.matmul %435, %437, %cst_150 {dimension_numbers = #tpu.dot_dimension_numbers<[1], [0], [0], [1], [0, 0, 1, 1], [], []>} : vector<152x256xbf16>, vector<256x128xbf16>, vector<152x128xf32> -> vector<152x128xf32>
    %c8_151 = arith.constant 8 : index
    %c0_152 = arith.constant 0 : index
    %439 = vector.load %arg11[%c8_151, %c0_152] : memref<184x256xbf16, #tpu.memory_space<vmem>>, vector<152x256xbf16>
    %c1_153 = arith.constant 1 : index
    %c0_154 = arith.constant 0 : index
    %c0_155 = arith.constant 0 : index
    %440 = vector.load %arg6[%c1_153, %c0_154, %c0_155] : memref<5x256x128xbf16, #tpu.memory_space<vmem>>, vector<1x256x128xbf16>
    %441 = vector.shape_cast %440 : vector<1x256x128xbf16> to vector<256x128xbf16>
    %cst_156 = arith.constant dense<0.000000e+00> : vector<152x128xf32>
    %442 = tpu.matmul %439, %441, %cst_156 {dimension_numbers = #tpu.dot_dimension_numbers<[1], [0], [0], [1], [0, 0, 1, 1], [], []>} : vector<152x256xbf16>, vector<256x128xbf16>, vector<152x128xf32> -> vector<152x128xf32>
    %443 = arith.addf %438, %442 : vector<152x128xf32>
    %c16_157 = arith.constant 16 : index
    %c0_158 = arith.constant 0 : index
    %444 = vector.load %arg11[%c16_157, %c0_158] : memref<184x256xbf16, #tpu.memory_space<vmem>>, vector<152x256xbf16>
    %c2_159 = arith.constant 2 : index
    %c0_160 = arith.constant 0 : index
    %c0_161 = arith.constant 0 : index
    %445 = vector.load %arg6[%c2_159, %c0_160, %c0_161] : memref<5x256x128xbf16, #tpu.memory_space<vmem>>, vector<1x256x128xbf16>
    %446 = vector.shape_cast %445 : vector<1x256x128xbf16> to vector<256x128xbf16>
    %cst_162 = arith.constant dense<0.000000e+00> : vector<152x128xf32>
    %447 = tpu.matmul %444, %446, %cst_162 {dimension_numbers = #tpu.dot_dimension_numbers<[1], [0], [0], [1], [0, 0, 1, 1], [], []>} : vector<152x256xbf16>, vector<256x128xbf16>, vector<152x128xf32> -> vector<152x128xf32>
    %448 = arith.addf %443, %447 : vector<152x128xf32>
    %c24_163 = arith.constant 24 : index
    %c0_164 = arith.constant 0 : index
    %449 = vector.load %arg11[%c24_163, %c0_164] : memref<184x256xbf16, #tpu.memory_space<vmem>>, vector<152x256xbf16>
    %c3_165 = arith.constant 3 : index
    %c0_166 = arith.constant 0 : index
    %c0_167 = arith.constant 0 : index
    %450 = vector.load %arg6[%c3_165, %c0_166, %c0_167] : memref<5x256x128xbf16, #tpu.memory_space<vmem>>, vector<1x256x128xbf16>
    %451 = vector.shape_cast %450 : vector<1x256x128xbf16> to vector<256x128xbf16>
    %cst_168 = arith.constant dense<0.000000e+00> : vector<152x128xf32>
    %452 = tpu.matmul %449, %451, %cst_168 {dimension_numbers = #tpu.dot_dimension_numbers<[1], [0], [0], [1], [0, 0, 1, 1], [], []>} : vector<152x256xbf16>, vector<256x128xbf16>, vector<152x128xf32> -> vector<152x128xf32>
    %453 = arith.addf %448, %452 : vector<152x128xf32>
    %c32_169 = arith.constant 32 : index
    %c0_170 = arith.constant 0 : index
    %454 = vector.load %arg11[%c32_169, %c0_170] : memref<184x256xbf16, #tpu.memory_space<vmem>>, vector<152x256xbf16>
    %c4_171 = arith.constant 4 : index
    %c0_172 = arith.constant 0 : index
    %c0_173 = arith.constant 0 : index
    %455 = vector.load %arg6[%c4_171, %c0_172, %c0_173] : memref<5x256x128xbf16, #tpu.memory_space<vmem>>, vector<1x256x128xbf16>
    %456 = vector.shape_cast %455 : vector<1x256x128xbf16> to vector<256x128xbf16>
    %cst_174 = arith.constant dense<0.000000e+00> : vector<152x128xf32>
    %457 = tpu.matmul %454, %456, %cst_174 {dimension_numbers = #tpu.dot_dimension_numbers<[1], [0], [0], [1], [0, 0, 1, 1], [], []>} : vector<152x256xbf16>, vector<256x128xbf16>, vector<152x128xf32> -> vector<152x128xf32>
    %458 = arith.addf %453, %457 : vector<152x128xf32>
    %c0_175 = arith.constant 0 : index
    %c0_176 = arith.constant 0 : index
    %459 = vector.load %arg7[%c0_175, %c0_176] : memref<1x128xf32, #tpu.memory_space<vmem>>, vector<1x128xf32>
    %460 = vector.broadcast %459 : vector<1x128xf32> to vector<152x128xf32>
    %461 = arith.addf %458, %460 : vector<152x128xf32>
    %cst_177 = arith.constant 0.000000e+00 : f32
    %462 = vector.broadcast %cst_177 : f32 to vector<8x128xf32>
    %cst_178 = arith.constant 0.000000e+00 : f32
    %463 = vector.broadcast %cst_178 : f32 to vector<8x128xf32>
    %cst_179 = arith.constant 0.899999976 : f32
    %464 = vector.broadcast %cst_179 : f32 to vector<8x128xf32>
    %465 = arith.mulf %464, %462 : vector<8x128xf32>
    %466 = vector.extract_strided_slice %461 {offsets = [0, 0], sizes = [8, 128], strides = [1, 1]} : vector<152x128xf32> to vector<8x128xf32>
    %467 = arith.addf %465, %466 : vector<8x128xf32>
    %cst_180 = arith.constant 1.000000e+00 : f32
    %468 = vector.broadcast %cst_180 : f32 to vector<8x128xf32>
    %469 = arith.mulf %468, %463 : vector<8x128xf32>
    %470 = arith.subf %467, %469 : vector<8x128xf32>
    %cst_181 = arith.constant 1.000000e+00 : f32
    %471 = vector.broadcast %cst_181 : f32 to vector<8x128xf32>
    %472 = arith.cmpf ogt, %470, %471 : vector<8x128xf32>
    %473 = arith.extui %472 : vector<8x128xi1> to vector<8x128xi32>
    %474 = arith.sitofp %473 : vector<8x128xi32> to vector<8x128xf32>
    %cst_182 = arith.constant 0.899999976 : f32
    %475 = vector.broadcast %cst_182 : f32 to vector<8x128xf32>
    %476 = arith.mulf %475, %470 : vector<8x128xf32>
    %477 = vector.extract_strided_slice %461 {offsets = [8, 0], sizes = [8, 128], strides = [1, 1]} : vector<152x128xf32> to vector<8x128xf32>
    %478 = arith.addf %476, %477 : vector<8x128xf32>
    %cst_183 = arith.constant 1.000000e+00 : f32
    %479 = vector.broadcast %cst_183 : f32 to vector<8x128xf32>
    %480 = arith.mulf %479, %474 : vector<8x128xf32>
    %481 = arith.subf %478, %480 : vector<8x128xf32>
    %cst_184 = arith.constant 1.000000e+00 : f32
    %482 = vector.broadcast %cst_184 : f32 to vector<8x128xf32>
    %483 = arith.cmpf ogt, %481, %482 : vector<8x128xf32>
    %484 = arith.extui %483 : vector<8x128xi1> to vector<8x128xi32>
    %485 = arith.sitofp %484 : vector<8x128xi32> to vector<8x128xf32>
    %cst_185 = arith.constant 0.899999976 : f32
    %486 = vector.broadcast %cst_185 : f32 to vector<8x128xf32>
    %487 = arith.mulf %486, %481 : vector<8x128xf32>
    %488 = vector.extract_strided_slice %461 {offsets = [16, 0], sizes = [8, 128], strides = [1, 1]} : vector<152x128xf32> to vector<8x128xf32>
    %489 = arith.addf %487, %488 : vector<8x128xf32>
    %cst_186 = arith.constant 1.000000e+00 : f32
    %490 = vector.broadcast %cst_186 : f32 to vector<8x128xf32>
    %491 = arith.mulf %490, %485 : vector<8x128xf32>
    %492 = arith.subf %489, %491 : vector<8x128xf32>
    %cst_187 = arith.constant 1.000000e+00 : f32
    %493 = vector.broadcast %cst_187 : f32 to vector<8x128xf32>
    %494 = arith.cmpf ogt, %492, %493 : vector<8x128xf32>
    %495 = arith.extui %494 : vector<8x128xi1> to vector<8x128xi32>
    %496 = arith.sitofp %495 : vector<8x128xi32> to vector<8x128xf32>
    %cst_188 = arith.constant 0.899999976 : f32
    %497 = vector.broadcast %cst_188 : f32 to vector<8x128xf32>
    %498 = arith.mulf %497, %492 : vector<8x128xf32>
    %499 = vector.extract_strided_slice %461 {offsets = [24, 0], sizes = [8, 128], strides = [1, 1]} : vector<152x128xf32> to vector<8x128xf32>
    %500 = arith.addf %498, %499 : vector<8x128xf32>
    %cst_189 = arith.constant 1.000000e+00 : f32
    %501 = vector.broadcast %cst_189 : f32 to vector<8x128xf32>
    %502 = arith.mulf %501, %496 : vector<8x128xf32>
    %503 = arith.subf %500, %502 : vector<8x128xf32>
    %cst_190 = arith.constant 1.000000e+00 : f32
    %504 = vector.broadcast %cst_190 : f32 to vector<8x128xf32>
    %505 = arith.cmpf ogt, %503, %504 : vector<8x128xf32>
    %506 = arith.extui %505 : vector<8x128xi1> to vector<8x128xi32>
    %507 = arith.sitofp %506 : vector<8x128xi32> to vector<8x128xf32>
    %cst_191 = arith.constant 0.899999976 : f32
    %508 = vector.broadcast %cst_191 : f32 to vector<8x128xf32>
    %509 = arith.mulf %508, %503 : vector<8x128xf32>
    %510 = vector.extract_strided_slice %461 {offsets = [32, 0], sizes = [8, 128], strides = [1, 1]} : vector<152x128xf32> to vector<8x128xf32>
    %511 = arith.addf %509, %510 : vector<8x128xf32>
    %cst_192 = arith.constant 1.000000e+00 : f32
    %512 = vector.broadcast %cst_192 : f32 to vector<8x128xf32>
    %513 = arith.mulf %512, %507 : vector<8x128xf32>
    %514 = arith.subf %511, %513 : vector<8x128xf32>
    %cst_193 = arith.constant 1.000000e+00 : f32
    %515 = vector.broadcast %cst_193 : f32 to vector<8x128xf32>
    %516 = arith.cmpf ogt, %514, %515 : vector<8x128xf32>
    %517 = arith.extui %516 : vector<8x128xi1> to vector<8x128xi32>
    %518 = arith.sitofp %517 : vector<8x128xi32> to vector<8x128xf32>
    %cst_194 = arith.constant 0.899999976 : f32
    %519 = vector.broadcast %cst_194 : f32 to vector<8x128xf32>
    %520 = arith.mulf %519, %514 : vector<8x128xf32>
    %521 = vector.extract_strided_slice %461 {offsets = [40, 0], sizes = [8, 128], strides = [1, 1]} : vector<152x128xf32> to vector<8x128xf32>
    %522 = arith.addf %520, %521 : vector<8x128xf32>
    %cst_195 = arith.constant 1.000000e+00 : f32
    %523 = vector.broadcast %cst_195 : f32 to vector<8x128xf32>
    %524 = arith.mulf %523, %518 : vector<8x128xf32>
    %525 = arith.subf %522, %524 : vector<8x128xf32>
    %cst_196 = arith.constant 1.000000e+00 : f32
    %526 = vector.broadcast %cst_196 : f32 to vector<8x128xf32>
    %527 = arith.cmpf ogt, %525, %526 : vector<8x128xf32>
    %528 = arith.extui %527 : vector<8x128xi1> to vector<8x128xi32>
    %529 = arith.sitofp %528 : vector<8x128xi32> to vector<8x128xf32>
    %cst_197 = arith.constant 0.899999976 : f32
    %530 = vector.broadcast %cst_197 : f32 to vector<8x128xf32>
    %531 = arith.mulf %530, %525 : vector<8x128xf32>
    %532 = vector.extract_strided_slice %461 {offsets = [48, 0], sizes = [8, 128], strides = [1, 1]} : vector<152x128xf32> to vector<8x128xf32>
    %533 = arith.addf %531, %532 : vector<8x128xf32>
    %cst_198 = arith.constant 1.000000e+00 : f32
    %534 = vector.broadcast %cst_198 : f32 to vector<8x128xf32>
    %535 = arith.mulf %534, %529 : vector<8x128xf32>
    %536 = arith.subf %533, %535 : vector<8x128xf32>
    %cst_199 = arith.constant 1.000000e+00 : f32
    %537 = vector.broadcast %cst_199 : f32 to vector<8x128xf32>
    %538 = arith.cmpf ogt, %536, %537 : vector<8x128xf32>
    %539 = arith.extui %538 : vector<8x128xi1> to vector<8x128xi32>
    %540 = arith.sitofp %539 : vector<8x128xi32> to vector<8x128xf32>
    %cst_200 = arith.constant 0.899999976 : f32
    %541 = vector.broadcast %cst_200 : f32 to vector<8x128xf32>
    %542 = arith.mulf %541, %536 : vector<8x128xf32>
    %543 = vector.extract_strided_slice %461 {offsets = [56, 0], sizes = [8, 128], strides = [1, 1]} : vector<152x128xf32> to vector<8x128xf32>
    %544 = arith.addf %542, %543 : vector<8x128xf32>
    %cst_201 = arith.constant 1.000000e+00 : f32
    %545 = vector.broadcast %cst_201 : f32 to vector<8x128xf32>
    %546 = arith.mulf %545, %540 : vector<8x128xf32>
    %547 = arith.subf %544, %546 : vector<8x128xf32>
    %cst_202 = arith.constant 1.000000e+00 : f32
    %548 = vector.broadcast %cst_202 : f32 to vector<8x128xf32>
    %549 = arith.cmpf ogt, %547, %548 : vector<8x128xf32>
    %550 = arith.extui %549 : vector<8x128xi1> to vector<8x128xi32>
    %551 = arith.sitofp %550 : vector<8x128xi32> to vector<8x128xf32>
    %cst_203 = arith.constant 0.899999976 : f32
    %552 = vector.broadcast %cst_203 : f32 to vector<8x128xf32>
    %553 = arith.mulf %552, %547 : vector<8x128xf32>
    %554 = vector.extract_strided_slice %461 {offsets = [64, 0], sizes = [8, 128], strides = [1, 1]} : vector<152x128xf32> to vector<8x128xf32>
    %555 = arith.addf %553, %554 : vector<8x128xf32>
    %cst_204 = arith.constant 1.000000e+00 : f32
    %556 = vector.broadcast %cst_204 : f32 to vector<8x128xf32>
    %557 = arith.mulf %556, %551 : vector<8x128xf32>
    %558 = arith.subf %555, %557 : vector<8x128xf32>
    %cst_205 = arith.constant 1.000000e+00 : f32
    %559 = vector.broadcast %cst_205 : f32 to vector<8x128xf32>
    %560 = arith.cmpf ogt, %558, %559 : vector<8x128xf32>
    %561 = arith.extui %560 : vector<8x128xi1> to vector<8x128xi32>
    %562 = arith.sitofp %561 : vector<8x128xi32> to vector<8x128xf32>
    %cst_206 = arith.constant 0.899999976 : f32
    %563 = vector.broadcast %cst_206 : f32 to vector<8x128xf32>
    %564 = arith.mulf %563, %558 : vector<8x128xf32>
    %565 = vector.extract_strided_slice %461 {offsets = [72, 0], sizes = [8, 128], strides = [1, 1]} : vector<152x128xf32> to vector<8x128xf32>
    %566 = arith.addf %564, %565 : vector<8x128xf32>
    %cst_207 = arith.constant 1.000000e+00 : f32
    %567 = vector.broadcast %cst_207 : f32 to vector<8x128xf32>
    %568 = arith.mulf %567, %562 : vector<8x128xf32>
    %569 = arith.subf %566, %568 : vector<8x128xf32>
    %cst_208 = arith.constant 1.000000e+00 : f32
    %570 = vector.broadcast %cst_208 : f32 to vector<8x128xf32>
    %571 = arith.cmpf ogt, %569, %570 : vector<8x128xf32>
    %572 = arith.extui %571 : vector<8x128xi1> to vector<8x128xi32>
    %573 = arith.sitofp %572 : vector<8x128xi32> to vector<8x128xf32>
    %cst_209 = arith.constant 0.899999976 : f32
    %574 = vector.broadcast %cst_209 : f32 to vector<8x128xf32>
    %575 = arith.mulf %574, %569 : vector<8x128xf32>
    %576 = vector.extract_strided_slice %461 {offsets = [80, 0], sizes = [8, 128], strides = [1, 1]} : vector<152x128xf32> to vector<8x128xf32>
    %577 = arith.addf %575, %576 : vector<8x128xf32>
    %cst_210 = arith.constant 1.000000e+00 : f32
    %578 = vector.broadcast %cst_210 : f32 to vector<8x128xf32>
    %579 = arith.mulf %578, %573 : vector<8x128xf32>
    %580 = arith.subf %577, %579 : vector<8x128xf32>
    %cst_211 = arith.constant 1.000000e+00 : f32
    %581 = vector.broadcast %cst_211 : f32 to vector<8x128xf32>
    %582 = arith.cmpf ogt, %580, %581 : vector<8x128xf32>
    %583 = arith.extui %582 : vector<8x128xi1> to vector<8x128xi32>
    %584 = arith.sitofp %583 : vector<8x128xi32> to vector<8x128xf32>
    %cst_212 = arith.constant 0.899999976 : f32
    %585 = vector.broadcast %cst_212 : f32 to vector<8x128xf32>
    %586 = arith.mulf %585, %580 : vector<8x128xf32>
    %587 = vector.extract_strided_slice %461 {offsets = [88, 0], sizes = [8, 128], strides = [1, 1]} : vector<152x128xf32> to vector<8x128xf32>
    %588 = arith.addf %586, %587 : vector<8x128xf32>
    %cst_213 = arith.constant 1.000000e+00 : f32
    %589 = vector.broadcast %cst_213 : f32 to vector<8x128xf32>
    %590 = arith.mulf %589, %584 : vector<8x128xf32>
    %591 = arith.subf %588, %590 : vector<8x128xf32>
    %cst_214 = arith.constant 1.000000e+00 : f32
    %592 = vector.broadcast %cst_214 : f32 to vector<8x128xf32>
    %593 = arith.cmpf ogt, %591, %592 : vector<8x128xf32>
    %594 = arith.extui %593 : vector<8x128xi1> to vector<8x128xi32>
    %595 = arith.sitofp %594 : vector<8x128xi32> to vector<8x128xf32>
    %cst_215 = arith.constant 0.899999976 : f32
    %596 = vector.broadcast %cst_215 : f32 to vector<8x128xf32>
    %597 = arith.mulf %596, %591 : vector<8x128xf32>
    %598 = vector.extract_strided_slice %461 {offsets = [96, 0], sizes = [8, 128], strides = [1, 1]} : vector<152x128xf32> to vector<8x128xf32>
    %599 = arith.addf %597, %598 : vector<8x128xf32>
    %cst_216 = arith.constant 1.000000e+00 : f32
    %600 = vector.broadcast %cst_216 : f32 to vector<8x128xf32>
    %601 = arith.mulf %600, %595 : vector<8x128xf32>
    %602 = arith.subf %599, %601 : vector<8x128xf32>
    %cst_217 = arith.constant 1.000000e+00 : f32
    %603 = vector.broadcast %cst_217 : f32 to vector<8x128xf32>
    %604 = arith.cmpf ogt, %602, %603 : vector<8x128xf32>
    %605 = arith.extui %604 : vector<8x128xi1> to vector<8x128xi32>
    %606 = arith.sitofp %605 : vector<8x128xi32> to vector<8x128xf32>
    %cst_218 = arith.constant 0.899999976 : f32
    %607 = vector.broadcast %cst_218 : f32 to vector<8x128xf32>
    %608 = arith.mulf %607, %602 : vector<8x128xf32>
    %609 = vector.extract_strided_slice %461 {offsets = [104, 0], sizes = [8, 128], strides = [1, 1]} : vector<152x128xf32> to vector<8x128xf32>
    %610 = arith.addf %608, %609 : vector<8x128xf32>
    %cst_219 = arith.constant 1.000000e+00 : f32
    %611 = vector.broadcast %cst_219 : f32 to vector<8x128xf32>
    %612 = arith.mulf %611, %606 : vector<8x128xf32>
    %613 = arith.subf %610, %612 : vector<8x128xf32>
    %cst_220 = arith.constant 1.000000e+00 : f32
    %614 = vector.broadcast %cst_220 : f32 to vector<8x128xf32>
    %615 = arith.cmpf ogt, %613, %614 : vector<8x128xf32>
    %616 = arith.extui %615 : vector<8x128xi1> to vector<8x128xi32>
    %617 = arith.sitofp %616 : vector<8x128xi32> to vector<8x128xf32>
    %cst_221 = arith.constant 0.899999976 : f32
    %618 = vector.broadcast %cst_221 : f32 to vector<8x128xf32>
    %619 = arith.mulf %618, %613 : vector<8x128xf32>
    %620 = vector.extract_strided_slice %461 {offsets = [112, 0], sizes = [8, 128], strides = [1, 1]} : vector<152x128xf32> to vector<8x128xf32>
    %621 = arith.addf %619, %620 : vector<8x128xf32>
    %cst_222 = arith.constant 1.000000e+00 : f32
    %622 = vector.broadcast %cst_222 : f32 to vector<8x128xf32>
    %623 = arith.mulf %622, %617 : vector<8x128xf32>
    %624 = arith.subf %621, %623 : vector<8x128xf32>
    %cst_223 = arith.constant 1.000000e+00 : f32
    %625 = vector.broadcast %cst_223 : f32 to vector<8x128xf32>
    %626 = arith.cmpf ogt, %624, %625 : vector<8x128xf32>
    %627 = arith.extui %626 : vector<8x128xi1> to vector<8x128xi32>
    %628 = arith.sitofp %627 : vector<8x128xi32> to vector<8x128xf32>
    %cst_224 = arith.constant 0.899999976 : f32
    %629 = vector.broadcast %cst_224 : f32 to vector<8x128xf32>
    %630 = arith.mulf %629, %624 : vector<8x128xf32>
    %631 = vector.extract_strided_slice %461 {offsets = [120, 0], sizes = [8, 128], strides = [1, 1]} : vector<152x128xf32> to vector<8x128xf32>
    %632 = arith.addf %630, %631 : vector<8x128xf32>
    %cst_225 = arith.constant 1.000000e+00 : f32
    %633 = vector.broadcast %cst_225 : f32 to vector<8x128xf32>
    %634 = arith.mulf %633, %628 : vector<8x128xf32>
    %635 = arith.subf %632, %634 : vector<8x128xf32>
    %cst_226 = arith.constant 1.000000e+00 : f32
    %636 = vector.broadcast %cst_226 : f32 to vector<8x128xf32>
    %637 = arith.cmpf ogt, %635, %636 : vector<8x128xf32>
    %638 = arith.extui %637 : vector<8x128xi1> to vector<8x128xi32>
    %639 = arith.sitofp %638 : vector<8x128xi32> to vector<8x128xf32>
    %cst_227 = arith.constant 0.899999976 : f32
    %640 = vector.broadcast %cst_227 : f32 to vector<8x128xf32>
    %641 = arith.mulf %640, %635 : vector<8x128xf32>
    %642 = vector.extract_strided_slice %461 {offsets = [128, 0], sizes = [8, 128], strides = [1, 1]} : vector<152x128xf32> to vector<8x128xf32>
    %643 = arith.addf %641, %642 : vector<8x128xf32>
    %cst_228 = arith.constant 1.000000e+00 : f32
    %644 = vector.broadcast %cst_228 : f32 to vector<8x128xf32>
    %645 = arith.mulf %644, %639 : vector<8x128xf32>
    %646 = arith.subf %643, %645 : vector<8x128xf32>
    %cst_229 = arith.constant 1.000000e+00 : f32
    %647 = vector.broadcast %cst_229 : f32 to vector<8x128xf32>
    %648 = arith.cmpf ogt, %646, %647 : vector<8x128xf32>
    %649 = arith.extui %648 : vector<8x128xi1> to vector<8x128xi32>
    %650 = arith.sitofp %649 : vector<8x128xi32> to vector<8x128xf32>
    %cst_230 = arith.constant 0.899999976 : f32
    %651 = vector.broadcast %cst_230 : f32 to vector<8x128xf32>
    %652 = arith.mulf %651, %646 : vector<8x128xf32>
    %653 = vector.extract_strided_slice %461 {offsets = [136, 0], sizes = [8, 128], strides = [1, 1]} : vector<152x128xf32> to vector<8x128xf32>
    %654 = arith.addf %652, %653 : vector<8x128xf32>
    %cst_231 = arith.constant 1.000000e+00 : f32
    %655 = vector.broadcast %cst_231 : f32 to vector<8x128xf32>
    %656 = arith.mulf %655, %650 : vector<8x128xf32>
    %657 = arith.subf %654, %656 : vector<8x128xf32>
    %cst_232 = arith.constant 1.000000e+00 : f32
    %658 = vector.broadcast %cst_232 : f32 to vector<8x128xf32>
    %659 = arith.cmpf ogt, %657, %658 : vector<8x128xf32>
    %660 = arith.extui %659 : vector<8x128xi1> to vector<8x128xi32>
    %661 = arith.sitofp %660 : vector<8x128xi32> to vector<8x128xf32>
    %cst_233 = arith.constant 0.899999976 : f32
    %662 = vector.broadcast %cst_233 : f32 to vector<8x128xf32>
    %663 = arith.mulf %662, %657 : vector<8x128xf32>
    %664 = vector.extract_strided_slice %461 {offsets = [144, 0], sizes = [8, 128], strides = [1, 1]} : vector<152x128xf32> to vector<8x128xf32>
    %665 = arith.addf %663, %664 : vector<8x128xf32>
    %cst_234 = arith.constant 1.000000e+00 : f32
    %666 = vector.broadcast %cst_234 : f32 to vector<8x128xf32>
    %667 = arith.mulf %666, %661 : vector<8x128xf32>
    %668 = arith.subf %665, %667 : vector<8x128xf32>
    %cst_235 = arith.constant 1.000000e+00 : f32
    %669 = vector.broadcast %cst_235 : f32 to vector<8x128xf32>
    %670 = arith.cmpf ogt, %668, %669 : vector<8x128xf32>
    %671 = arith.extui %670 : vector<8x128xi1> to vector<8x128xi32>
    %672 = arith.sitofp %671 : vector<8x128xi32> to vector<8x128xf32>
    %673 = tpu.concatenate %474, %485, %496, %507, %518, %529, %540, %551, %562, %573, %584, %595, %606, %617, %628, %639 in 0 : vector<8x128xf32>, vector<8x128xf32>, vector<8x128xf32>, vector<8x128xf32>, vector<8x128xf32>, vector<8x128xf32>, vector<8x128xf32>, vector<8x128xf32>, vector<8x128xf32>, vector<8x128xf32>, vector<8x128xf32>, vector<8x128xf32>, vector<8x128xf32>, vector<8x128xf32>, vector<8x128xf32>, vector<8x128xf32> -> vector<128x128xf32>
    %674 = tpu.concatenate %650, %661, %672 in 0 : vector<8x128xf32>, vector<8x128xf32>, vector<8x128xf32> -> vector<24x128xf32>
    %675 = tpu.concatenate %673, %674 in 0 : vector<128x128xf32>, vector<24x128xf32> -> vector<152x128xf32>
    %c0_236 = arith.constant 0 : index
    %c0_237 = arith.constant 0 : index
    %c0_238 = arith.constant 0 : index
    %676 = vector.load %arg8[%c0_236, %c0_237, %c0_238] : memref<1x152x128xf32, #tpu.memory_space<vmem>>, vector<1x152x128xf32>
    %677 = vector.shape_cast %676 : vector<1x152x128xf32> to vector<152x128xf32>
    %678 = vector.shape_cast %675 : vector<152x128xf32> to vector<1x152x128xf32>
    tpu.vector_store %arg8[%c0_236, %c0_237, %c0_238], %678 {strides = array<i32>} : memref<1x152x128xf32, #tpu.memory_space<vmem>>, vector<1x152x128xf32>,
    %679 = tpu.concatenate %470, %481, %492, %503, %514, %525, %536, %547, %558, %569, %580, %591, %602, %613, %624, %635 in 0 : vector<8x128xf32>, vector<8x128xf32>, vector<8x128xf32>, vector<8x128xf32>, vector<8x128xf32>, vector<8x128xf32>, vector<8x128xf32>, vector<8x128xf32>, vector<8x128xf32>, vector<8x128xf32>, vector<8x128xf32>, vector<8x128xf32>, vector<8x128xf32>, vector<8x128xf32>, vector<8x128xf32>, vector<8x128xf32> -> vector<128x128xf32>
    %680 = tpu.concatenate %646, %657, %668 in 0 : vector<8x128xf32>, vector<8x128xf32>, vector<8x128xf32> -> vector<24x128xf32>
    %681 = tpu.concatenate %679, %680 in 0 : vector<128x128xf32>, vector<24x128xf32> -> vector<152x128xf32>
    %c0_239 = arith.constant 0 : index
    %c0_240 = arith.constant 0 : index
    %c0_241 = arith.constant 0 : index
    %682 = vector.load %arg9[%c0_239, %c0_240, %c0_241] : memref<1x152x128xf32, #tpu.memory_space<vmem>>, vector<1x152x128xf32>
    %683 = vector.shape_cast %682 : vector<1x152x128xf32> to vector<152x128xf32>
    %684 = vector.shape_cast %681 : vector<152x128xf32> to vector<1x152x128xf32>
    tpu.vector_store %arg9[%c0_239, %c0_240, %c0_241], %684 {strides = array<i32>} : memref<1x152x128xf32, #tpu.memory_space<vmem>>, vector<1x152x128xf32>,
    return
  }
  func.func @transform_0(%arg0: i32) -> (i32, i32, i32) {
    %c0_i32 = arith.constant 0 : i32
    %c0_i32_0 = arith.constant 0 : i32
    %c0_i32_1 = arith.constant 0 : i32
    return %arg0, %c0_i32, %c0_i32_0 : i32, i32, i32
  }
  func.func @transform_1(%arg0: i32) -> (i32, i32) {
    %c0_i32 = arith.constant 0 : i32
    %c0_i32_0 = arith.constant 0 : i32
    %c0_i32_1 = arith.constant 0 : i32
    return %c0_i32, %c0_i32_0 : i32, i32
  }
  func.func @transform_2(%arg0: i32) -> (i32, i32) {
    %c0_i32 = arith.constant 0 : i32
    %c0_i32_0 = arith.constant 0 : i32
    %c0_i32_1 = arith.constant 0 : i32
    return %c0_i32, %c0_i32_0 : i32, i32
  }
  func.func @transform_3(%arg0: i32) -> (i32, i32, i32) {
    %c0_i32 = arith.constant 0 : i32
    %c0_i32_0 = arith.constant 0 : i32
    %c0_i32_1 = arith.constant 0 : i32
    %c0_i32_2 = arith.constant 0 : i32
    return %c0_i32, %c0_i32_0, %c0_i32_1 : i32, i32, i32
  }
  func.func @transform_4(%arg0: i32) -> (i32, i32) {
    %c0_i32 = arith.constant 0 : i32
    %c0_i32_0 = arith.constant 0 : i32
    %c0_i32_1 = arith.constant 0 : i32
    return %c0_i32, %c0_i32_0 : i32, i32
  }
  func.func @transform_5(%arg0: i32) -> (i32, i32, i32) {
    %c0_i32 = arith.constant 0 : i32
    %c0_i32_0 = arith.constant 0 : i32
    %c0_i32_1 = arith.constant 0 : i32
    %c0_i32_2 = arith.constant 0 : i32
    return %c0_i32, %c0_i32_0, %c0_i32_1 : i32, i32, i32
  }
  func.func @transform_6(%arg0: i32) -> (i32, i32) {
    %c0_i32 = arith.constant 0 : i32
    %c0_i32_0 = arith.constant 0 : i32
    %c0_i32_1 = arith.constant 0 : i32
    return %c0_i32, %c0_i32_0 : i32, i32
  }
  func.func @transform_7(%arg0: i32) -> (i32, i32, i32) {
    %c0_i32 = arith.constant 0 : i32
    %c0_i32_0 = arith.constant 0 : i32
    %c0_i32_1 = arith.constant 0 : i32
    return %arg0, %c0_i32, %c0_i32_0 : i32, i32, i32
  }
  func.func @transform_8(%arg0: i32) -> (i32, i32, i32) {
    %c0_i32 = arith.constant 0 : i32
    %c0_i32_0 = arith.constant 0 : i32
    %c0_i32_1 = arith.constant 0 : i32
    return %arg0, %c0_i32, %c0_i32_0 : i32, i32, i32
  }
}

</mosaic_0001>

<bundles_post_ra>
// kernel: snn_delay_forward.1
= control target key start
LH: loop header
LB: loop body
LE: loop exit
PB: predicated region body
PF: predicated region fallthrough
CT: control target
= control target key end

     0   :  { %s8637_s27 = smov 0   ;;  %s11448_s0 = inlined_call_operand.vmem [shape: bf16[2,136,768], index: 0, kind: input, shape index: {}]   ;;  %s11449_s1 = inlined_call_operand.vmem [shape: bf16[768,256], index: 1, kind: input, shape index: {}]   ;;  %s11450_s2 = inlined_call_operand.vmem [shape: f32[1,256], index: 2, kind: input, shape index: {}]   ;;  %s11451_s3 = inlined_call_operand.vmem [shape: bf16[5,256,256], index: 3, kind: input, shape index: {}]   ;;  %s11452_s4 = inlined_call_operand.vmem [shape: f32[1,256], index: 4, kind: input, shape index: {}]   ;;  %s11453_s5 = inlined_call_operand.vmem [shape: bf16[5,256,128], index: 5, kind: input, shape index: {}]   ;;  %s11454_s6 = inlined_call_operand.vmem [shape: f32[1,128], index: 6, kind: input, shape index: {}]   ;;  %s11455_s7 = inlined_call_operand.vmem [shape: f32[2,152,128], index: 7, kind: output, shape index: {0}]   ;;  %s11456_s8 = inlined_call_operand.vmem [shape: f32[2,152,128], index: 8, kind: output, shape index: {1}]  }
   0x1 LB: > { %s6149_s28 = sadd.s32 4294967295, %s8585_s27   ;;  %p6153_p0 = scmp.ge.s32.totalorder %s8585_s27, 1  ;;  %s8585_s27 = sphi %s8637_s27, %s19_s27  }
   0x2   : > { %p265_p1 = scmp.lt.s32.totalorder %s8585_s27, 3 }
   0x4   : > { %p266_p2 = pnand %p6153_p0, %p265_p1 }
   0x5   : > { %v7909_v0 = vld [vmem:[%s11449_s1 + $0x4] ss:$8 sps:$4 sm:$0xff] (!%p266_p2)   ;;  %v7911_v1 = vld [vmem:[%s11449_s1] ss:$8 sps:$4 sm:$0xff] (!%p266_p2)   ;;  %v7912_v2 = vld [vmem:[%s11449_s1 + $0x14] ss:$8 sps:$4 sm:$0xff] (!%p266_p2)  }
   0x6   : > { %269 = sbr.rel (%p266_p2) target bundleno = 1433 (0x599), region = 48  ;;  %1220 = vmatprep.subr.bf16.mxu0 (!%p266_p2), %v7909_v0  ;;  %v7914_v3 = vld [vmem:[%s11449_s1 + $0x10] ss:$8 sps:$4 sm:$0xff] (!%p266_p2)   ;;  %v7915_v4 = vld [vmem:[%s11449_s1 + $0x24] ss:$8 sps:$4 sm:$0xff] (!%p266_p2)   ;;  %p304_p3 = scmp.lt.s32.totalorder (!%p266_p2), %s6149_s28, 1 }
   0x7   : > { %1221 = vmatpush1.bf16.msra.mxu0 (!%p266_p2), %v7911_v1  ;;  %v7917_v5 = vld [vmem:[%s11449_s1 + $0x20] ss:$8 sps:$4 sm:$0xff] (!%p266_p2)   ;;  %v7918_v6 = vld [vmem:[%s11449_s1 + $0x34] ss:$8 sps:$4 sm:$0xff] (!%p266_p2)   ;;  %v7920_v7 = vld [vmem:[%s11449_s1 + $0x30] ss:$8 sps:$4 sm:$0xff] (!%p266_p2)  }
   0x8   : > { %1222 = vmatprep.subr.bf16.mxu0 (!%p266_p2), %v7912_v2  ;;  %v7921_v8 = vld [vmem:[%s11449_s1 + $0x44] ss:$8 sps:$4 sm:$0xff] (!%p266_p2)   ;;  %v7923_v9 = vld [vmem:[%s11449_s1 + $0x40] ss:$8 sps:$4 sm:$0xff] (!%p266_p2)   ;;  %v7924_v10 = vld [vmem:[%s11449_s1 + $0x54] ss:$8 sps:$4 sm:$0xff] (!%p266_p2)  }
   0x9   : > { %v7926_v11 = vld [vmem:[%s11449_s1 + $0x50] ss:$8 sps:$4 sm:$0xff] (!%p266_p2)   ;;  %v7927_v12 = vld [vmem:[%s11449_s1 + $0x64] ss:$8 sps:$4 sm:$0xff] (!%p266_p2)   ;;  %v7929_v14 = vld [vmem:[%s11449_s1 + $0x60] ss:$8 sps:$4 sm:$0xff] (!%p266_p2)  }
   0xa   : > { %v7930_v15 = vld [vmem:[%s11449_s1 + $0x74] ss:$8 sps:$4 sm:$0xff] (!%p266_p2)   ;;  %v7932_v16 = vld [vmem:[%s11449_s1 + $0x70] ss:$8 sps:$4 sm:$0xff] (!%p266_p2)   ;;  %v7933_v17 = vld [vmem:[%s11449_s1 + $0x84] ss:$8 sps:$4 sm:$0xff] (!%p266_p2)  }
   0xb   : > { %1223 = vmatpush1.bf16.msra.mxu0 (!%p266_p2), %v7914_v3  ;;  %v7935_v18 = vld [vmem:[%s11449_s1 + $0x80] ss:$8 sps:$4 sm:$0xff] (!%p266_p2)   ;;  %v7936_v19 = vld [vmem:[%s11449_s1 + $0x94] ss:$8 sps:$4 sm:$0xff] (!%p266_p2)   ;;  %v7938_v20 = vld [vmem:[%s11449_s1 + $0x90] ss:$8 sps:$4 sm:$0xff] (!%p266_p2)  }
   0xc   : > { %1224 = vmatprep.subr.bf16.mxu0 (!%p266_p2), %v7915_v4  ;;  %v7939_v21 = vld [vmem:[%s11449_s1 + $0xa4] ss:$8 sps:$4 sm:$0xff] (!%p266_p2)   ;;  %v7941_v22 = vld [vmem:[%s11449_s1 + $0xa0] ss:$8 sps:$4 sm:$0xff] (!%p266_p2)   ;;  %v7942_v23 = vld [vmem:[%s11449_s1 + $0xb4] ss:$8 sps:$4 sm:$0xff] (!%p266_p2)  }
   0xd   : > { %s11669_s28 = smov (!%p304_p3, %s6149_s28), 1  ;;  %v7944_v24 = vld [vmem:[%s11449_s1 + $0xb0] ss:$8 sps:$4 sm:$0xff]   ;;  %v7945_v25 = vld [vmem:[%s11449_s1 + $0xc4] ss:$8 sps:$4 sm:$0xff]   ;;  %vm11473_vm0 = vcmask 1043456  }
   0xe   : > { %s7896_s29 = smul.u32 408, %s11669_s28  ;;  %v7947_v26 = vld [vmem:[%s11449_s1 + $0xc0] ss:$8 sps:$4 sm:$0xff]   ;;  %v7948_v27 = vld [vmem:[%s11449_s1 + $0xd4] ss:$8 sps:$4 sm:$0xff]   ;;  %vm8589_vm3 = vmmov 1  }
   0xf   : > { %1225 = vmatpush1.bf16.msra.mxu0 %v7917_v5  ;;  %v7950_v28 = vld [vmem:[%s11449_s1 + $0xd0] ss:$8 sps:$4 sm:$0xff]   ;;  %v7951_v29 = vld [vmem:[%s11449_s1 + $0xe4] ss:$8 sps:$4 sm:$0xff]   ;;  %v7953_v30 = vld [vmem:[%s11449_s1 + $0xe0] ss:$8 sps:$4 sm:$0xff]  }
  0x10   : > { %1226 = vmatprep.subr.bf16.mxu0 %v7918_v6  ;;  %s8687_s14 = scalar_lea.vmem %s11448_s0, %s7896_s29  ;;  %v7954_v31 = vld [vmem:[%s11449_s1 + $0xf4] ss:$8 sps:$4 sm:$0xff]   ;;  %v7956_v32 = vld [vmem:[%s11449_s1 + $0xf0] ss:$8 sps:$4 sm:$0xff]   ;;  %v7962_v33 = vld [vmem:[%s11449_s1 + $0x104] ss:$8 sps:$4 sm:$0xff]  }
  0x11   : > { %v7959_v13 = vld [vmem:[%s8687_s14 + $0x4] ss:$24 sps:$4 sm:$0xff]   ;;  %v7957_v34 = vld [vmem:[%s8687_s14] ss:$24 sps:$4 sm:$0xff]   ;;  %v7966_v36 = vld [vmem:[%s8687_s14 + $0x34] ss:$24 sps:$4 sm:$0xff]  }
  0x12   : > { %1252 = vmatprep.mubr.bf16.mxu0 %v7959_v13  ;;  %v7960_v35 = vld [vmem:[%s11449_s1 + $0x100] ss:$8 sps:$4 sm:$0xff]   ;;  %v7965_v37 = vld [vmem:[%s11449_s1 + $0x114] ss:$8 sps:$4 sm:$0xff]   ;;  %v7963_v38 = vld [vmem:[%s11449_s1 + $0x110] ss:$8 sps:$4 sm:$0xff]  }
  0x13   : > { %1227 = vmatpush1.bf16.msra.mxu0 %v7920_v7  ;;  %v7971_v39 = vld [vmem:[%s11449_s1 + $0x124] ss:$8 sps:$4 sm:$0xff]   ;;  %v7968_v40 = vld [vmem:[%s8687_s14 + $0x30] ss:$24 sps:$4 sm:$0xff]   ;;  %v7974_v43 = vld [vmem:[%s11449_s1 + $0x134] ss:$8 sps:$4 sm:$0xff]  }
  0x14   : > { %1228 = vmatprep.subr.bf16.mxu0 %v7921_v8  ;;  %v7969_v41 = vld [vmem:[%s11449_s1 + $0x120] ss:$8 sps:$4 sm:$0xff]   ;;  %v7975_v42 = vld [vmem:[%s8687_s14 + $0x64] ss:$24 sps:$4 sm:$0xff]   ;;  %v7972_v44 = vld [vmem:[%s11449_s1 + $0x130] ss:$8 sps:$4 sm:$0xff]  }
  0x15   : > { %v7980_v45 = vld [vmem:[%s11449_s1 + $0x144] ss:$8 sps:$4 sm:$0xff]   ;;  %v7977_v46 = vld [vmem:[%s8687_s14 + $0x60] ss:$24 sps:$4 sm:$0xff]   ;;  %v7985_v49 = vld [vmem:[%s11449_s1 + $0x154] ss:$8 sps:$4 sm:$0xff]  }
  0x16   : > { %v7978_v47 = vld [vmem:[%s11449_s1 + $0x140] ss:$8 sps:$4 sm:$0xff]   ;;  %v7981_v48 = vld [vmem:[%s8687_s14 + $0x94] ss:$24 sps:$4 sm:$0xff]   ;;  %v7983_v50 = vld [vmem:[%s11449_s1 + $0x150] ss:$8 sps:$4 sm:$0xff]  }
  0x17   : > { %1229 = vmatpush1.bf16.msra.mxu0 %v7923_v9  ;;  %v7989_v51 = vld [vmem:[%s11449_s1 + $0x164] ss:$8 sps:$4 sm:$0xff]   ;;  %v7986_v52 = vld [vmem:[%s8687_s14 + $0x90] ss:$24 sps:$4 sm:$0xff]   ;;  %v7995_v55 = vld [vmem:[%s11449_s1 + $0x174] ss:$8 sps:$4 sm:$0xff]  }
  0x18   : > { %1230 = vmatprep.subr.bf16.mxu0 %v7924_v10  ;;  %v7987_v53 = vld [vmem:[%s11449_s1 + $0x160] ss:$8 sps:$4 sm:$0xff]   ;;  %v7990_v54 = vld [vmem:[%s8687_s14 + $0xc4] ss:$24 sps:$4 sm:$0xff]   ;;  %v7993_v56 = vld [vmem:[%s11449_s1 + $0x170] ss:$8 sps:$4 sm:$0xff]  }
  0x19   : > { %v7998_v57 = vld [vmem:[%s11449_s1 + $0x184] ss:$8 sps:$4 sm:$0xff]   ;;  %v7992_v58 = vld [vmem:[%s8687_s14 + $0xc0] ss:$24 sps:$4 sm:$0xff]   ;;  %v8004_v61 = vld [vmem:[%s11449_s1 + $0x194] ss:$8 sps:$4 sm:$0xff]  }
  0x1a   : > { %v7996_v59 = vld [vmem:[%s11449_s1 + $0x180] ss:$8 sps:$4 sm:$0xff]   ;;  %v7999_v60 = vld [vmem:[%s8687_s14 + $0xf4] ss:$24 sps:$4 sm:$0xff]   ;;  %v8002_v62 = vld [vmem:[%s11449_s1 + $0x190] ss:$8 sps:$4 sm:$0xff]  }
  0x1b   : > { %1231 = vmatpush1.bf16.msra.mxu0 %v7926_v11  ;;  %v8007_v63 = vld [vmem:[%s11449_s1 + $0x1a4] ss:$8 sps:$4 sm:$0xff]   ;;  %v8001_v0 = vld [vmem:[%s8687_s14 + $0xf0] ss:$24 sps:$4 sm:$0xff]   ;;  %v8013_v3 = vld [vmem:[%s11449_s1 + $0x1b4] ss:$8 sps:$4 sm:$0xff]  }
  0x1c   : > { %1232 = vmatprep.subr.bf16.mxu0 %v7927_v12  ;;  %v8005_v1 = vld [vmem:[%s11449_s1 + $0x1a0] ss:$8 sps:$4 sm:$0xff]   ;;  %v8008_v2 = vld [vmem:[%s8687_s14 + $0x124] ss:$24 sps:$4 sm:$0xff]   ;;  %v8011_v4 = vld [vmem:[%s11449_s1 + $0x1b0] ss:$8 sps:$4 sm:$0xff]  }
  0x1d   : > { %v8016_v5 = vld [vmem:[%s11449_s1 + $0x1c4] ss:$8 sps:$4 sm:$0xff]   ;;  %v8010_v6 = vld [vmem:[%s8687_s14 + $0x120] ss:$24 sps:$4 sm:$0xff]   ;;  %v8022_v9 = vld [vmem:[%s11449_s1 + $0x1d4] ss:$8 sps:$4 sm:$0xff]  }
  0x1e   : > { %v8014_v7 = vld [vmem:[%s11449_s1 + $0x1c0] ss:$8 sps:$4 sm:$0xff]   ;;  %v8017_v8 = vld [vmem:[%s8687_s14 + $0x154] ss:$24 sps:$4 sm:$0xff]   ;;  %v8020_v10 = vld [vmem:[%s11449_s1 + $0x1d0] ss:$8 sps:$4 sm:$0xff]  }
  0x1f   : > { %1233 = vmatpush1.bf16.msra.mxu0 %v7929_v14  ;;  %v368_v11 = vld [vmem:[%s8687_s14 + $0x180] sm:$0xff]  ;;  %v8019_v13 = vld [vmem:[%s8687_s14 + $0x150] ss:$24 sps:$4 sm:$0xff]   ;;  %s7897_s24 = smul.u32 152, %s11669_s28 }
  0x20   : > { %1234 = vmatprep.subr.bf16.mxu0 %v7930_v15  ;;  %v8026_v12 = vld [vmem:[%s11449_s1 + $0x1e4] ss:$8 sps:$4 sm:$0xff]   ;;  %v8024_v14 = vld [vmem:[%s11449_s1 + $0x1e0] ss:$8 sps:$4 sm:$0xff]   ;;  %v8030_v15 = vld [vmem:[%s11449_s1 + $0x1f4] ss:$8 sps:$4 sm:$0xff]  }
  0x21   : > { %s11327_s30 = scalar_lea.vmem %s11456_s8, %s7897_s24  ;;  %s11334_s10 = scalar_lea.vmem %s11455_s7, %s7897_s24 }
  0x23   : > { %1235 = vmatpush1.bf16.msra.mxu0 %v7932_v16  ;;  %v6206_v16 = vcombine.high %v368_v11, %v368_v11 }
  0x24   : > { %1236 = vmatprep.subr.bf16.mxu0 %v7933_v17  ;;  %v8028_v17 = vld [vmem:[%s11449_s1 + $0x1f0] ss:$8 sps:$4 sm:$0xff]  }
  0x27   : > { %1237 = vmatpush1.bf16.msra.mxu0 %v7935_v18  ;;  %v8036_v18 = vld [vmem:[%s11449_s1 + $0x204] ss:$8 sps:$4 sm:$0xff]  }
  0x28   : > { %1238 = vmatprep.subr.bf16.mxu0 %v7936_v19  ;;  %v8033_v19 = vld [vmem:[%s8687_s14 + $0xc] ss:$24 sps:$4 sm:$0xff]  }
  0x2b   : > { %1239 = vmatpush1.bf16.msra.mxu0 %v7938_v20  ;;  %v6205_v20 = vcombine.low %v368_v11, %v368_v11  ;;  %v8131_v11 = vld [vmem:[%s11451_s3 + $0x104] ss:$8 sps:$4 sm:$0xff]  }
  0x2c   : > { %1240 = vmatprep.subr.bf16.mxu0 %v7939_v21  ;;  %v8031_v21 = vld [vmem:[%s8687_s14 + $0x8] ss:$24 sps:$4 sm:$0xff]   ;;  %2148 = vmatprep.subr.bf16.mxu1 %v8131_v11  ;;  %v8206_v11 = vld [vmem:[%s11451_s3 + $0x1d4] ss:$8 sps:$4 sm:$0xff]  }
  0x2f   : > { %1241 = vmatpush1.bf16.msra.mxu0 %v7941_v22  ;;  %v8034_v22 = vld [vmem:[%s11449_s1 + $0x200] ss:$8 sps:$4 sm:$0xff]  }
  0x30   : > { %1242 = vmatprep.subr.bf16.mxu0 %v7942_v23  ;;  %v8040_v23 = vld [vmem:[%s8687_s14 + $0x3c] ss:$24 sps:$4 sm:$0xff]  }
  0x33   : > { %1243 = vmatpush1.bf16.msra.mxu0 %v7944_v24  ;;  %v8039_v24 = vld [vmem:[%s11449_s1 + $0x214] ss:$8 sps:$4 sm:$0xff]  }
  0x34   : > { %1244 = vmatprep.subr.bf16.mxu0 %v7945_v25  ;;  %v8037_v25 = vld [vmem:[%s11449_s1 + $0x210] ss:$8 sps:$4 sm:$0xff]  }
  0x37   : > { %1245 = vmatpush1.bf16.msra.mxu0 %v7947_v26  ;;  %v8045_v26 = vld [vmem:[%s11449_s1 + $0x224] ss:$8 sps:$4 sm:$0xff]  }
  0x38   : > { %1246 = vmatprep.subr.bf16.mxu0 %v7948_v27  ;;  %v8042_v27 = vld [vmem:[%s8687_s14 + $0x38] ss:$24 sps:$4 sm:$0xff]  }
  0x3b   : > { %1247 = vmatpush1.bf16.msra.mxu0 %v7950_v28  ;;  %v8043_v28 = vld [vmem:[%s11449_s1 + $0x220] ss:$8 sps:$4 sm:$0xff]  }
  0x3c   : > { %1248 = vmatprep.subr.bf16.mxu0 %v7951_v29  ;;  %v8049_v29 = vld [vmem:[%s8687_s14 + $0x6c] ss:$24 sps:$4 sm:$0xff]  }
  0x3f   : > { %1249 = vmatpush1.bf16.msra.mxu0 %v7953_v30  ;;  %v8048_v30 = vld [vmem:[%s11449_s1 + $0x234] ss:$8 sps:$4 sm:$0xff]  }
  0x40   : > { %1250 = vmatprep.subr.bf16.mxu0 %v7954_v31  ;;  %v8046_v31 = vld [vmem:[%s11449_s1 + $0x230] ss:$8 sps:$4 sm:$0xff]  }
  0x43   : > { %1251 = vmatpush1.bf16.msra.mxu0 %v7956_v32  ;;  %v8054_v32 = vld [vmem:[%s11449_s1 + $0x244] ss:$8 sps:$4 sm:$0xff]  }
  0x44   : > { %1341 = vmatprep.subr.bf16.mxu0 %v7962_v33  ;;  %v8051_v33 = vld [vmem:[%s8687_s14 + $0x68] ss:$24 sps:$4 sm:$0xff]  }
  0x46   : > { %1253 = vmatmul.mubr.bf16.vlgmr.msra.gmra.mrb[0].mxu0 %v7957_v34  ;;  %v8052_v34 = vld [vmem:[%s11449_s1 + $0x240] ss:$8 sps:$4 sm:$0xff]  }
  0x47   : > { %1342 = vmatpush1.bf16.msra.mxu0 %v7960_v35  ;;  %1262 = vmatprep.mubr.bf16.mxu0 %v7966_v36  ;;  %v8055_v35 = vld [vmem:[%s8687_s14 + $0x9c] ss:$24 sps:$4 sm:$0xff]  }
  0x48   : > { %1343 = vmatprep.subr.bf16.mxu0 %v7965_v37  ;;  %v8059_v36 = vld [vmem:[%s11449_s1 + $0x254] ss:$8 sps:$4 sm:$0xff]   ;;  %v8057_v37 = vld [vmem:[%s11449_s1 + $0x250] ss:$8 sps:$4 sm:$0xff]  }
  0x4b   : > { %1344 = vmatpush1.bf16.msra.mxu0 %v7963_v38  ;;  %v8063_v38 = vld [vmem:[%s11449_s1 + $0x264] ss:$8 sps:$4 sm:$0xff]  }
  0x4c   : > { %1345 = vmatprep.subr.bf16.mxu0 %v7971_v39  ;;  %v8060_v39 = vld [vmem:[%s8687_s14 + $0x98] ss:$24 sps:$4 sm:$0xff]  }
  0x4e   : > { %1263 = vmatmul.mubr.bf16.gmra.mrb[4].mxu0 %v7968_v40  ;;  %v8061_v40 = vld [vmem:[%s11449_s1 + $0x260] ss:$8 sps:$4 sm:$0xff]  }
  0x4f   : > { %1346 = vmatpush1.bf16.msra.mxu0 %v7969_v41  ;;  %1272 = vmatprep.mubr.bf16.mxu0 %v7975_v42  ;;  %v8064_v41 = vld [vmem:[%s8687_s14 + $0xcc] ss:$24 sps:$4 sm:$0xff]   ;;  %v8069_v42 = vld [vmem:[%s11449_s1 + $0x274] ss:$8 sps:$4 sm:$0xff]  }
  0x50   : > { %1347 = vmatprep.subr.bf16.mxu0 %v7974_v43  ;;  %v8067_v43 = vld [vmem:[%s11449_s1 + $0x270] ss:$8 sps:$4 sm:$0xff]  }
  0x53   : > { %1348 = vmatpush1.bf16.msra.mxu0 %v7972_v44  ;;  %v8072_v44 = vld [vmem:[%s11449_s1 + $0x284] ss:$8 sps:$4 sm:$0xff]  }
  0x54   : > { %1349 = vmatprep.subr.bf16.mxu0 %v7980_v45  ;;  %v8066_v45 = vld [vmem:[%s8687_s14 + $0xc8] ss:$24 sps:$4 sm:$0xff]  }
  0x56   : > { %1273 = vmatmul.mubr.bf16.gmra.mrb[8].mxu0 %v7977_v46  ;;  %v8070_v46 = vld [vmem:[%s11449_s1 + $0x280] ss:$8 sps:$4 sm:$0xff]  }
  0x57   : > { %1350 = vmatpush1.bf16.msra.mxu0 %v7978_v47  ;;  %1282 = vmatprep.mubr.bf16.mxu0 %v7981_v48  ;;  %v8073_v47 = vld [vmem:[%s8687_s14 + $0xfc] ss:$24 sps:$4 sm:$0xff]  }
  0x58   : > { %1351 = vmatprep.subr.bf16.mxu0 %v7985_v49  ;;  %v8078_v48 = vld [vmem:[%s11449_s1 + $0x294] ss:$8 sps:$4 sm:$0xff]   ;;  %v8076_v49 = vld [vmem:[%s11449_s1 + $0x290] ss:$8 sps:$4 sm:$0xff]  }
  0x5b   : > { %1352 = vmatpush1.bf16.msra.mxu0 %v7983_v50  ;;  %v8081_v50 = vld [vmem:[%s11449_s1 + $0x2a4] ss:$8 sps:$4 sm:$0xff]  }
  0x5c   : > { %1353 = vmatprep.subr.bf16.mxu0 %v7989_v51  ;;  %v8075_v51 = vld [vmem:[%s8687_s14 + $0xf8] ss:$24 sps:$4 sm:$0xff]  }
  0x5e   : > { %1283 = vmatmul.mubr.bf16.gmra.mrb[12].mxu0 %v7986_v52  ;;  %v8079_v52 = vld [vmem:[%s11449_s1 + $0x2a0] ss:$8 sps:$4 sm:$0xff]  }
  0x5f   : > { %1354 = vmatpush1.bf16.msra.mxu0 %v7987_v53  ;;  %1292 = vmatprep.mubr.bf16.mxu0 %v7990_v54  ;;  %v8082_v53 = vld [vmem:[%s8687_s14 + $0x12c] ss:$24 sps:$4 sm:$0xff]   ;;  %v8087_v54 = vld [vmem:[%s11449_s1 + $0x2b4] ss:$8 sps:$4 sm:$0xff]  }
  0x60   : > { %1355 = vmatprep.subr.bf16.mxu0 %v7995_v55  ;;  %v8085_v55 = vld [vmem:[%s11449_s1 + $0x2b0] ss:$8 sps:$4 sm:$0xff]  }
  0x63   : > { %1356 = vmatpush1.bf16.msra.mxu0 %v7993_v56  ;;  %v8090_v56 = vld [vmem:[%s11449_s1 + $0x2c4] ss:$8 sps:$4 sm:$0xff]  }
  0x64   : > { %1357 = vmatprep.subr.bf16.mxu0 %v7998_v57  ;;  %v8084_v57 = vld [vmem:[%s8687_s14 + $0x128] ss:$24 sps:$4 sm:$0xff]  }
  0x66   : > { %1293 = vmatmul.mubr.bf16.gmra.mrb[16].mxu0 %v7992_v58  ;;  %v8088_v58 = vld [vmem:[%s11449_s1 + $0x2c0] ss:$8 sps:$4 sm:$0xff]  }
  0x67   : > { %1358 = vmatpush1.bf16.msra.mxu0 %v7996_v59  ;;  %1302 = vmatprep.mubr.bf16.mxu0 %v7999_v60  ;;  %v8091_v59 = vld [vmem:[%s8687_s14 + $0x15c] ss:$24 sps:$4 sm:$0xff]  }
  0x68   : > { %1359 = vmatprep.subr.bf16.mxu0 %v8004_v61  ;;  %v8096_v60 = vld [vmem:[%s11449_s1 + $0x2d4] ss:$8 sps:$4 sm:$0xff]   ;;  %v8094_v61 = vld [vmem:[%s11449_s1 + $0x2d0] ss:$8 sps:$4 sm:$0xff]  }
  0x6b   : > { %1360 = vmatpush1.bf16.msra.mxu0 %v8002_v62  ;;  %v369_v62 = vld [vmem:[%s8687_s14 + $0x188] sm:$0xff] }
  0x6c   : > { %1361 = vmatprep.subr.bf16.mxu0 %v8007_v63  ;;  %v8100_v63 = vld [vmem:[%s11449_s1 + $0x2e4] ss:$8 sps:$4 sm:$0xff]  }
  0x6e   : > { %1303 = vmatmul.mubr.bf16.gmra.mrb[20].mxu0 %v8001_v0  ;;  %v8093_v0 = vld [vmem:[%s8687_s14 + $0x158] ss:$24 sps:$4 sm:$0xff]  }
  0x6f   : > { %1362 = vmatpush1.bf16.msra.mxu0 %v8005_v1  ;;  %1312 = vmatprep.mubr.bf16.mxu0 %v8008_v2  ;;  %v8098_v1 = vld [vmem:[%s11449_s1 + $0x2e0] ss:$8 sps:$4 sm:$0xff]   ;;  %v8104_v2 = vld [vmem:[%s11449_s1 + $0x2f4] ss:$8 sps:$4 sm:$0xff]  }
  0x70   : > { %1363 = vmatprep.subr.bf16.mxu0 %v8013_v3  ;;  %v6208_v3 = vcombine.high %v369_v62, %v369_v62 }
  0x73   : > { %1364 = vmatpush1.bf16.msra.mxu0 %v8011_v4  ;;  %v8102_v4 = vld [vmem:[%s11449_s1 + $0x2f0] ss:$8 sps:$4 sm:$0xff]  }
  0x74   : > { %1365 = vmatprep.subr.bf16.mxu0 %v8016_v5  ;;  %v8107_v5 = vld [vmem:[%s8687_s14 + $0x14] ss:$24 sps:$4 sm:$0xff]  }
  0x76   : > { %1313 = vmatmul.mubr.bf16.gmra.mrb[24].mxu0 %v8010_v6  ;;  %v6207_v6 = vcombine.low %v369_v62, %v369_v62  ;;  %v8190_v62 = vld [vmem:[%s11451_s3 + $0x1a0] ss:$8 sps:$4 sm:$0xff]  }
  0x77   : > { %1322 = vmatprep.mubr.bf16.mxu0 %v8017_v8  ;;  %1366 = vmatpush1.bf16.msra.mxu0 %v8014_v7  ;;  %v8105_v7 = vld [vmem:[%s8687_s14 + $0x10] ss:$24 sps:$4 sm:$0xff]   ;;  %v8108_v8 = vld [vmem:[%s8687_s14 + $0x44] ss:$24 sps:$4 sm:$0xff]  }
  0x78   : > { %1367 = vmatprep.subr.bf16.mxu0 %v8022_v9  ;;  %v8110_v9 = vld [vmem:[%s8687_s14 + $0x40] ss:$24 sps:$4 sm:$0xff]  }
  0x7b   : > { %1368 = vmatpush1.bf16.msra.mxu0 %v8020_v10  ;;  %v8111_v10 = vld [vmem:[%s8687_s14 + $0x74] ss:$24 sps:$4 sm:$0xff]  }
  0x7c   : > { %1369 = vmatprep.subr.bf16.mxu0 %v8026_v12  ;;  %v8133_v12 = vld [vmem:[%s11451_s3 + $0x100] ss:$8 sps:$4 sm:$0xff]  }
  0x7d   : > { %2149 = vmatpush1.bf16.msra.mxu1 %v8133_v12  ;;  %v8208_v12 = vld [vmem:[%s11451_s3 + $0x1d0] ss:$8 sps:$4 sm:$0xff]  }
  0x7e   : > { %1323 = vmatmul.mubr.bf16.gmra.mrb[28].mxu0 %v8019_v13  ;;  %v8134_v13 = vld [vmem:[%s11451_s3 + $0x114] ss:$8 sps:$4 sm:$0xff]  }
  0x7f   : > { %1332 = vmatprep.mubr.bf16.mxu0 %v6206_v16  ;;  %1370 = vmatpush1.bf16.msra.mxu0 %v8024_v14  ;;  %v8137_v14 = vld [vmem:[%s11451_s3 + $0x400] ss:$8 sps:$4 sm:$0xff]   ;;  %v8136_v16 = vld [vmem:[%s11451_s3 + $0x110] ss:$8 sps:$4 sm:$0xff]  }
  0x80   : > { %1371 = vmatprep.subr.bf16.mxu0 %v8030_v15  ;;  %v8139_v15 = vld [vmem:[%s11451_s3 + $0x404] ss:$8 sps:$4 sm:$0xff]   ;;  %2150 = vmatprep.subr.bf16.mxu1 %v8134_v13 }
  0x81   : > { %2151 = vmatpush1.bf16.msra.mxu1 %v8136_v16  ;;  %v8211_v13 = vld [vmem:[%s11451_s3 + $0x4c4] ss:$8 sps:$4 sm:$0xff]  }
  0x82   : > { %v8212_v16 = vld [vmem:[%s11451_s3 + $0x1e4] ss:$8 sps:$4 sm:$0xff]  }
  0x83   : > { %1372 = vmatpush1.bf16.msra.mxu0 %v8028_v17  ;;  %v8145_v17 = vld [vmem:[%s11451_s3 + $0x414] ss:$8 sps:$4 sm:$0xff]  }
  0x84   : > { %1462 = vmatprep.subr.bf16.mxu0 %v8036_v18  ;;  %v8140_v18 = vld [vmem:[%s11451_s3 + $0x124] ss:$8 sps:$4 sm:$0xff]  }
  0x85   : > { %2152 = vmatprep.subr.bf16.mxu1 %v8140_v18  ;;  %v8217_v18 = vld [vmem:[%s11451_s3 + $0x4d4] ss:$8 sps:$4 sm:$0xff]  }
  0x86   : > { %1333 = vmatmul.mubr.bf16.gmra.mrb[32].mxu0 %v6205_v20  ;;  %v8113_v20 = vld [vmem:[%s8687_s14 + $0x70] ss:$24 sps:$4 sm:$0xff]  }
  0x87   : > { %1373 = vmatprep.mubr.bf16.mxu0 %v8033_v19  ;;  %v8143_v19 = vld [vmem:[%s11451_s3 + $0x410] ss:$8 sps:$4 sm:$0xff]  }
  0x8e   : > { %1374 = vmatmul.mubr.bf16.vlgmr.msra.gmra.mrb[0].mxu0 %v8031_v21  ;;  %v8151_v21 = vld [vmem:[%s11451_s3 + $0x424] ss:$8 sps:$4 sm:$0xff]  }
  0x8f   : > { %1463 = vmatpush1.bf16.msra.mxu0 %v8034_v22  ;;  %1383 = vmatprep.mubr.bf16.mxu0 %v8040_v23  ;;  %v8114_v22 = vld [vmem:[%s8687_s14 + $0xa4] ss:$24 sps:$4 sm:$0xff]   ;;  %v8142_v23 = vld [vmem:[%s11451_s3 + $0x120] ss:$8 sps:$4 sm:$0xff]  }
  0x90   : > { %1464 = vmatprep.subr.bf16.mxu0 %v8039_v24  ;;  %v8146_v24 = vld [vmem:[%s11451_s3 + $0x134] ss:$8 sps:$4 sm:$0xff]   ;;  %2153 = vmatpush1.bf16.msra.mxu1 %v8142_v23 }
  0x91   : > { %2154 = vmatprep.subr.bf16.mxu1 %v8146_v24  ;;  %v8221_v24 = vld [vmem:[%s11451_s3 + $0x4e0] ss:$8 sps:$4 sm:$0xff]  }
  0x93   : > { %1465 = vmatpush1.bf16.msra.mxu0 %v8037_v25  ;;  %v8149_v25 = vld [vmem:[%s11451_s3 + $0x420] ss:$8 sps:$4 sm:$0xff]  }
  0x94   : > { %1466 = vmatprep.subr.bf16.mxu0 %v8045_v26  ;;  %v8157_v26 = vld [vmem:[%s11451_s3 + $0x434] ss:$8 sps:$4 sm:$0xff]  }
  0x96   : > { %1384 = vmatmul.mubr.bf16.gmra.mrb[4].mxu0 %v8042_v27  ;;  %v8148_v27 = vld [vmem:[%s11451_s3 + $0x130] ss:$8 sps:$4 sm:$0xff]  }
  0x97   : > { %1467 = vmatpush1.bf16.msra.mxu0 %v8043_v28  ;;  %1393 = vmatprep.mubr.bf16.mxu0 %v8049_v29  ;;  %v8152_v28 = vld [vmem:[%s11451_s3 + $0x144] ss:$8 sps:$4 sm:$0xff]   ;;  %v8155_v29 = vld [vmem:[%s11451_s3 + $0x430] ss:$8 sps:$4 sm:$0xff]  }
  0x98   : > { %1468 = vmatprep.subr.bf16.mxu0 %v8048_v30  ;;  %v8116_v30 = vld [vmem:[%s8687_s14 + $0xa0] ss:$24 sps:$4 sm:$0xff]   ;;  %2155 = vmatpush1.bf16.msra.mxu1 %v8148_v27 }
  0x99   : > { %2156 = vmatprep.subr.bf16.mxu1 %v8152_v28 }
  0x9b   : > { %1469 = vmatpush1.bf16.msra.mxu0 %v8046_v31  ;;  %v8163_v31 = vld [vmem:[%s11451_s3 + $0x444] ss:$8 sps:$4 sm:$0xff]  }
  0x9c   : > { %1470 = vmatprep.subr.bf16.mxu0 %v8054_v32  ;;  %v8117_v32 = vld [vmem:[%s8687_s14 + $0xd4] ss:$24 sps:$4 sm:$0xff]  }
  0x9e   : > { %1394 = vmatmul.mubr.bf16.gmra.mrb[8].mxu0 %v8051_v33  ;;  %v8154_v33 = vld [vmem:[%s11451_s3 + $0x140] ss:$8 sps:$4 sm:$0xff]  }
  0x9f   : > { %1471 = vmatpush1.bf16.msra.mxu0 %v8052_v34  ;;  %1403 = vmatprep.mubr.bf16.mxu0 %v8055_v35  ;;  %v8158_v34 = vld [vmem:[%s11451_s3 + $0x154] ss:$8 sps:$4 sm:$0xff]   ;;  %v8161_v35 = vld [vmem:[%s11451_s3 + $0x440] ss:$8 sps:$4 sm:$0xff]  }
  0xa0   : > { %1472 = vmatprep.subr.bf16.mxu0 %v8059_v36  ;;  %v8169_v36 = vld [vmem:[%s11451_s3 + $0x454] ss:$8 sps:$4 sm:$0xff]   ;;  %2157 = vmatpush1.bf16.msra.mxu1 %v8154_v33  ;;  %v8229_v33 = vld [vmem:[%s11451_s3 + $0x4] ss:$8 sps:$4 sm:$0xff]  }
  0xa1   : > { %2158 = vmatprep.subr.bf16.mxu1 %v8158_v34 }
  0xa3   : > { %1473 = vmatpush1.bf16.msra.mxu0 %v8057_v37  ;;  %v8160_v37 = vld [vmem:[%s11451_s3 + $0x150] ss:$8 sps:$4 sm:$0xff]  }
  0xa4   : > { %1474 = vmatprep.subr.bf16.mxu0 %v8063_v38  ;;  %v8164_v38 = vld [vmem:[%s11451_s3 + $0x164] ss:$8 sps:$4 sm:$0xff]   ;;  %2159 = vmatpush1.bf16.msra.mxu1 %v8160_v37 }
  0xa5   : > { %2160 = vmatprep.subr.bf16.mxu1 %v8164_v38 }
  0xa6   : > { %1404 = vmatmul.mubr.bf16.gmra.mrb[12].mxu0 %v8060_v39  ;;  %v8167_v39 = vld [vmem:[%s11451_s3 + $0x450] ss:$8 sps:$4 sm:$0xff]  }
  0xa7   : > { %1475 = vmatpush1.bf16.msra.mxu0 %v8061_v40  ;;  %1413 = vmatprep.mubr.bf16.mxu0 %v8064_v41  ;;  %v8119_v40 = vld [vmem:[%s8687_s14 + $0xd0] ss:$24 sps:$4 sm:$0xff]   ;;  %v8175_v41 = vld [vmem:[%s11451_s3 + $0x464] ss:$8 sps:$4 sm:$0xff]  }
  0xa8   : > { %1476 = vmatprep.subr.bf16.mxu0 %v8069_v42  ;;  %v8120_v42 = vld [vmem:[%s8687_s14 + $0x104] ss:$24 sps:$4 sm:$0xff]  }
  0xab   : > { %1477 = vmatpush1.bf16.msra.mxu0 %v8067_v43  ;;  %v8166_v43 = vld [vmem:[%s11451_s3 + $0x160] ss:$8 sps:$4 sm:$0xff]  }
  0xac   : > { %1478 = vmatprep.subr.bf16.mxu0 %v8072_v44  ;;  %v8170_v44 = vld [vmem:[%s11451_s3 + $0x174] ss:$8 sps:$4 sm:$0xff]   ;;  %2161 = vmatpush1.bf16.msra.mxu1 %v8166_v43 }
  0xad   : > { %2162 = vmatprep.subr.bf16.mxu1 %v8170_v44  ;;  %v8238_v43 = vld [vmem:[%s11451_s3 + $0x34] ss:$8 sps:$4 sm:$0xff]   ;;  %v8236_v44 = vld [vmem:[%s11451_s3 + $0x30] ss:$8 sps:$4 sm:$0xff]  }
  0xae   : > { %1414 = vmatmul.mubr.bf16.gmra.mrb[16].mxu0 %v8066_v45  ;;  %v8173_v45 = vld [vmem:[%s11451_s3 + $0x460] ss:$8 sps:$4 sm:$0xff]  }
  0xaf   : > { %1479 = vmatpush1.bf16.msra.mxu0 %v8070_v46  ;;  %1423 = vmatprep.mubr.bf16.mxu0 %v8073_v47  ;;  %v8181_v46 = vld [vmem:[%s11451_s3 + $0x474] ss:$8 sps:$4 sm:$0xff]   ;;  %v8172_v47 = vld [vmem:[%s11451_s3 + $0x170] ss:$8 sps:$4 sm:$0xff]  }
  0xb0   : > { %1480 = vmatprep.subr.bf16.mxu0 %v8078_v48  ;;  %v8176_v48 = vld [vmem:[%s11451_s3 + $0x184] ss:$8 sps:$4 sm:$0xff]   ;;  %2163 = vmatpush1.bf16.msra.mxu1 %v8172_v47  ;;  %v8244_v47 = vld [vmem:[%s11451_s3 + $0x54] ss:$8 sps:$4 sm:$0xff]  }
  0xb1   : > { %2164 = vmatprep.subr.bf16.mxu1 %v8176_v48  ;;  %v8242_v48 = vld [vmem:[%s11451_s3 + $0x50] ss:$8 sps:$4 sm:$0xff]  }
  0xb3   : > { %1481 = vmatpush1.bf16.msra.mxu0 %v8076_v49  ;;  %v8179_v49 = vld [vmem:[%s11451_s3 + $0x470] ss:$8 sps:$4 sm:$0xff]  }
  0xb4   : > { %1482 = vmatprep.subr.bf16.mxu0 %v8081_v50  ;;  %v8122_v50 = vld [vmem:[%s8687_s14 + $0x100] ss:$24 sps:$4 sm:$0xff]  }
  0xb6   : > { %1424 = vmatmul.mubr.bf16.gmra.mrb[20].mxu0 %v8075_v51  ;;  %v8187_v51 = vld [vmem:[%s11451_s3 + $0x484] ss:$8 sps:$4 sm:$0xff]  }
  0xb7   : > { %1483 = vmatpush1.bf16.msra.mxu0 %v8079_v52  ;;  %1433 = vmatprep.mubr.bf16.mxu0 %v8082_v53  ;;  %v8123_v52 = vld [vmem:[%s8687_s14 + $0x134] ss:$24 sps:$4 sm:$0xff]   ;;  %v8178_v53 = vld [vmem:[%s11451_s3 + $0x180] ss:$8 sps:$4 sm:$0xff]  }
  0xb8   : > { %1484 = vmatprep.subr.bf16.mxu0 %v8087_v54  ;;  %v8182_v54 = vld [vmem:[%s11451_s3 + $0x194] ss:$8 sps:$4 sm:$0xff]   ;;  %2165 = vmatpush1.bf16.msra.mxu1 %v8178_v53  ;;  %v8253_v53 = vld [vmem:[%s11451_s3 + $0x84] ss:$8 sps:$4 sm:$0xff]  }
  0xb9   : > { %2166 = vmatprep.subr.bf16.mxu1 %v8182_v54  ;;  %v8251_v54 = vld [vmem:[%s11451_s3 + $0x80] ss:$8 sps:$4 sm:$0xff]  }
  0xbb   : > { %1485 = vmatpush1.bf16.msra.mxu0 %v8085_v55  ;;  %v8185_v55 = vld [vmem:[%s11451_s3 + $0x480] ss:$8 sps:$4 sm:$0xff]  }
  0xbc   : > { %1486 = vmatprep.subr.bf16.mxu0 %v8090_v56  ;;  %v8193_v56 = vld [vmem:[%s11451_s3 + $0x494] ss:$8 sps:$4 sm:$0xff]  }
  0xbe   : > { %1434 = vmatmul.mubr.bf16.gmra.mrb[24].mxu0 %v8084_v57  ;;  %v8184_v57 = vld [vmem:[%s11451_s3 + $0x190] ss:$8 sps:$4 sm:$0xff]  }
  0xbf   : > { %1443 = vmatprep.mubr.bf16.mxu0 %v8091_v59  ;;  %1487 = vmatpush1.bf16.msra.mxu0 %v8088_v58  ;;  %v8188_v58 = vld [vmem:[%s11451_s3 + $0x1a4] ss:$8 sps:$4 sm:$0xff]   ;;  %v8191_v59 = vld [vmem:[%s11451_s3 + $0x490] ss:$8 sps:$4 sm:$0xff]  }
  0xc0   : > { %1488 = vmatprep.subr.bf16.mxu0 %v8096_v60  ;;  %v8125_v60 = vld [vmem:[%s8687_s14 + $0x130] ss:$24 sps:$4 sm:$0xff]   ;;  %2167 = vmatpush1.bf16.msra.mxu1 %v8184_v57  ;;  %v8259_v57 = vld [vmem:[%s11451_s3 + $0xa4] ss:$8 sps:$4 sm:$0xff]  }
  0xc1   : > { %2168 = vmatprep.subr.bf16.mxu1 %v8188_v58  ;;  %v8257_v58 = vld [vmem:[%s11451_s3 + $0xa0] ss:$8 sps:$4 sm:$0xff]  }
  0xc3   : > { %1489 = vmatpush1.bf16.msra.mxu0 %v8094_v61  ;;  %v8126_v61 = vld [vmem:[%s8687_s14 + $0x164] ss:$24 sps:$4 sm:$0xff]  }
  0xc4   : > { %1490 = vmatprep.subr.bf16.mxu0 %v8100_v63  ;;  %2169 = vmatpush1.bf16.msra.mxu1 %v8190_v62  ;;  %v370_v63 = vld [vmem:[%s8687_s14 + $0x190] sm:$0xff]  ;;  %v8263_v62 = vld [vmem:[%s11451_s3 + $0xc0] ss:$8 sps:$4 sm:$0xff]  }
  0xc6   : > { %1444 = vmatmul.mubr.bf16.gmra.mrb[28].mxu0 %v8093_v0  ;;  %v8128_v0 = vld [vmem:[%s8687_s14 + $0x160] ss:$24 sps:$4 sm:$0xff]  }
  0xc7   : > { %1453 = vmatprep.mubr.bf16.mxu0 %v6208_v3  ;;  %1491 = vmatpush1.bf16.msra.mxu0 %v8098_v1  ;;  %v6210_v1 = vcombine.high %v370_v63, %v370_v63  ;;  %v8194_v3 = vld [vmem:[%s11451_s3 + $0x1b4] ss:$8 sps:$4 sm:$0xff]  }
  0xc8   : > { %1492 = vmatprep.subr.bf16.mxu0 %v8104_v2  ;;  %v6209_v2 = vcombine.low %v370_v63, %v370_v63  ;;  %2170 = vmatprep.subr.bf16.mxu1 %v8194_v3  ;;  %v8268_v63 = vld [vmem:[%s11451_s3 + $0xd4] ss:$8 sps:$4 sm:$0xff]   ;;  %v8269_v3 = vld [vmem:[%s11451_s3 + $0xe0] ss:$8 sps:$4 sm:$0xff]  }
  0xcb   : > { %1493 = vmatpush1.bf16.msra.mxu0 %v8102_v4  ;;  %v8196_v4 = vld [vmem:[%s11451_s3 + $0x1b0] ss:$8 sps:$4 sm:$0xff]  }
  0xcc   : > { %3551 = vmatprep.subr.bf16.mxu0 %v8139_v15  ;;  %2171 = vmatpush1.bf16.msra.mxu1 %v8196_v4  ;;  %v8587_v15 = vmov 0.0|0.0   ;;  %v8274_v4 = vld [vmem:[%s11451_s3 + $0xf4] ss:$8 sps:$4 sm:$0xff]  }
  0xcd   : > { %1803 = vst [vmem:[#allocation2 + $0x8] sm:$0xff] %v8587_v15  ;;  %1805 = vst [vmem:[#allocation2 + $0x18] sm:$0xff] %v8587_v15 }
  0xce   : > { %1454 = vmatmul.mubr.bf16.gmra.mrb[36].mxu0 %v6207_v6  ;;  %v8197_v6 = vld [vmem:[%s11451_s3 + $0x4a0] ss:$8 sps:$4 sm:$0xff]   ;;  %1802 = vst [vmem:[#allocation2] sm:$0xff] %v8587_v15  ;;  %1804 = vst [vmem:[#allocation2 + $0x10] sm:$0xff] %v8587_v15 }
  0xcf   : > { %1494 = vmatprep.mubr.bf16.mxu0 %v8107_v5  ;;  %v8199_v5 = vld [vmem:[%s11451_s3 + $0x4a4] ss:$8 sps:$4 sm:$0xff]  }
  0xd4   : > { %v1875_v23 = vld [vmem:[#allocation2 + $0x8] sm:$0xf0] }
  0xd5   : > { %v1874_v27 = vld [vmem:[#allocation2] sm:$0xf0] }
  0xd6   : > { %1495 = vmatmul.mubr.bf16.vlgmr.msra.gmra.mrb[0].mxu0 %v8105_v7  ;;  %v8200_v7 = vld [vmem:[%s11451_s3 + $0x1c4] ss:$8 sps:$4 sm:$0xff]   ;;  %v1932_v28 = vrot.slane %v1874_v27, 4 }
  0xd7   : > { %1504 = vmatprep.mubr.bf16.mxu0 %v8108_v8  ;;  %3552 = vmatpush1.bf16.msra.mxu0 %v8137_v14  ;;  %v8202_v8 = vld [vmem:[%s11451_s3 + $0x1c0] ss:$8 sps:$4 sm:$0xff]  }
  0xd8   : > { %3553 = vmatprep.subr.bf16.mxu0 %v8145_v17  ;;  %2172 = vmatprep.subr.bf16.mxu1 %v8200_v7  ;;  %v8209_v14 = vld [vmem:[%s11451_s3 + $0x4c0] ss:$8 sps:$4 sm:$0xff]  }
  0xd9   : > { %2173 = vmatpush1.bf16.msra.mxu1 %v8202_v8  ;;  %v8214_v17 = vld [vmem:[%s11451_s3 + $0x1e0] ss:$8 sps:$4 sm:$0xff]  }
  0xda   : > { %2174 = vmatprep.subr.bf16.mxu1 %v8206_v11  ;;  %v467_v8 = vld [vmem:[%s11450_s2] sm:$0x3] }
  0xdb   : > { %3554 = vmatpush1.bf16.msra.mxu0 %v8143_v19  ;;  %v8215_v19 = vld [vmem:[%s11451_s3 + $0x4d0] ss:$8 sps:$4 sm:$0xff]  }
  0xdc   : > { %3555 = vmatprep.subr.bf16.mxu0 %v8151_v21  ;;  %v8220_v21 = vld [vmem:[%s11451_s3 + $0x1f0] ss:$8 sps:$4 sm:$0xff]  }
  0xdd   : > { %2175 = vmatpush1.bf16.msra.mxu1 %v8208_v12 }
  0xde   : > { %1505 = vmatmul.mubr.bf16.gmra.mrb[4].mxu0 %v8110_v9  ;;  %v8205_v9 = vld [vmem:[%s11451_s3 + $0x4b4] ss:$8 sps:$4 sm:$0xff]   ;;  %2176 = vmatprep.subr.bf16.mxu1 %v8212_v16 }
  0xdf   : > { %1514 = vmatprep.mubr.bf16.mxu0 %v8111_v10  ;;  %3556 = vmatpush1.bf16.msra.mxu0 %v8149_v25  ;;  %v8203_v10 = vld [vmem:[%s11451_s3 + $0x4b0] ss:$8 sps:$4 sm:$0xff]   ;;  %v1935_v25 = vrot.slane %v1875_v23, 4 }
  0xe0   : > { %3557 = vmatprep.subr.bf16.mxu0 %v8157_v26  ;;  %v9183_v26 = vrot.slane %v8587_v15, 4 }
  0xe1   : > { %2177 = vmatpush1.bf16.msra.mxu1 %v8214_v17 }
  0xe3   : > { %3558 = vmatpush1.bf16.msra.mxu0 %v8155_v29  ;;  %v1937_v29 = vsel %vm11473_vm0, %v1935_v25, %v9183_v26 }
  0xe4   : > { %3559 = vmatprep.subr.bf16.mxu0 %v8163_v31  ;;  %2180 = vmatprep.mubr.bf16.mxu1 %v1937_v29  ;;  %v8226_v31 = vld [vmem:[%s11451_s3 + $0x4f4] ss:$8 sps:$4 sm:$0xff]  }
  0xe6   : > { %1515 = vmatmul.mubr.bf16.gmra.mrb[8].mxu0 %v8113_v20  ;;  %v8218_v20 = vld [vmem:[%s11451_s3 + $0x1f4] ss:$8 sps:$4 sm:$0xff]  }
  0xe7   : > { %1524 = vmatprep.mubr.bf16.mxu0 %v8114_v22  ;;  %3560 = vmatpush1.bf16.msra.mxu0 %v8161_v35  ;;  %v8223_v22 = vld [vmem:[%s11451_s3 + $0x4e4] ss:$8 sps:$4 sm:$0xff]   ;;  %v8227_v35 = vld [vmem:[%s11451_s3] ss:$8 sps:$4 sm:$0xff]  }
  0xe8   : > { %3561 = vmatprep.subr.bf16.mxu0 %v8169_v36  ;;  %2178 = vmatprep.subr.bf16.mxu1 %v8218_v20 }
  0xe9   : > { %2179 = vmatpush1.bf16.msra.mxu1 %v8220_v21 }
  0xea   : > { %2431 = vmatprep.subr.bf16.mxu1 %v8229_v33 }
  0xeb   : > { %3562 = vmatpush1.bf16.msra.mxu0 %v8167_v39  ;;  %v8232_v39 = vld [vmem:[%s11451_s3 + $0x14] ss:$8 sps:$4 sm:$0xff]  }
  0xec   : > { %3563 = vmatprep.subr.bf16.mxu0 %v8175_v41  ;;  %v8235_v41 = vld [vmem:[%s11451_s3 + $0x24] ss:$8 sps:$4 sm:$0xff]  }
  0xee   : > { %1525 = vmatmul.mubr.bf16.gmra.mrb[12].mxu0 %v8116_v30  ;;  %v1934_v30 = vsel %vm11473_vm0, %v1932_v28, %v9183_v26 }
  0xef   : > { %1534 = vmatprep.mubr.bf16.mxu0 %v8117_v32  ;;  %3564 = vmatpush1.bf16.msra.mxu0 %v8173_v45  ;;  %v8224_v32 = vld [vmem:[%s11451_s3 + $0x4f0] ss:$8 sps:$4 sm:$0xff]   ;;  %v8241_v45 = vld [vmem:[%s11451_s3 + $0x44] ss:$8 sps:$4 sm:$0xff]  }
  0xf0   : > { %3565 = vmatprep.subr.bf16.mxu0 %v8181_v46  ;;  %2181 = vmatmul.mubr.bf16.vlgmr.msra.gmra.mrb[0].mxu1 %v1934_v30  ;;  %v8239_v46 = vld [vmem:[%s11451_s3 + $0x40] ss:$8 sps:$4 sm:$0xff]  }
  0xf1   : > { %2432 = vmatpush1.bf16.msra.mxu1 %v8227_v35 }
  0xf2   : > { %2433 = vmatprep.subr.bf16.mxu1 %v8232_v39 }
  0xf3   : > { %3566 = vmatpush1.bf16.msra.mxu0 %v8179_v49  ;;  %v8247_v49 = vld [vmem:[%s11451_s3 + $0x64] ss:$8 sps:$4 sm:$0xff]  }
  0xf4   : > { %3567 = vmatprep.subr.bf16.mxu0 %v8187_v51  ;;  %v8250_v51 = vld [vmem:[%s11451_s3 + $0x74] ss:$8 sps:$4 sm:$0xff]  }
  0xf6   : > { %1535 = vmatmul.mubr.bf16.gmra.mrb[16].mxu0 %v8119_v40  ;;  %v8230_v40 = vld [vmem:[%s11451_s3 + $0x10] ss:$8 sps:$4 sm:$0xff]  }
  0xf7   : > { %1544 = vmatprep.mubr.bf16.mxu0 %v8120_v42  ;;  %3568 = vmatpush1.bf16.msra.mxu0 %v8185_v55  ;;  %v8233_v42 = vld [vmem:[%s11451_s3 + $0x20] ss:$8 sps:$4 sm:$0xff]   ;;  %v8256_v55 = vld [vmem:[%s11451_s3 + $0x94] ss:$8 sps:$4 sm:$0xff]  }
  0xf8   : > { %3569 = vmatprep.subr.bf16.mxu0 %v8193_v56  ;;  %2434 = vmatpush1.bf16.msra.mxu1 %v8230_v40  ;;  %v8254_v56 = vld [vmem:[%s11451_s3 + $0x90] ss:$8 sps:$4 sm:$0xff]  }
  0xf9   : > { %2435 = vmatprep.subr.bf16.mxu1 %v8235_v41 }
  0xfb   : > { %3570 = vmatpush1.bf16.msra.mxu0 %v8191_v59  ;;  %v8262_v59 = vld [vmem:[%s11451_s3 + $0xb4] ss:$8 sps:$4 sm:$0xff]  }
  0xfc   : > { %3571 = vmatprep.subr.bf16.mxu0 %v8199_v5  ;;  %2436 = vmatpush1.bf16.msra.mxu1 %v8233_v42  ;;  %v8272_v5 = vld [vmem:[%s11451_s3 + $0xf0] ss:$8 sps:$4 sm:$0xff]  }
  0xfd   : > { %2437 = vmatprep.subr.bf16.mxu1 %v8238_v43 }
  0xfe   : > { %1545 = vmatmul.mubr.bf16.gmra.mrb[20].mxu0 %v8122_v50  ;;  %v8245_v50 = vld [vmem:[%s11451_s3 + $0x60] ss:$8 sps:$4 sm:$0xff]  }
  0xff   : > { %1554 = vmatprep.mubr.bf16.mxu0 %v8123_v52  ;;  %3572 = vmatpush1.bf16.msra.mxu0 %v8197_v6  ;;  %v8248_v52 = vld [vmem:[%s11451_s3 + $0x70] ss:$8 sps:$4 sm:$0xff]  }
 0x100   : > { %3573 = vmatprep.subr.bf16.mxu0 %v8205_v9  ;;  %2438 = vmatpush1.bf16.msra.mxu1 %v8236_v44  ;;  %v8334_v44 = vld [vmem:[%s11451_s3 + $0x334] ss:$8 sps:$4 sm:$0xff]  }
 0x101   : > { %2439 = vmatprep.subr.bf16.mxu1 %v8241_v45  ;;  %v8590_v45 = vmov 1.0  }
 0x103   : > { %3574 = vmatpush1.bf16.msra.mxu0 %v8203_v10  ;;  %v8277_v10 = vld [vmem:[%s11451_s3 + $0x204] ss:$8 sps:$4 sm:$0xff]  }
 0x104   : > { %3575 = vmatprep.subr.bf16.mxu0 %v8211_v13  ;;  %2440 = vmatpush1.bf16.msra.mxu1 %v8239_v46 }
 0x105   : > { %2441 = vmatprep.subr.bf16.mxu1 %v8244_v47 }
 0x106   : > { %1555 = vmatmul.mubr.bf16.gmra.mrb[24].mxu0 %v8125_v60  ;;  %v8260_v60 = vld [vmem:[%s11451_s3 + $0xb0] ss:$8 sps:$4 sm:$0xff]  }
 0x107   : > { %1564 = vmatprep.mubr.bf16.mxu0 %v8126_v61  ;;  %3576 = vmatpush1.bf16.msra.mxu0 %v8209_v14  ;;  %v8265_v61 = vld [vmem:[%s11451_s3 + $0xc4] ss:$8 sps:$4 sm:$0xff]  }
 0x108   : > { %3577 = vmatprep.subr.bf16.mxu0 %v8217_v18  ;;  %2442 = vmatpush1.bf16.msra.mxu1 %v8242_v48 }
 0x109   : > { %2443 = vmatprep.subr.bf16.mxu1 %v8247_v49 }
 0x10b   : > { %3578 = vmatpush1.bf16.msra.mxu0 %v8215_v19 }
 0x10c   : > { %3579 = vmatprep.subr.bf16.mxu0 %v8223_v22  ;;  %2444 = vmatpush1.bf16.msra.mxu1 %v8245_v50 }
 0x10d   : > { %2445 = vmatprep.subr.bf16.mxu1 %v8250_v51  ;;  %v8335_v51 = vld [vmem:[%s11451_s3 + $0x340] ss:$8 sps:$4 sm:$0xff]  }
 0x10e   : > { %1565 = vmatmul.mubr.bf16.gmra.mrb[28].mxu0 %v8128_v0  ;;  %v8266_v0 = vld [vmem:[%s11451_s3 + $0xd0] ss:$8 sps:$4 sm:$0xff]  }
 0x10f   : > { %1574 = vmatprep.mubr.bf16.mxu0 %v6210_v1  ;;  %3580 = vmatpush1.bf16.msra.mxu0 %v8221_v24  ;;  %v469_v1 = vlaneseq }
 0x110   : > { %3581 = vmatprep.subr.bf16.mxu0 %v8226_v31  ;;  %2446 = vmatpush1.bf16.msra.mxu1 %v8248_v52  ;;  %v8588_v31 = vmov 0.0  }
 0x111   : > { %2447 = vmatprep.subr.bf16.mxu1 %v8253_v53  ;;  %v9295_v6 = vshrl.u32 %v469_v1, 7  ;;  %v9337_v46 = vpack.c.bf16 %v8590_v45, %v8588_v31 }
 0x113   : > { %3582 = vmatpush1.bf16.msra.mxu0 %v8224_v32  ;;  %v11459_v7 = vsub.s32 0, %v9295_v6  ;;  %v11458_v9 = vsub.s32 1, %v9295_v6 }
 0x114   : > { %2448 = vmatpush1.bf16.msra.mxu1 %v8251_v54 }
 0x115   : > { %2449 = vmatprep.subr.bf16.mxu1 %v8256_v55  ;;  %v9307_v11 = vrot.slane %v467_v8, %v11459_v7  ;;  %v9311_v12 = vrot.slane %v467_v8, %v11458_v9 }
 0x116   : > { %1575 = vmatmul.mubr.bf16.gmra.mrb[40].mxu0 %v6209_v2  ;;  %v8271_v2 = vld [vmem:[%s11451_s3 + $0xe4] ss:$8 sps:$4 sm:$0xff]  }
 0x118   : > { %2450 = vmatpush1.bf16.msra.mxu1 %v8254_v56 }
 0x119   : > { %2451 = vmatprep.subr.bf16.mxu1 %v8259_v57 }
 0x11c   : > { %2452 = vmatpush1.bf16.msra.mxu1 %v8257_v58 }
 0x11d   : > { %2453 = vmatprep.subr.bf16.mxu1 %v8262_v59 }
 0x120   : > { %2454 = vmatpush1.bf16.msra.mxu1 %v8260_v60 }
 0x121   : > { %2455 = vmatprep.subr.bf16.mxu1 %v8265_v61 }
 0x124   : > { %2456 = vmatpush1.bf16.msra.mxu1 %v8263_v62 }
 0x125   : > { %2457 = vmatprep.subr.bf16.mxu1 %v8268_v63 }
 0x128   : > { %2458 = vmatpush1.bf16.msra.mxu1 %v8266_v0 }
 0x129   : > { %2459 = vmatprep.subr.bf16.mxu1 %v8271_v2 }
 0x12c   : > { %2460 = vmatpush1.bf16.msra.mxu1 %v8269_v3 }
 0x12d   : > { %2461 = vmatprep.subr.bf16.mxu1 %v8274_v4 }
 0x130   : > { %2462 = vmatpush1.bf16.msra.mxu1 %v8272_v5 }
 0x131   : > { %2749 = vmatprep.subr.bf16.mxu1 %v8277_v10 }
 0x159   : > { %v9198_v34 = vpop.f32.mrb[32].mxu0 }
 0x15a   : > { %v9203_v36 = vpop.f32.mrb[33].mxu0  ;;  %v1335_v13 = vadd.f32 %v9198_v34, %v9307_v11 }
 0x15b   : > { %v1338_v37 = vpop.f32.mrb[34].mxu0  ;;  %v1337_v14 = vadd.f32 %v9203_v36, %v9311_v12 }
 0x15c   : > { %v1339_v38 = vpop.f32.mrb[35].mxu0 }
 0x1a1   : > { %v1455_v16 = vpop.f32.mrb[36].mxu0 }
 0x1a2   : > { %v9317_v17 = vadd.f32 %v1455_v16, %v1335_v13  ;;  %v1457_v18 = vpop.f32.mrb[37].mxu0 }
 0x1a3   : > { %v9319_v19 = vadd.f32 %v1457_v18, %v1337_v14  ;;  %v1459_v20 = vpop.f32.mrb[38].mxu0 }
 0x1a4   : > { %v1460_v21 = vpop.f32.mrb[39].mxu0 }
 0x1a9   : > { %v1496_v22 = vpop.f32.mrb[0].mxu0 }
 0x1aa   : > { %v7656_v23 = vadd.f32 %v1496_v22, %v9307_v11  ;;  %v1498_v24 = vpop.f32.mrb[1].mxu0 }
 0x1ab   : > { %v7657_v25 = vadd.f32 %v1498_v24, %v9311_v12  ;;  %v1500_v27 = vpop.f32.mrb[2].mxu0 }
 0x1ac   : > { %vm1585_vm1 = vcmp.gt.f32.partialorder %v7656_v23, 1.0  ;;  %v1591_v28 = vmul.f32 0.9, %v7656_v23  ;;  %v7658_v29 = vadd.f32 %v1500_v27, %v9307_v11  ;;  %v1502_v30 = vpop.f32.mrb[3].mxu0  ;;  %v8591_v27 = vmov 1.0|1.0  }
 0x1ad   : > { %v6307_v32 = vsel %vm1585_vm1, 1.0, %v8588_v31  ;;  %vm1586_vm2 = vcmp.gt.f32.partialorder %v7657_v25, 1.0  ;;  %v1592_v33 = vmul.f32 0.9, %v7657_v25  ;;  %v7659_v34 = vadd.f32 %v1502_v30, %v9311_v12  ;;  %vm9346_vm6 = vmpackc.low %vm1585_vm1, %vm8589_vm3  ;;  %v8338_v25 = vld [vmem:[%s11451_s3 + $0x350] ss:$8 sps:$4 sm:$0xff]  }
 0x1ae   : > { %v1784_v35 = vpack.c.bf16 %v6307_v32, %v8588_v31  ;;  %v6308_v36 = vsel %vm1586_vm2, 1.0, %v8588_v31  ;;  %v1593_v37 = vadd.f32 %v7658_v29, %v1591_v28  ;;  %vm9332_vm4 = vmpackc.low %vm1586_vm2, %vm8589_vm3  ;;  %v8341_v30 = vld [vmem:[%s11451_s3 + $0x360] ss:$8 sps:$4 sm:$0xff]  }
 0x1af   : > { %v1785_v38 = vpack.c.bf16 %v6308_v36, %v8588_v31  ;;  %v1594_v39 = vadd.f32 %v7659_v34, %v1592_v33  ;;  %8487 = vmatprep.mubr.msk.bf16.mxu0 %vm9332_vm4, %v9337_v46 }
 0x1b0   : > { %v1595_v40 = vsub.f32 %v1593_v37, %v6307_v32  ;;  %v9342_v47 = vrot.slane %v1784_v35, 4  ;;  %8490 = vmatmul.mubr.msk.bf16.vlgmr.msra.gmra.mrb[44].mxu0 %vm9346_vm6, %v9337_v46 }
 0x1b1   : > { %v1596_v41 = vsub.f32 %v1594_v39, %v6308_v36  ;;  %v1506_v42 = vpop.f32.mrb[4].mxu0  ;;  %v9330_v43 = vrot.slane %v1785_v38, 4 }
 0x1b2   : > { %v7660_v48 = vadd.f32 %v1506_v42, %v9307_v11  ;;  %vm1597_vm5 = vcmp.gt.f32.partialorder %v1595_v40, 1.0  ;;  %v1603_v49 = vmul.f32 0.9, %v1595_v40  ;;  %v1508_v50 = vpop.f32.mrb[5].mxu0  ;;  %v1939_v60 = vsel %vm11473_vm0, %v9183_v26, %v9342_v47 }
 0x1b3   : > { %v7661_v52 = vadd.f32 %v1508_v50, %v9311_v12  ;;  %vm1598_vm7 = vcmp.gt.f32.partialorder %v1596_v41, 1.0  ;;  %v1604_v53 = vmul.f32 0.9, %v1596_v41  ;;  %v1510_v54 = vpop.f32.mrb[6].mxu0  ;;  %v1941_v57 = vsel %vm11473_vm0, %v9183_v26, %v9330_v43 }
 0x1b4   : > { %v1605_v55 = vadd.f32 %v7660_v48, %v1603_v49  ;;  %v1512_v56 = vpop.f32.mrb[7].mxu0  ;;  %v6309_v58 = vsel %vm1597_vm5, 1.0, %v8588_v31  ;;  %2190 = vmatprep.mubr.bf16.mxu1 %v1941_v57  ;;  %v6310_v62 = vsel %vm1598_vm7, 1.0, %v8588_v31  ;;  %v7662_v0 = vadd.f32 %v1510_v54, %v9307_v11 }
 0x1b5   : > { %v1606_v59 = vadd.f32 %v7661_v52, %v1604_v53  ;;  %2191 = vmatmul.mubr.bf16.gmra.mrb[4].mxu1 %v1939_v60  ;;  %v7663_v3 = vadd.f32 %v1512_v56, %v9311_v12 }
 0x1b6   : > { %v1607_v61 = vsub.f32 %v1605_v55, %v6309_v58 }
 0x1b7   : > { %v1608_v63 = vsub.f32 %v1606_v59, %v6310_v62 }
 0x1b8   : > { %vm1609_vm8 = vcmp.gt.f32.partialorder %v1607_v61, 1.0  ;;  %v1615_v1 = vmul.f32 0.9, %v1607_v61 }
 0x1b9   : > { %v6311_v2 = vsel %vm1609_vm8, 1.0, %v8588_v31  ;;  %vm1610_vm9 = vcmp.gt.f32.partialorder %v1608_v63, 1.0  ;;  %v1616_v4 = vmul.f32 0.9, %v1608_v63  ;;  %v1516_v5 = vpop.f32.mrb[8].mxu0  ;;  %vm9382_vm12 = vmpackc.low %vm1609_vm8, %vm1597_vm5 }
 0x1ba   : > { %v1617_v8 = vadd.f32 %v7662_v0, %v1615_v1  ;;  %v1786_v26 = vpack.c.bf16 %v6311_v2, %v6309_v58  ;;  %v6312_v10 = vsel %vm1610_vm9, 1.0, %v8588_v31  ;;  %v1518_v13 = vpop.f32.mrb[9].mxu0  ;;  %vm9372_vm10 = vmpackc.low %vm1610_vm9, %vm1598_vm7  ;;  %v7664_v28 = vadd.f32 %v1516_v5, %v9307_v11 }
 0x1bb   : > { %v1618_v14 = vadd.f32 %v7663_v3, %v1616_v4  ;;  %v1787_v16 = vpack.c.bf16 %v6312_v10, %v6310_v62  ;;  %v1520_v18 = vpop.f32.mrb[10].mxu0  ;;  %8492 = vmatprep.mubr.msk.bf16.mxu0 %vm9372_vm10, %v8591_v27  ;;  %v7665_v33 = vadd.f32 %v1518_v13, %v9311_v12 }
 0x1bc   : > { %v1619_v20 = vsub.f32 %v1617_v8, %v6311_v2  ;;  %v1522_v21 = vpop.f32.mrb[11].mxu0  ;;  %v2987_v22 = vrot.slane %v1786_v26, 4  ;;  %8494 = vmatmul.mubr.msk.bf16.gmra.mrb[48].mxu0 %vm9382_vm12, %v8591_v27  ;;  %v7666_v49 = vadd.f32 %v1520_v18, %v9307_v11  ;;  %v8346_v2 = vld [vmem:[%s11451_s3 + $0x374] ss:$8 sps:$4 sm:$0xff]   ;;  %v8347_v8 = vld [vmem:[%s11451_s3 + $0x380] ss:$8 sps:$4 sm:$0xff]  }
 0x1bd   : > { %v1620_v23 = vsub.f32 %v1618_v14, %v6312_v10  ;;  %v2989_v24 = vrot.slane %v1787_v16, 4  ;;  %v7667_v54 = vadd.f32 %v1522_v21, %v9311_v12 }
 0x1be   : > { %vm1621_vm11 = vcmp.gt.f32.partialorder %v1619_v20, 1.0  ;;  %v1627_v29 = vmul.f32 0.9, %v1619_v20  ;;  %v9391_v32 = vsel %vm11473_vm0, %v9342_v47, %v2987_v22 }
 0x1bf   : > { %vm1622_vm13 = vcmp.gt.f32.partialorder %v1620_v23, 1.0  ;;  %v1628_v34 = vmul.f32 0.9, %v1620_v23  ;;  %v9396_v35 = vsel %vm11473_vm0, %v9330_v43, %v2989_v24  ;;  %v6313_v37 = vsel %vm1621_vm11, 1.0, %v8588_v31 }
 0x1c0   : > { %v1629_v36 = vadd.f32 %v7664_v28, %v1627_v29  ;;  %2200 = vmatprep.mubr.bf16.mxu1 %v9396_v35  ;;  %v6314_v41 = vsel %vm1622_vm13, 1.0, %v8588_v31 }
 0x1c1   : > { %v1630_v38 = vadd.f32 %v7665_v33, %v1628_v34  ;;  %v1526_v39 = vpop.f32.mrb[12].mxu0  ;;  %2201 = vmatmul.mubr.bf16.gmra.mrb[8].mxu1 %v9391_v32 }
 0x1c2   : > { %v1631_v40 = vsub.f32 %v1629_v36, %v6313_v37  ;;  %v1528_v42 = vpop.f32.mrb[13].mxu0  ;;  %v7668_v3 = vadd.f32 %v1526_v39, %v9307_v11 }
 0x1c3   : > { %v1632_v45 = vsub.f32 %v1630_v38, %v6314_v41  ;;  %v1530_v48 = vpop.f32.mrb[14].mxu0  ;;  %v7669_v26 = vadd.f32 %v1528_v42, %v9311_v12 }
 0x1c4   : > { %vm1633_vm14 = vcmp.gt.f32.partialorder %v1631_v40, 1.0  ;;  %v1639_v50 = vmul.f32 0.9, %v1631_v40  ;;  %v1532_v52 = vpop.f32.mrb[15].mxu0  ;;  %v7670_v34 = vadd.f32 %v1530_v48, %v9307_v11 }
 0x1c5   : > { %v6315_v53 = vsel %vm1633_vm14, 1.0, %v8588_v31  ;;  %vm1634_vm15 = vcmp.gt.f32.partialorder %v1632_v45, 1.0  ;;  %v1640_v55 = vmul.f32 0.9, %v1632_v45  ;;  %vm9420_vm3 = vmpackc.low %vm1633_vm14, %vm1621_vm11  ;;  %v7671_v36 = vadd.f32 %v1532_v52, %v9311_v12 }
 0x1c6   : > { %v1641_v56 = vadd.f32 %v7666_v49, %v1639_v50  ;;  %v1788_v57 = vpack.c.bf16 %v6315_v53, %v6313_v37  ;;  %v6316_v58 = vsel %vm1634_vm15, 1.0, %v8588_v31  ;;  %vm9410_vm1 = vmpackc.low %vm1634_vm15, %vm1622_vm13 }
 0x1c7   : > { %v1642_v59 = vadd.f32 %v7667_v54, %v1640_v55  ;;  %v1789_v60 = vpack.c.bf16 %v6316_v58, %v6314_v41  ;;  %8496 = vmatprep.mubr.msk.bf16.mxu0 %vm9410_vm1, %v8591_v27 }
 0x1c8   : > { %v1643_v61 = vsub.f32 %v1641_v56, %v6315_v53  ;;  %v2991_v62 = vrot.slane %v1788_v57, 4  ;;  %8498 = vmatmul.mubr.msk.bf16.gmra.mrb[52].mxu0 %vm9420_vm3, %v8591_v27  ;;  %v8352_v56 = vld [vmem:[%s11451_s3 + $0x394] ss:$8 sps:$4 sm:$0xff]  }
 0x1c9   : > { %v1644_v63 = vsub.f32 %v1642_v59, %v6316_v58  ;;  %v1536_v0 = vpop.f32.mrb[16].mxu0  ;;  %v2993_v1 = vrot.slane %v1789_v60, 4  ;;  %v8353_v59 = vld [vmem:[%s11451_s3 + $0x3a0] ss:$8 sps:$4 sm:$0xff]  }
 0x1ca   : > { %vm1645_vm2 = vcmp.gt.f32.partialorder %v1643_v61, 1.0  ;;  %v1651_v4 = vmul.f32 0.9, %v1643_v61  ;;  %v1538_v5 = vpop.f32.mrb[17].mxu0  ;;  %v9432_v20 = vsel %vm11473_vm0, %v2987_v22, %v2991_v62  ;;  %v7672_v57 = vadd.f32 %v1536_v0, %v9307_v11 }
 0x1cb   : > { %vm1646_vm5 = vcmp.gt.f32.partialorder %v1644_v63, 1.0  ;;  %v1652_v10 = vmul.f32 0.9, %v1644_v63  ;;  %v1540_v13 = vpop.f32.mrb[18].mxu0  ;;  %v9429_v18 = vsel %vm11473_vm0, %v2989_v24, %v2993_v1  ;;  %v6317_v21 = vsel %vm1645_vm2, 1.0, %v8588_v31 }
 0x1cc   : > { %v1653_v14 = vadd.f32 %v7668_v3, %v1651_v4  ;;  %v1542_v16 = vpop.f32.mrb[19].mxu0  ;;  %2210 = vmatprep.mubr.bf16.mxu1 %v9429_v18  ;;  %v6318_v29 = vsel %vm1646_vm5, 1.0, %v8588_v31  ;;  %v7673_v63 = vadd.f32 %v1538_v5, %v9311_v12 }
 0x1cd   : > { %v1654_v23 = vadd.f32 %v7669_v26, %v1652_v10  ;;  %2211 = vmatmul.mubr.bf16.gmra.mrb[12].mxu1 %v9432_v20 }
 0x1ce   : > { %v1655_v28 = vsub.f32 %v1653_v14, %v6317_v21 }
 0x1cf   : > { %v1656_v33 = vsub.f32 %v1654_v23, %v6318_v29  ;;  %v7674_v23 = vadd.f32 %v1540_v13, %v9307_v11 }
 0x1d0   : > { %vm1657_vm7 = vcmp.gt.f32.partialorder %v1655_v28, 1.0  ;;  %v1663_v24 = vmul.f32 0.9, %v1655_v28 }
 0x1d1   : > { %v6319_v22 = vsel %vm1657_vm7, 1.0, %v8588_v31  ;;  %vm1658_vm8 = vcmp.gt.f32.partialorder %v1656_v33, 1.0  ;;  %v1664_v37 = vmul.f32 0.9, %v1656_v33  ;;  %v1546_v38 = vpop.f32.mrb[20].mxu0  ;;  %vm9472_vm13 = vmpackc.low %vm1657_vm7, %vm1645_vm2 }
 0x1d2   : > { %v1665_v39 = vadd.f32 %v7670_v34, %v1663_v24  ;;  %v1790_v40 = vpack.c.bf16 %v6319_v22, %v6317_v21  ;;  %v6320_v41 = vsel %vm1658_vm8, 1.0, %v8588_v31  ;;  %v1548_v42 = vpop.f32.mrb[21].mxu0  ;;  %vm9460_vm9 = vmpackc.low %vm1658_vm8, %vm1646_vm5  ;;  %v7675_v34 = vadd.f32 %v1542_v16, %v9311_v12 }
 0x1d3   : > { %v1666_v45 = vadd.f32 %v7671_v36, %v1664_v37  ;;  %v1791_v49 = vpack.c.bf16 %v6320_v41, %v6318_v29  ;;  %v9446_v50 = vpop.f32.mrb[22].mxu0  ;;  %8500 = vmatprep.mubr.msk.bf16.mxu0 %vm9460_vm9, %v8591_v27 }
 0x1d4   : > { %v9448_v48 = vsub.f32 %v1665_v39, %v6319_v22  ;;  %v9450_v53 = vpop.f32.mrb[23].mxu0  ;;  %v9452_v54 = vrot.slane %v1790_v40, 4  ;;  %8502 = vmatmul.mubr.msk.bf16.gmra.mrb[56].mxu0 %vm9472_vm13, %v8591_v27 }
 0x1d5   : > { %v9454_v52 = vsub.f32 %v1666_v45, %v6320_v41  ;;  %v9456_v55 = vrot.slane %v1791_v49, 4 }
 0x1d6   : > { %vm1669_vm11 = vcmp.gt.f32.partialorder %v9448_v48, 1.0  ;;  %v1675_v58 = vmul.f32 0.9, %v9448_v48  ;;  %v9481_v60 = vsel %vm11473_vm0, %v2991_v62, %v9452_v54  ;;  %v8314_v48 = vld [vmem:[%s11451_s3 + $0x2d0] ss:$8 sps:$4 sm:$0xff]  }
 0x1d7   : > { %vm1670_vm14 = vcmp.gt.f32.partialorder %v9454_v52, 1.0  ;;  %v1676_v0 = vmul.f32 0.9, %v9454_v52  ;;  %v9488_v61 = vsel %vm11473_vm0, %v2993_v1, %v9456_v55  ;;  %v6321_v4 = vsel %vm1669_vm11, 1.0, %v8588_v31  ;;  %v8313_v52 = vld [vmem:[%s11451_s3 + $0x2c4] ss:$8 sps:$4 sm:$0xff]  }
 0x1d8   : > { %v1677_v3 = vadd.f32 %v7672_v57, %v1675_v58  ;;  %2220 = vmatprep.mubr.bf16.mxu1 %v9488_v61  ;;  %v6322_v10 = vsel %vm1670_vm14, 1.0, %v8588_v31  ;;  %v7676_v57 = vadd.f32 %v1546_v38, %v9307_v11 }
 0x1d9   : > { %v1678_v26 = vadd.f32 %v7673_v63, %v1676_v0  ;;  %v9494_v62 = vpop.f32.mrb[24].mxu0  ;;  %2221 = vmatmul.mubr.bf16.gmra.mrb[16].mxu1 %v9481_v60  ;;  %v7677_v0 = vadd.f32 %v1548_v42, %v9311_v12 }
 0x1da   : > { %v9497_v5 = vsub.f32 %v1677_v3, %v6321_v4  ;;  %v9502_v1 = vpop.f32.mrb[25].mxu0 }
 0x1db   : > { %v9504_v14 = vsub.f32 %v1678_v26, %v6322_v10  ;;  %v9506_v21 = vpop.f32.mrb[26].mxu0 }
 0x1dc   : > { %vm1681_vm15 = vcmp.gt.f32.partialorder %v9497_v5, 1.0  ;;  %v1687_v28 = vmul.f32 0.9, %v9497_v5  ;;  %v9511_v29 = vpop.f32.mrb[27].mxu0  ;;  %v8319_v5 = vld [vmem:[%s11451_s3 + $0x2e4] ss:$8 sps:$4 sm:$0xff]  }
 0x1dd   : > { %v6323_v33 = vsel %vm1681_vm15, 1.0, %v8588_v31  ;;  %vm1682_vm2 = vcmp.gt.f32.partialorder %v9504_v14, 1.0  ;;  %v1688_v24 = vmul.f32 0.9, %v9504_v14  ;;  %v8311_v14 = vld [vmem:[%s11451_s3 + $0x2c0] ss:$8 sps:$4 sm:$0xff]  }
 0x1de   : > { %v1689_v22 = vadd.f32 %v7674_v23, %v1687_v28  ;;  %v9519_v36 = vpack.c.bf16 %v6323_v33, %v6321_v4  ;;  %v6324_v13 = vsel %vm1682_vm2, 1.0, %v8588_v31 }
 0x1df   : > { %v1690_v37 = vadd.f32 %v7675_v34, %v1688_v24  ;;  %v1793_v39 = vpack.c.bf16 %v6324_v13, %v6322_v10 }
 0x1e0   : > { %v9524_v40 = vsub.f32 %v1689_v22, %v6323_v33  ;;  %1814 = vst [vmem:[#allocation2 + $0x60] sm:$0xff] %v9519_v36  ;;  %v1954_v49 = vrot.slane %v9519_v36, 4  ;;  %v7678_v22 = vadd.f32 %v9446_v50, %v9307_v11 }
 0x1e1   : > { %v9527_v41 = vsub.f32 %v1690_v37, %v6324_v13  ;;  %1815 = vst [vmem:[#allocation2 + $0x68] sm:$0xff] %v1793_v39  ;;  %v9529_v16 = vpop.f32.mrb[28].mxu0  ;;  %v1956_v45 = vrot.slane %v1793_v39, 4  ;;  %v7679_v37 = vadd.f32 %v9450_v53, %v9311_v12 }
 0x1e2   : > { %vm11457_vm5 = vcmp.gt.f32.partialorder %v9524_v40, 1.0  ;;  %v1699_v58 = vmul.f32 0.9, %v9524_v40  ;;  %v9535_v63 = vpop.f32.mrb[29].mxu0  ;;  %v1955_v42 = vsel %vm11473_vm0, %v9452_v54, %v1954_v49 }
 0x1e3   : > { %vm11462_vm7 = vcmp.gt.f32.partialorder %v9527_v41, 1.0  ;;  %v1700_v3 = vmul.f32 0.9, %v9527_v41  ;;  %v9540_v4 = vpop.f32.mrb[30].mxu0  ;;  %v1957_v38 = vsel %vm11473_vm0, %v9456_v55, %v1956_v45  ;;  %v6325_v23 = vsel %vm11457_vm5, 1.0, %v8588_v31 }
 0x1e4   : > { %v1701_v26 = vadd.f32 %v7676_v57, %v1699_v58  ;;  %v9542_v10 = vpop.f32.mrb[31].mxu0  ;;  %2230 = vmatprep.mubr.bf16.mxu1 %v1957_v38  ;;  %v6326_v34 = vsel %vm11462_vm7, 1.0, %v8588_v31 }
 0x1e5   : > { %v1702_v28 = vadd.f32 %v7677_v0, %v1700_v3  ;;  %2231 = vmatmul.mubr.bf16.gmra.mrb[20].mxu1 %v1955_v42 }
 0x1e6   : > { %v9551_v33 = vsub.f32 %v1701_v26, %v6325_v23 }
 0x1e7   : > { %v9556_v24 = vsub.f32 %v1702_v28, %v6326_v34 }
 0x1e8   : > { %vm11460_vm8 = vcmp.gt.f32.partialorder %v9551_v33, 1.0  ;;  %v1711_v36 = vmul.f32 0.9, %v9551_v33 }
 0x1e9   : > { %v6327_v13 = vsel %vm11460_vm8, 1.0, %v8588_v31  ;;  %vm11461_vm5 = vcmp.gt.f32.partialorder %v9556_v24, 1.0  ;;  %v1712_v39 = vmul.f32 0.9, %v9556_v24  ;;  %v1576_v57 = vpop.f32.mrb[40].mxu0 }
 0x1ea   : > { %v1713_v58 = vadd.f32 %v7678_v22, %v1711_v36  ;;  %v1794_v0 = vpack.c.bf16 %v6327_v13, %v6325_v23  ;;  %v6328_v50 = vsel %vm11461_vm5, 1.0, %v8588_v31  ;;  %v9573_v3 = vadd.f32 %v1576_v57, %v9317_v17  ;;  %v1578_v26 = vpop.f32.mrb[41].mxu0 }
 0x1eb   : > { %v1714_v38 = vadd.f32 %v7679_v37, %v1712_v39  ;;  %v1795_v28 = vpack.c.bf16 %v6328_v50, %v6326_v34  ;;  %v9576_v42 = vadd.f32 %v1578_v26, %v9319_v19  ;;  %v1580_v53 = vpop.f32.mrb[42].mxu0  ;;  %v7680_v17 = vadd.f32 %v9494_v62, %v9307_v11 }
 0x1ec   : > { %v9578_v9 = vsub.f32 %v1713_v58, %v6327_v13  ;;  %1816 = vst [vmem:[#allocation2 + $0x70] sm:$0xff] %v1794_v0  ;;  %v1958_v7 = vrot.slane %v1794_v0, 4  ;;  %v1581_v22 = vpop.f32.mrb[43].mxu0  ;;  %v7681_v19 = vadd.f32 %v9502_v1, %v9311_v12 }
 0x1ed   : > { %v9580_v23 = vsub.f32 %v1714_v38, %v6328_v50  ;;  %1817 = vst [vmem:[#allocation2 + $0x78] sm:$0xff] %v1795_v28  ;;  %v1960_v36 = vrot.slane %v1795_v28, 4  ;;  %v7683_v38 = vadd.f32 %v9511_v29, %v9311_v12  ;;  %v7684_v29 = vadd.f32 %v9529_v16, %v9307_v11 }
 0x1ee   : > { %vm11463_vm8 = vcmp.gt.f32.partialorder %v9578_v9, 1.0  ;;  %v1723_v34 = vmul.f32 0.9, %v9578_v9  ;;  %v1959_v57 = vsel %vm11473_vm0, %v1954_v49, %v1958_v7 }
 0x1ef   : > { %vm11466_vm5 = vcmp.gt.f32.partialorder %v9580_v23, 1.0  ;;  %v1724_v13 = vmul.f32 0.9, %v9580_v23  ;;  %v1961_v37 = vsel %vm11473_vm0, %v1956_v45, %v1960_v36  ;;  %v6329_v62 = vsel %vm11463_vm8, 1.0, %v8588_v31 }
 0x1f0   : > { %v1725_v39 = vadd.f32 %v7680_v17, %v1723_v34  ;;  %2240 = vmatprep.mubr.bf16.mxu1 %v1961_v37  ;;  %v6330_v1 = vsel %vm11466_vm5, 1.0, %v8588_v31  ;;  %v7682_v45 = vadd.f32 %v9506_v21, %v9307_v11 }
 0x1f1   : > { %v1726_v58 = vadd.f32 %v7681_v19, %v1724_v13  ;;  %2241 = vmatmul.mubr.bf16.gmra.mrb[24].mxu1 %v1959_v57 }
 0x1f2   : > { %v9595_v0 = vsub.f32 %v1725_v39, %v6329_v62 }
 0x1f3   : > { %v9600_v50 = vsub.f32 %v1726_v58, %v6330_v1 }
 0x1f4   : > { %vm11464_vm7 = vcmp.gt.f32.partialorder %v9595_v0, 1.0  ;;  %v1735_v49 = vmul.f32 0.9, %v9595_v0 }
 0x1f5   : > { %v6331_v26 = vsel %vm11464_vm7, 1.0, %v8588_v31  ;;  %vm11465_vm8 = vcmp.gt.f32.partialorder %v9600_v50, 1.0  ;;  %v1736_v28 = vmul.f32 0.9, %v9600_v50 }
 0x1f6   : > { %v1737_v53 = vadd.f32 %v7682_v45, %v1735_v49  ;;  %v1796_v22 = vpack.c.bf16 %v6331_v26, %v6329_v62  ;;  %v6332_v21 = vsel %vm11465_vm8, 1.0, %v8588_v31  ;;  %v7685_v62 = vadd.f32 %v9535_v63, %v9311_v12 }
 0x1f7   : > { %v1738_v17 = vadd.f32 %v7683_v38, %v1736_v28  ;;  %v1797_v34 = vpack.c.bf16 %v6332_v21, %v6330_v1 }
 0x1f8   : > { %v9616_v19 = vsub.f32 %v1737_v53, %v6331_v26  ;;  %v9618_v13 = vrot.slane %v1796_v22, 4  ;;  %v7687_v22 = vadd.f32 %v9542_v10, %v9311_v12 }
 0x1f9   : > { %v9620_v37 = vsub.f32 %v1738_v17, %v6332_v21  ;;  %v9622_v39 = vrot.slane %v1797_v34, 4 }
 0x1fa   : > { %vm11467_vm7 = vcmp.gt.f32.partialorder %v9616_v19, 1.0  ;;  %v1747_v57 = vmul.f32 0.9, %v9616_v19  ;;  %v1963_v49 = vsel %vm11473_vm0, %v1958_v7, %v9618_v13 }
 0x1fb   : > { %vm11469_vm8 = vcmp.gt.f32.partialorder %v9620_v37, 1.0  ;;  %v1748_v58 = vmul.f32 0.9, %v9620_v37  ;;  %v1965_v1 = vsel %vm11473_vm0, %v1960_v36, %v9622_v39  ;;  %v6333_v16 = vsel %vm11467_vm7, 1.0, %v8588_v31 }
 0x1fc   : > { %v1749_v45 = vadd.f32 %v7684_v29, %v1747_v57  ;;  %2250 = vmatprep.mubr.bf16.mxu1 %v1965_v1  ;;  %v6334_v63 = vsel %vm11469_vm8, 1.0, %v8588_v31  ;;  %v7686_v36 = vadd.f32 %v9540_v4, %v9307_v11 }
 0x1fd   : > { %v1750_v26 = vadd.f32 %v7685_v62, %v1748_v58  ;;  %2251 = vmatmul.mubr.bf16.gmra.mrb[28].mxu1 %v1963_v49 }
 0x1fe   : > { %v9639_v38 = vsub.f32 %v1749_v45, %v6333_v16 }
 0x1ff   : > { %v9644_v28 = vsub.f32 %v1750_v26, %v6334_v63 }
 0x200   : > { %vm11468_vm5 = vcmp.gt.f32.partialorder %v9639_v38, 1.0  ;;  %v1759_v7 = vmul.f32 0.9, %v9639_v38 }
 0x201   : > { %v6335_v53 = vsel %vm11468_vm5, 1.0, %v8588_v31  ;;  %vm11470_vm7 = vcmp.gt.f32.partialorder %v9644_v28, 1.0  ;;  %v1760_v21 = vmul.f32 0.9, %v9644_v28 }
 0x202   : > { %v1761_v17 = vadd.f32 %v7686_v36, %v1759_v7  ;;  %v9657_v34 = vpack.c.bf16 %v6335_v53, %v6333_v16  ;;  %v6336_v11 = vsel %vm11470_vm7, 1.0, %v8588_v31  ;;  %v11523_v36 = vmov 0 }
 0x203   : > { %v1762_v4 = vadd.f32 %v7687_v22, %v1760_v21  ;;  %v9662_v29 = vpack.c.bf16 %v6336_v11, %v6334_v63  ;;  %v11525_v22 = vmov 0 }
 0x204   : > { %v9664_v57 = vsub.f32 %v1761_v17, %v6335_v53  ;;  %1820 = vst [vmem:[#allocation2 + $0x90] sm:$0xff] %v9657_v34 }
 0x205   : > { %v9667_v62 = vsub.f32 %v1762_v4, %v6336_v11  ;;  %1821 = vst [vmem:[#allocation2 + $0x98] sm:$0xff] %v9662_v29 }
 0x206   : > { %vm11471_vm5 = vcmp.gt.f32.partialorder %v9664_v57, 1.0  ;;  %v1771_v12 = vmul.f32 0.9, %v9664_v57 }
 0x207   : > { %vm11472_vm8 = vcmp.gt.f32.partialorder %v9667_v62, 1.0  ;;  %v1772_v10 = vmul.f32 0.9, %v9667_v62  ;;  %v6337_v1 = vsel %vm11471_vm5, 1.0, %v8588_v31 }
 0x208   : > { %v1773_v58 = vadd.f32 %v1771_v12, %v9573_v3  ;;  %v6338_v16 = vsel %vm11472_vm8, 1.0, %v8588_v31  ;;  %vm9798_vm8 = vmpackc.low %vm1682_vm2, %vm1670_vm14  ;;  %vm11531_vm2 = vcmp.gt.f32.partialorder %v9527_v41, 1.0  ;;  %v8317_v41 = vld [vmem:[%s11451_s3 + $0x2e0] ss:$8 sps:$4 sm:$0xff]  }
 0x209   : > { %v1774_v45 = vadd.f32 %v1772_v10, %v9576_v42  ;;  %v8275_v10 = vld [vmem:[%s11451_s3 + $0x200] ss:$8 sps:$4 sm:$0xff]   ;;  %vm9821_vm14 = vmpackc.low %vm1681_vm15, %vm1669_vm11  ;;  %vm11536_vm11 = vcmp.gt.f32.partialorder %v9551_v33, 1.0  ;;  %v8325_v33 = vld [vmem:[%s11451_s3 + $0x304] ss:$8 sps:$4 sm:$0xff]  }
 0x20a   : > { %v1775_v49 = vsub.f32 %v1773_v58, %v6337_v1  ;;  %v8280_v58 = vld [vmem:[%s11451_s3 + $0x214] ss:$8 sps:$4 sm:$0xff]  }
 0x20b   : > { %v1776_v26 = vsub.f32 %v1774_v45, %v6338_v16  ;;  %v1876_v63 = vld [vmem:[#allocation2 + $0x90] sm:$0xf]  ;;  %v8283_v45 = vld [vmem:[%s11451_s3 + $0x224] ss:$8 sps:$4 sm:$0xff]  }
 0x20c   : > { %vm9682_vm7 = vcmp.gt.f32.partialorder %v1775_v49, 1.0  ;;  %v1877_v7 = vld [vmem:[#allocation2 + $0x98] sm:$0xf]  ;;  %v1966_v53 = vrot.slane %v1876_v63, 4  ;;  %v8281_v49 = vld [vmem:[%s11451_s3 + $0x220] ss:$8 sps:$4 sm:$0xff]  }
 0x20d   : > { %v11524_v36 = vsel %vm9682_vm7, 4294967295, %v11523_v36  ;;  %v6339_v3 = vsel %vm9682_vm7, 1.0, %v8588_v31  ;;  %vm9689_vm5 = vcmp.gt.f32.partialorder %v1776_v26, 1.0  ;;  %v1968_v42 = vrot.slane %v1877_v7, 4  ;;  %v8284_v26 = vld [vmem:[%s11451_s3 + $0x230] ss:$8 sps:$4 sm:$0xff]  }
 0x20e   : > { %v11526_v22 = vsel %vm9689_vm5, 4294967295, %v11525_v22  ;;  %v1800_v21 = vpack.c.bf16 %v6339_v3, %v6337_v1  ;;  %v6340_v17 = vsel %vm9689_vm5, 1.0, %v8588_v31  ;;  %v1967_v12 = vsel %vm11473_vm0, %v9618_v13, %v1966_v53  ;;  %v8278_v1 = vld [vmem:[%s11451_s3 + $0x210] ss:$8 sps:$4 sm:$0xff]   ;;  %v8289_v63 = vld [vmem:[%s11451_s3 + $0x244] ss:$8 sps:$4 sm:$0xff]  }
 0x20f   : > { %v1801_v11 = vpack.c.bf16 %v6340_v17, %v6338_v16  ;;  %v1969_v4 = vsel %vm11473_vm0, %v9622_v39, %v1968_v42  ;;  %v8286_v16 = vld [vmem:[%s11451_s3 + $0x234] ss:$8 sps:$4 sm:$0xff]   ;;  %v8287_v7 = vld [vmem:[%s11451_s3 + $0x240] ss:$8 sps:$4 sm:$0xff]   ;;  %v8290_v53 = vld [vmem:[%s11451_s3 + $0x250] ss:$8 sps:$4 sm:$0xff]  }
 0x210   : > { %1822 = vst [vmem:[#allocation2 + $0xa0] sm:$0xff] %v1800_v21  ;;  %2260 = vmatprep.mubr.bf16.mxu1 %v1969_v4  ;;  %v8295_v3 = vld [vmem:[%s11451_s3 + $0x264] ss:$8 sps:$4 sm:$0xff]   ;;  %v8293_v42 = vld [vmem:[%s11451_s3 + $0x260] ss:$8 sps:$4 sm:$0xff]   ;;  %vm11532_vm0 = vcmp.gt.f32.partialorder %v9556_v24, 1.0 }
 0x211   : > { %1823 = vst [vmem:[#allocation2 + $0xa8] sm:$0xff] %v1801_v11  ;;  %2261 = vmatmul.mubr.bf16.gmra.mrb[32].mxu1 %v1967_v12  ;;  %v8298_v21 = vld [vmem:[%s11451_s3 + $0x274] ss:$8 sps:$4 sm:$0xff]   ;;  %v8296_v17 = vld [vmem:[%s11451_s3 + $0x270] ss:$8 sps:$4 sm:$0xff]   ;;  %vm9832_vm7 = vmpackc.low %vm11532_vm0, %vm11531_vm2  ;;  %vm11535_vm0 = vcmp.gt.f32.partialorder %v9524_v40, 1.0 }
 0x212   : > { %2463 = vmatprep.mubr.bf16.mxu1 %v8587_v15  ;;  %v8301_v11 = vld [vmem:[%s11451_s3 + $0x284] ss:$8 sps:$4 sm:$0xff]   ;;  %v8299_v4 = vld [vmem:[%s11451_s3 + $0x280] ss:$8 sps:$4 sm:$0xff]   ;;  %v8304_v12 = vld [vmem:[%s11451_s3 + $0x294] ss:$8 sps:$4 sm:$0xff]  }
 0x213   : > { %v8322_v24 = vld [vmem:[%s11451_s3 + $0x2f4] ss:$8 sps:$4 sm:$0xff]   ;;  %vm9855_vm15 = vmpackc.low %vm11536_vm11, %vm11535_vm0  ;;  %vm11539_vm2 = vcmp.gt.f32.partialorder %v9580_v23, 1.0  ;;  %vm11540_vm5 = vcmp.gt.f32.partialorder %v9600_v50, 1.0  ;;  %v8320_v40 = vld [vmem:[%s11451_s3 + $0x2f0] ss:$8 sps:$4 sm:$0xff]  }
 0x214   : > { %vm11544_vm0 = vcmp.gt.f32.partialorder %v9595_v0, 1.0  ;;  %v9890_v50 = vld [vmem:[#allocation2 + $0x8] sm:$0xff]  ;;  %v8326_v0 = vld [vmem:[%s11451_s3 + $0x310] ss:$8 sps:$4 sm:$0xff]  }
 0x215   : > { %v8400_v23 = vld [vmem:[%s11453_s5 + $0x130] sm:$0xff]  }
 0x219   : > { %2464 = vmatmul.mubr.bf16.vlgmr.msra.gmra.mrb[0].mxu1 %v8587_v15 }
 0x21a   : > { %2750 = vmatpush1.bf16.msra.mxu1 %v8275_v10  ;;  %2473 = vmatprep.mubr.bf16.mxu1 %v8587_v15  ;;  %v8302_v10 = vld [vmem:[%s11451_s3 + $0x290] ss:$8 sps:$4 sm:$0xff]  }
 0x21b   : > { %2751 = vmatprep.subr.bf16.mxu1 %v8280_v58  ;;  %v8307_v58 = vld [vmem:[%s11451_s3 + $0x2a4] ss:$8 sps:$4 sm:$0xff]  }
 0x21e   : > { %2752 = vmatpush1.bf16.msra.mxu1 %v8278_v1  ;;  %v8305_v1 = vld [vmem:[%s11451_s3 + $0x2a0] ss:$8 sps:$4 sm:$0xff]  }
 0x21f   : > { %2753 = vmatprep.subr.bf16.mxu1 %v8283_v45  ;;  %v8310_v45 = vld [vmem:[%s11451_s3 + $0x2b4] ss:$8 sps:$4 sm:$0xff]  }
 0x221   : > { %2474 = vmatmul.mubr.bf16.gmra.mrb[4].mxu1 %v8587_v15  ;;  %v8292_v15 = vld [vmem:[%s11451_s3 + $0x254] ss:$8 sps:$4 sm:$0xff]  }
 0x222   : > { %8505 = vmatprep.mubr.msk.bf16.mxu1 %vm9332_vm4, %v9337_v46  ;;  %2754 = vmatpush1.bf16.msra.mxu1 %v8281_v49 }
 0x223   : > { %2755 = vmatprep.subr.bf16.mxu1 %v8286_v16  ;;  %v8308_v16 = vld [vmem:[%s11451_s3 + $0x2b0] ss:$8 sps:$4 sm:$0xff]  }
 0x226   : > { %2756 = vmatpush1.bf16.msra.mxu1 %v8284_v26  ;;  %v8316_v26 = vld [vmem:[%s11451_s3 + $0x2d4] ss:$8 sps:$4 sm:$0xff]  }
 0x227   : > { %2757 = vmatprep.subr.bf16.mxu1 %v8289_v63  ;;  %v8359_v63 = vld [vmem:[%s11451_s3 + $0x3c0] ss:$8 sps:$4 sm:$0xff]  }
 0x229   : > { %8508 = vmatmul.mubr.msk.bf16.gmra.mrb[8].mxu1 %vm9346_vm6, %v9337_v46 }
 0x22a   : > { %8510 = vmatprep.mubr.msk.bf16.mxu1 %vm9372_vm10, %v8591_v27  ;;  %2758 = vmatpush1.bf16.msra.mxu1 %v8287_v7  ;;  %v11533_v7 = vmov 0 }
 0x22b   : > { %2759 = vmatprep.subr.bf16.mxu1 %v8292_v15  ;;  %v11534_v7 = vsel %vm9832_vm7, 4294967295, %v11533_v7 }
 0x22e   : > { %2760 = vmatpush1.bf16.msra.mxu1 %v8290_v53  ;;  %v8395_v53 = vld [vmem:[%s11453_s5 + $0x168] sm:$0xff]  }
 0x22f   : > { %2761 = vmatprep.subr.bf16.mxu1 %v8295_v3  ;;  %v8323_v3 = vld [vmem:[%s11451_s3 + $0x300] ss:$8 sps:$4 sm:$0xff]  }
 0x231   : > { %8512 = vmatmul.mubr.msk.bf16.gmra.mrb[12].mxu1 %vm9382_vm12, %v8591_v27 }
 0x232   : > { %8514 = vmatprep.mubr.msk.bf16.mxu1 %vm9410_vm1, %v8591_v27  ;;  %2762 = vmatpush1.bf16.msra.mxu1 %v8293_v42  ;;  %v8331_v42 = vld [vmem:[%s11451_s3 + $0x324] ss:$8 sps:$4 sm:$0xff]  }
 0x233   : > { %2763 = vmatprep.subr.bf16.mxu1 %v8298_v21  ;;  %v8329_v21 = vld [vmem:[%s11451_s3 + $0x320] ss:$8 sps:$4 sm:$0xff]  }
 0x236   : > { %2764 = vmatpush1.bf16.msra.mxu1 %v8296_v17  ;;  %v8332_v17 = vld [vmem:[%s11451_s3 + $0x330] ss:$8 sps:$4 sm:$0xff]  }
 0x237   : > { %2765 = vmatprep.subr.bf16.mxu1 %v8301_v11  ;;  %v8337_v11 = vld [vmem:[%s11451_s3 + $0x344] ss:$8 sps:$4 sm:$0xff]  }
 0x239   : > { %8516 = vmatmul.mubr.msk.bf16.gmra.mrb[16].mxu1 %vm9420_vm3, %v8591_v27 }
 0x23a   : > { %8518 = vmatprep.mubr.msk.bf16.mxu1 %vm9460_vm9, %v8591_v27  ;;  %2766 = vmatpush1.bf16.msra.mxu1 %v8299_v4  ;;  %v8343_v4 = vld [vmem:[%s11451_s3 + $0x364] ss:$8 sps:$4 sm:$0xff]  }
 0x23b   : > { %2767 = vmatprep.subr.bf16.mxu1 %v8304_v12  ;;  %v8344_v12 = vld [vmem:[%s11451_s3 + $0x370] ss:$8 sps:$4 sm:$0xff]  }
 0x23e   : > { %2768 = vmatpush1.bf16.msra.mxu1 %v8302_v10  ;;  %v8349_v10 = vld [vmem:[%s11451_s3 + $0x384] ss:$8 sps:$4 sm:$0xff]  }
 0x23f   : > { %2769 = vmatprep.subr.bf16.mxu1 %v8307_v58  ;;  %v8350_v58 = vld [vmem:[%s11451_s3 + $0x390] ss:$8 sps:$4 sm:$0xff]  }
 0x241   : > { %8520 = vmatmul.mubr.msk.bf16.gmra.mrb[20].mxu1 %vm9472_vm13, %v8591_v27 }
 0x242   : > { %8522 = vmatprep.mubr.msk.bf16.mxu1 %vm9798_vm8, %v8591_v27  ;;  %2770 = vmatpush1.bf16.msra.mxu1 %v8305_v1  ;;  %v8355_v1 = vld [vmem:[%s11451_s3 + $0x3a4] ss:$8 sps:$4 sm:$0xff]  }
 0x243   : > { %2771 = vmatprep.subr.bf16.mxu1 %v8310_v45 }
 0x246   : > { %2772 = vmatpush1.bf16.msra.mxu1 %v8308_v16 }
 0x247   : > { %2773 = vmatprep.subr.bf16.mxu1 %v8313_v52  ;;  %v8358_v52 = vld [vmem:[%s11451_s3 + $0x3b4] ss:$8 sps:$4 sm:$0xff]  }
 0x249   : > { %8524 = vmatmul.mubr.msk.bf16.gmra.mrb[24].mxu1 %vm9821_vm14, %v8591_v27 }
 0x24a   : > { %8526 = vmatprep.mubr.msk.bf16.mxu1 %vm9832_vm7, %v8591_v27  ;;  %2774 = vmatpush1.bf16.msra.mxu1 %v8311_v14  ;;  %vm9866_vm7 = vmpackc.low %vm11540_vm5, %vm11539_vm2  ;;  %vm11543_vm5 = vcmp.gt.f32.partialorder %v9578_v9, 1.0  ;;  %v8328_v9 = vld [vmem:[%s11451_s3 + $0x314] ss:$8 sps:$4 sm:$0xff]  }
 0x24b   : > { %2775 = vmatprep.subr.bf16.mxu1 %v8316_v26  ;;  %vm9883_vm11 = vmpackc.low %vm11544_vm0, %vm11543_vm5  ;;  %v8356_v26 = vld [vmem:[%s11451_s3 + $0x3b0] ss:$8 sps:$4 sm:$0xff]  }
 0x24e   : > { %2776 = vmatpush1.bf16.msra.mxu1 %v8314_v48  ;;  %v8361_v48 = vld [vmem:[%s11451_s3 + $0x3c4] ss:$8 sps:$4 sm:$0xff]  }
 0x24f   : > { %2777 = vmatprep.subr.bf16.mxu1 %v8319_v5 }
 0x251   : > { %8528 = vmatmul.mubr.msk.bf16.gmra.mrb[28].mxu1 %vm9855_vm15, %v8591_v27 }
 0x252   : > { %8530 = vmatprep.mubr.msk.bf16.mxu1 %vm9866_vm7, %v8591_v27  ;;  %2778 = vmatpush1.bf16.msra.mxu1 %v8317_v41  ;;  %v8371_v41 = vld [vmem:[%s11453_s5 + $0xc0] sm:$0xff]  }
 0x253   : > { %2779 = vmatprep.subr.bf16.mxu1 %v8322_v24  ;;  %v8372_v24 = vld [vmem:[%s11453_s5 + $0x80] sm:$0xff]   ;;  %7244 = vmatprep.subr.bf16.mxu0 %v8371_v41  ;;  %v8394_v41 = vld [vmem:[%s11453_s5 + $0xb0] sm:$0xff]  }
 0x254   : > { %7245 = vmatpush3.bf16.msra.mxu0 %v8372_v24 }
 0x256   : > { %2780 = vmatpush1.bf16.msra.mxu1 %v8320_v40  ;;  %v8373_v40 = vld [vmem:[%s11453_s5 + $0xc8] sm:$0xff]  }
 0x257   : > { %3197 = vmatprep.subr.bf16.mxu1 %v8325_v33  ;;  %v6665_v33 = vcombine.low %v9890_v50, %v9890_v50  ;;  %7246 = vmatprep.subr.bf16.mxu0 %v8373_v40  ;;  %v8397_v40 = vld [vmem:[%s11453_s5 + $0xf8] sm:$0xff]  }
 0x259   : > { %8532 = vmatmul.mubr.msk.bf16.gmra.mrb[32].mxu1 %vm9883_vm11, %v8591_v27 }
 0x25a   : > { %2781 = vmatprep.mubr.bf16.mxu1 %v9890_v50 }
 0x261   : > { %2782 = vmatmul.mubr.bf16.vlgmr.msra.gmra.mrb[0].mxu1 %v9890_v50 }
 0x262   : > { %8535 = vmatprep.mubr.msk.bf16.mxu1 %vm9332_vm4, %v9337_v46  ;;  %3198 = vmatpush1.bf16.msra.mxu1 %v8323_v3  ;;  %vm11547_vm4 = vnez %v11534_v7  ;;  %v8364_v7 = vld [vmem:[%s11451_s3 + $0x3d4] ss:$8 sps:$4 sm:$0xff]   ;;  %v8362_v3 = vld [vmem:[%s11451_s3 + $0x3d0] ss:$8 sps:$4 sm:$0xff]  }
 0x263   : > { %3199 = vmatprep.subr.bf16.mxu1 %v8328_v9 }
 0x266   : > { %3200 = vmatpush1.bf16.msra.mxu1 %v8326_v0  ;;  %v8367_v0 = vld [vmem:[%s11451_s3 + $0x3e4] ss:$8 sps:$4 sm:$0xff]  }
 0x267   : > { %3201 = vmatprep.subr.bf16.mxu1 %v8331_v42  ;;  %v7036_v42 = vcombine.high %v9890_v50, %v6665_v33  ;;  %v8453_v33 = vld [vmem:[%s11451_s3 + $0x400] ss:$8 sps:$4 sm:$0xff]  }
 0x269   : > { %8538 = vmatmul.mubr.msk.bf16.gmra.mrb[4].mxu1 %vm9346_vm6, %v9337_v46  ;;  %v8340_v46 = vld [vmem:[%s11451_s3 + $0x354] ss:$8 sps:$4 sm:$0xff]   ;;  %4426 = vmatprep.mubr.bf16.mxu0 %v7036_v42  ;;  %vm11548_vm6 = vcmp.gt.f32.partialorder %v9620_v37, 1.0  ;;  %v10145_v42 = vcombine.high %v9890_v50, %v9890_v50 }
 0x26a   : > { %8540 = vmatprep.mubr.msk.bf16.mxu1 %vm9372_vm10, %v8591_v27  ;;  %3202 = vmatpush1.bf16.msra.mxu1 %v8329_v21  ;;  %vm11549_vm10 = vcmp.gt.f32.partialorder %v9644_v28, 1.0  ;;  %v8382_v37 = vld [vmem:[%s11453_s5 + $0x98] sm:$0xff]  }
 0x26b   : > { %3203 = vmatprep.subr.bf16.mxu1 %v8334_v44  ;;  %v8374_v44 = vld [vmem:[%s11453_s5 + $0x88] sm:$0xff]  }
 0x26c   : > { %7247 = vmatpush3.bf16.msra.mxu0 %v8374_v44 }
 0x26e   : > { %3204 = vmatpush1.bf16.msra.mxu1 %v8332_v17  ;;  %v8377_v17 = vld [vmem:[%s11453_s5 + $0xd0] sm:$0xff]  }
 0x26f   : > { %3205 = vmatprep.subr.bf16.mxu1 %v8337_v11  ;;  %v8365_v11 = vld [vmem:[%s11451_s3 + $0x3e0] ss:$8 sps:$4 sm:$0xff]   ;;  %7248 = vmatprep.subr.bf16.mxu0 %v8377_v17  ;;  %v8455_v17 = vld [vmem:[%s11451_s3 + $0x410] ss:$8 sps:$4 sm:$0xff]  }
 0x271   : > { %8542 = vmatmul.mubr.msk.bf16.gmra.mrb[8].mxu1 %vm9382_vm12, %v8591_v27  ;;  %vm10070_vm12 = vmpackc.low %vm11549_vm10, %vm11548_vm6 }
 0x272   : > { %8544 = vmatprep.mubr.msk.bf16.mxu1 %vm9410_vm1, %v8591_v27  ;;  %3206 = vmatpush1.bf16.msra.mxu1 %v8335_v51  ;;  %v8370_v51 = vld [vmem:[%s11451_s3 + $0x3f4] ss:$8 sps:$4 sm:$0xff]   ;;  %vm11552_vm1 = vcmp.gt.f32.partialorder %v9616_v19, 1.0 }
 0x273   : > { %3207 = vmatprep.subr.bf16.mxu1 %v8340_v46  ;;  %v8378_v46 = vld [vmem:[%s11453_s5 + $0x90] sm:$0xff]  }
 0x274   : > { %7249 = vmatpush3.bf16.msra.mxu0 %v8378_v46  ;;  %v8457_v46 = vld [vmem:[%s11451_s3 + $0x420] ss:$8 sps:$4 sm:$0xff]  }
 0x276   : > { %3208 = vmatpush1.bf16.msra.mxu1 %v8338_v25  ;;  %v8381_v25 = vld [vmem:[%s11453_s5 + $0xd8] sm:$0xff]  }
 0x277   : > { %3209 = vmatprep.subr.bf16.mxu1 %v8343_v4  ;;  %7250 = vmatprep.subr.bf16.mxu0 %v8381_v25  ;;  %v8458_v25 = vld [vmem:[%s11451_s3 + $0x434] ss:$8 sps:$4 sm:$0xff]  }
 0x278   : > { %7251 = vmatpush3.bf16.msra.mxu0 %v8382_v37  ;;  %v8462_v37 = vld [vmem:[%s11451_s3 + $0x454] ss:$8 sps:$4 sm:$0xff]  }
 0x279   : > { %8546 = vmatmul.mubr.msk.bf16.gmra.mrb[12].mxu1 %vm9420_vm3, %v8591_v27  ;;  %vm11553_vm3 = vcmp.gt.f32.partialorder %v9639_v38, 1.0  ;;  %v8390_v38 = vld [vmem:[%s11453_s5 + $0xa8] sm:$0xff]   ;;  %v8401_v4 = vld [vmem:[%s11453_s5 + $0x178] sm:$0xff]  }
 0x27a   : > { %8548 = vmatprep.mubr.msk.bf16.mxu1 %vm9460_vm9, %v8591_v27  ;;  %3210 = vmatpush1.bf16.msra.mxu1 %v8341_v30  ;;  %v2909_v30 = vld [vmem:[#allocation2 + $0x18] sm:$0xf0]  ;;  %vm10104_vm9 = vmpackc.low %vm11553_vm3, %vm11552_vm1 }
 0x27b   : > { %3211 = vmatprep.subr.bf16.mxu1 %v8346_v2  ;;  %v8368_v2 = vld [vmem:[%s11451_s3 + $0x3f0] ss:$8 sps:$4 sm:$0xff]   ;;  %v2984_v28 = vrot.slane %v2909_v30, 4  ;;  %v8461_v30 = vld [vmem:[%s11451_s3 + $0x440] ss:$8 sps:$4 sm:$0xff]  }
 0x27e   : > { %3212 = vmatpush1.bf16.msra.mxu1 %v8344_v12 }
 0x27f   : > { %3213 = vmatprep.subr.bf16.mxu1 %v8349_v10  ;;  %v8385_v10 = vld [vmem:[%s11453_s5 + $0xe0] sm:$0xff]  }
 0x280   : > { %7252 = vmatprep.subr.bf16.mxu0 %v8385_v10 }
 0x281   : > { %8550 = vmatmul.mubr.msk.bf16.gmra.mrb[16].mxu1 %vm9472_vm13, %v8591_v27  ;;  %vm11556_vm13 = vcmask 1043456  }
 0x282   : > { %8552 = vmatprep.mubr.msk.bf16.mxu1 %vm9798_vm8, %v8591_v27  ;;  %3214 = vmatpush1.bf16.msra.mxu1 %v8347_v8  ;;  %vm11557_vm8 = vmmov %vm11556_vm13 }
 0x283   : > { %3215 = vmatprep.subr.bf16.mxu1 %v8352_v56  ;;  %v9981_v45 = vpop.f32.mrb[44].mxu0  ;;  %vm11560_vm2 = vmmov %vm11557_vm8 }
 0x284   : > { %v9986_v16 = vpop.f32.mrb[45].mxu0  ;;  %vm11561_vm5 = vmmov %vm11560_vm2 }
 0x285   : > { %v9988_v49 = vpop.f32.mrb[46].mxu0  ;;  %vm11562_vm0 = vmmov %vm11560_vm2 }
 0x286   : > { %3216 = vmatpush1.bf16.msra.mxu1 %v8350_v58  ;;  %v9993_v14 = vpop.f32.mrb[47].mxu0  ;;  %v8452_v58 = vld [vmem:[%s11451_s3 + $0x404] ss:$8 sps:$4 sm:$0xff]   ;;  %vm11564_vm6 = vmmov %vm11562_vm0 }
 0x287   : > { %3217 = vmatprep.subr.bf16.mxu1 %v8355_v1  ;;  %vm11565_vm10 = vmmov %vm11562_vm0 }
 0x288   : > { %vm11566_vm1 = vmmov %vm11562_vm0 }
 0x289   : > { %8554 = vmatmul.mubr.msk.bf16.gmra.mrb[20].mxu1 %vm9821_vm14, %v8591_v27  ;;  %vm11558_vm14 = vmmov %vm11557_vm8 }
 0x28a   : > { %8556 = vmatprep.mubr.msk.bf16.mxu1 %vm11547_vm4, %v8591_v27  ;;  %3218 = vmatpush1.bf16.msra.mxu1 %v8353_v59  ;;  %v8386_v59 = vld [vmem:[%s11453_s5 + $0xa0] sm:$0xff]   ;;  %vm11563_vm4 = vmmov %vm11562_vm0 }
 0x28b   : > { %3219 = vmatprep.subr.bf16.mxu1 %v8358_v52  ;;  %7253 = vmatpush3.bf16.msra.mxu0 %v8386_v59  ;;  %v8465_v59 = vld [vmem:[%s11451_s3 + $0x460] ss:$8 sps:$4 sm:$0xff]   ;;  %vm11567_vm3 = vmmov %vm11562_vm0  ;;  %v8407_v52 = vld [vmem:[%s11453_s5 + $0x50] sm:$0xff]  }
 0x28e   : > { %3220 = vmatpush1.bf16.msra.mxu1 %v8356_v26  ;;  %v2986_v26 = vsel %vm11556_vm13, %v2984_v28, %v9330_v43  ;;  %vm11570_vm13 = vcmp.gt.f32.partialorder %v9664_v57, 1.0  ;;  %v8405_v57 = vld [vmem:[%s11453_s5 + $0x48] sm:$0xff]  }
 0x28f   : > { %3221 = vmatprep.subr.bf16.mxu1 %v8361_v48  ;;  %v10016_v5 = vpop.f32.mrb[48].mxu0  ;;  %v2908_v48 = vld [vmem:[#allocation2 + $0x10] sm:$0xf0] }
 0x290   : > { %v10032_v15 = vpop.f32.mrb[49].mxu0  ;;  %v2981_v19 = vrot.slane %v2908_v48, 4  ;;  %v8466_v48 = vld [vmem:[%s11451_s3 + $0x474] ss:$8 sps:$4 sm:$0xff]  }
 0x291   : > { %8558 = vmatmul.mubr.msk.bf16.gmra.mrb[24].mxu1 %vm9855_vm15, %v8591_v27  ;;  %v10037_v9 = vpop.f32.mrb[50].mxu0  ;;  %vm11559_vm15 = vmmov %vm11557_vm8 }
 0x292   : > { %8560 = vmatprep.mubr.msk.bf16.mxu1 %vm9866_vm7, %v8591_v27  ;;  %3222 = vmatpush1.bf16.msra.mxu1 %v8359_v63  ;;  %v10043_v21 = vpop.f32.mrb[51].mxu0  ;;  %v8389_v63 = vld [vmem:[%s11453_s5 + $0xe8] sm:$0xff]   ;;  %v2983_v43 = vsel %vm11557_vm8, %v2981_v19, %v9342_v47  ;;  %vm11571_vm8 = vnez %v11524_v36 }
 0x293   : > { %3223 = vmatprep.subr.bf16.mxu1 %v8364_v7  ;;  %7254 = vmatprep.subr.bf16.mxu0 %v8389_v63  ;;  %v8393_v7 = vld [vmem:[%s11453_s5 + $0xf0] sm:$0xff]   ;;  %v8468_v19 = vld [vmem:[%s11451_s3 + $0x484] ss:$8 sps:$4 sm:$0xff]  }
 0x294   : > { %7255 = vmatpush3.bf16.msra.mxu0 %v8390_v38  ;;  %v8406_v36 = vld [vmem:[%s11453_s5 + $0x8] sm:$0xff]  }
 0x295   : > { %7256 = vmatprep.subr.bf16.mxu0 %v8393_v7 }
 0x296   : > { %3224 = vmatpush1.bf16.msra.mxu1 %v8362_v3  ;;  %v8454_v3 = vld [vmem:[%s11451_s3 + $0x414] ss:$8 sps:$4 sm:$0xff]  }
 0x297   : > { %3225 = vmatprep.subr.bf16.mxu1 %v8367_v0 }
 0x298   : > { %7257 = vmatpush3.bf16.msra.mxu0 %v8394_v41  ;;  %v8469_v41 = vld [vmem:[%s11451_s3 + $0x480] ss:$8 sps:$4 sm:$0xff]  }
 0x299   : > { %8562 = vmatmul.mubr.msk.bf16.gmra.mrb[28].mxu1 %vm9883_vm11, %v8591_v27  ;;  %7258 = vmatprep.subr.bf16.mxu0 %v8397_v40  ;;  %v8470_v40 = vld [vmem:[%s11451_s3 + $0x494] ss:$8 sps:$4 sm:$0xff]  }
 0x29a   : > { %8564 = vmatprep.mubr.msk.bf16.mxu1 %vm10070_vm12, %v8591_v27  ;;  %3226 = vmatpush1.bf16.msra.mxu1 %v8365_v11  ;;  %v8456_v11 = vld [vmem:[%s11451_s3 + $0x424] ss:$8 sps:$4 sm:$0xff]  }
 0x29b   : > { %3227 = vmatprep.subr.bf16.mxu1 %v8370_v51  ;;  %v10083_v12 = vpop.f32.mrb[52].mxu0  ;;  %v10160_v51 = vcombine.low %v10145_v42, %v9890_v50 }
 0x29c   : > { %v10088_v8 = vpop.f32.mrb[53].mxu0 }
 0x29d   : > { %v10090_v56 = vpop.f32.mrb[54].mxu0 }
 0x29e   : > { %3228 = vmatpush1.bf16.msra.mxu1 %v8368_v2  ;;  %v10095_v1 = vpop.f32.mrb[55].mxu0  ;;  %v10183_v2 = vld [vmem:[#allocation2 + $0x68] sm:$0xff] }
 0x29f   : > { %7624 = vmatprep.subr.bf16.mxu1 %v8452_v58  ;;  %v3001_v28 = vrot.slane %v10183_v2, 4  ;;  %v10199_v58 = vld [vmem:[#allocation2 + $0x60] sm:$0xff] }
 0x2a1   : > { %8566 = vmatmul.mubr.msk.bf16.gmra.mrb[32].mxu1 %vm10104_vm9, %v8591_v27  ;;  %v3002_v10 = vsel %vm11558_vm14, %v9456_v55, %v3001_v28  ;;  %v8467_v55 = vld [vmem:[%s11451_s3 + $0x470] ss:$8 sps:$4 sm:$0xff]   ;;  %vm8577_vm14 = vmpackc.low %vm11571_vm8, %vm11570_vm13 }
 0x2a2   : > { %3229 = vmatprep.mubr.bf16.mxu1 %v2986_v26  ;;  %v10204_v26 = vld [vmem:[#allocation2 + $0x78] sm:$0xff] }
 0x2a3   : > { %v3005_v63 = vrot.slane %v10204_v26, 4 }
 0x2a5   : > { %v3006_v7 = vsel %vm11560_vm2, %v3001_v28, %v3005_v63  ;;  %v2927_v28 = vld [vmem:[#allocation2 + $0xa8] sm:$0xf] }
 0x2a7   : > { %v10127_v24 = vpop.f32.mrb[56].mxu0 }
 0x2a8   : > { %v10136_v47 = vpop.f32.mrb[57].mxu0 }
 0x2a9   : > { %3230 = vmatmul.mubr.bf16.vlgmr.msra.gmra.mrb[0].mxu1 %v2983_v43  ;;  %v10141_v0 = vpop.f32.mrb[58].mxu0  ;;  %v10220_v43 = vld [vmem:[#allocation2 + $0x70] sm:$0xff] }
 0x2aa   : > { %3239 = vmatprep.mubr.bf16.mxu1 %v9396_v35  ;;  %7640 = vmatpush1.bf16.msra.mxu1 %v8453_v33  ;;  %v10147_v44 = vpop.f32.mrb[59].mxu0  ;;  %v8398_v35 = vld [vmem:[%s11453_s5 + $0xb8] sm:$0xff]   ;;  %v3003_v33 = vrot.slane %v10220_v43, 4 }
 0x2ab   : > { %7625 = vmatprep.subr.bf16.mxu1 %v8454_v3  ;;  %7259 = vmatpush3.bf16.msra.mxu0 %v8398_v35  ;;  %v8472_v3 = vld [vmem:[%s11451_s3 + $0x4a4] ss:$8 sps:$4 sm:$0xff]  }
 0x2ae   : > { %7641 = vmatpush1.bf16.msra.mxu1 %v8455_v17  ;;  %4427 = vmatmul.mubr.bf16.vlgmr.msra.gmra.mrb[60].mxu0 %v10160_v51  ;;  %v3010_v17 = vsel %vm11562_vm0, %v3005_v63, %v9622_v39  ;;  %v2926_v63 = vld [vmem:[#allocation2 + $0xa0] sm:$0xf] }
 0x2af   : > { %7626 = vmatprep.subr.bf16.mxu1 %v8456_v11  ;;  %4434 = vmatprep.mubr.bf16.mxu0 %v10145_v42  ;;  %v8473_v11 = vld [vmem:[%s11451_s3 + $0x4a0] ss:$8 sps:$4 sm:$0xff]  }
 0x2b1   : > { %3240 = vmatmul.mubr.bf16.gmra.mrb[4].mxu1 %v9391_v32  ;;  %v8459_v32 = vld [vmem:[%s11451_s3 + $0x430] ss:$8 sps:$4 sm:$0xff]  }
 0x2b2   : > { %3249 = vmatprep.mubr.bf16.mxu1 %v9429_v18  ;;  %7642 = vmatpush1.bf16.msra.mxu1 %v8457_v46  ;;  %v8460_v18 = vld [vmem:[%s11451_s3 + $0x444] ss:$8 sps:$4 sm:$0xff]   ;;  %v8474_v46 = vld [vmem:[%s11451_s3 + $0x4b4] ss:$8 sps:$4 sm:$0xff]  }
 0x2b3   : > { %7627 = vmatprep.subr.bf16.mxu1 %v8458_v25  ;;  %v3013_v25 = vrot.slane %v9662_v29, 4  ;;  %v8477_v29 = vld [vmem:[%s11451_s3 + $0x4c0] ss:$8 sps:$4 sm:$0xff]  }
 0x2b6   : > { %7643 = vmatpush1.bf16.msra.mxu1 %v8459_v32  ;;  %4435 = vmatmul.mubr.bf16.gmra.mrb[64].mxu0 %v10160_v51  ;;  %v8475_v32 = vld [vmem:[%s11451_s3 + $0x4b0] ss:$8 sps:$4 sm:$0xff]  }
 0x2b7   : > { %7628 = vmatprep.subr.bf16.mxu1 %v8460_v18  ;;  %v8476_v18 = vld [vmem:[%s11451_s3 + $0x4c4] ss:$8 sps:$4 sm:$0xff]  }
 0x2b9   : > { %3250 = vmatmul.mubr.bf16.gmra.mrb[8].mxu1 %v9432_v20  ;;  %v8463_v20 = vld [vmem:[%s11451_s3 + $0x450] ss:$8 sps:$4 sm:$0xff]  }
 0x2ba   : > { %3259 = vmatprep.mubr.bf16.mxu1 %v9488_v61  ;;  %7644 = vmatpush1.bf16.msra.mxu1 %v8461_v30  ;;  %v8464_v61 = vld [vmem:[%s11451_s3 + $0x464] ss:$8 sps:$4 sm:$0xff]   ;;  %v3008_v30 = vsel %vm11563_vm4, %v3003_v33, %v9618_v13 }
 0x2bb   : > { %7629 = vmatprep.subr.bf16.mxu1 %v8462_v37  ;;  %v3014_v37 = vsel %vm11564_vm6, %v9622_v39, %v3013_v25  ;;  %v8480_v39 = vld [vmem:[%s11451_s3 + $0x4e4] ss:$8 sps:$4 sm:$0xff]  }
 0x2be   : > { %7645 = vmatpush1.bf16.msra.mxu1 %v8463_v20  ;;  %v8478_v20 = vld [vmem:[%s11451_s3 + $0x4d4] ss:$8 sps:$4 sm:$0xff]  }
 0x2bf   : > { %7630 = vmatprep.subr.bf16.mxu1 %v8464_v61  ;;  %v3011_v61 = vrot.slane %v9657_v34, 4  ;;  %v8481_v34 = vld [vmem:[%s11451_s3 + $0x4e0] ss:$8 sps:$4 sm:$0xff]  }
 0x2c1   : > { %3260 = vmatmul.mubr.bf16.gmra.mrb[12].mxu1 %v9481_v60  ;;  %v2999_v60 = vrot.slane %v10199_v58, 4 }
 0x2c2   : > { %3269 = vmatprep.mubr.bf16.mxu1 %v3002_v10  ;;  %7646 = vmatpush1.bf16.msra.mxu1 %v8465_v59  ;;  %v3017_v10 = vrot.slane %v2927_v28, 4  ;;  %v8479_v59 = vld [vmem:[%s11451_s3 + $0x4d0] ss:$8 sps:$4 sm:$0xff]   ;;  %v8412_v28 = vld [vmem:[%s11453_s5 + $0x20] sm:$0xff]  }
 0x2c3   : > { %7631 = vmatprep.subr.bf16.mxu1 %v8466_v48  ;;  %v3000_v38 = vsel %vm11559_vm15, %v9452_v54, %v2999_v60  ;;  %v8471_v54 = vld [vmem:[%s11451_s3 + $0x490] ss:$8 sps:$4 sm:$0xff]   ;;  %v3004_v35 = vsel %vm11561_vm5, %v2999_v60, %v3003_v33  ;;  %v3012_v48 = vsel %vm11565_vm10, %v9618_v13, %v3011_v61  ;;  %v3015_v13 = vrot.slane %v2926_v63, 4  ;;  %v8380_v33 = vld [vmem:[%s11453_s5 + $0x108] sm:$0xff]   ;;  %v8426_v63 = vld [vmem:[%s11453_s5 + $0x260] sm:$0xff]  }
 0x2c4   : > { %v3018_v60 = vsel %vm11566_vm1, %v3013_v25, %v3017_v10  ;;  %v8409_v25 = vld [vmem:[%s11453_s5 + $0x58] sm:$0xff]   ;;  %v8422_v10 = vld [vmem:[%s11453_s5 + $0x210] sm:$0xff]  }
 0x2c6   : > { %7647 = vmatpush1.bf16.msra.mxu1 %v8467_v55  ;;  %v8482_v55 = vld [vmem:[%s11451_s3 + $0x4f4] ss:$8 sps:$4 sm:$0xff]  }
 0x2c7   : > { %7632 = vmatprep.subr.bf16.mxu1 %v8468_v19  ;;  %v8375_v19 = vld [vmem:[%s11453_s5 + $0x140] sm:$0xff]  }
 0x2c9   : > { %3270 = vmatmul.mubr.bf16.gmra.mrb[16].mxu1 %v3000_v38  ;;  %v8483_v38 = vld [vmem:[%s11451_s3 + $0x4f0] ss:$8 sps:$4 sm:$0xff]  }
 0x2ca   : > { %3279 = vmatprep.mubr.bf16.mxu1 %v3006_v7  ;;  %7648 = vmatpush1.bf16.msra.mxu1 %v8469_v41  ;;  %v3016_v7 = vsel %vm11567_vm3, %v3011_v61, %v3015_v13  ;;  %v8376_v41 = vld [vmem:[%s11453_s5 + $0x100] sm:$0xff]   ;;  %v8421_v61 = vld [vmem:[%s11453_s5 + $0x250] sm:$0xff]  }
 0x2cb   : > { %7633 = vmatprep.subr.bf16.mxu1 %v8470_v40  ;;  %v8379_v40 = vld [vmem:[%s11453_s5 + $0x148] sm:$0xff]   ;;  %v3710_v13 = vld [vmem:[%s11452_s4] sm:$0x3] }
 0x2ce   : > { %7649 = vmatpush1.bf16.msra.mxu1 %v8471_v54  ;;  %v8384_v54 = vld [vmem:[%s11453_s5 + $0x110] sm:$0xff]  }
 0x2cf   : > { %7634 = vmatprep.subr.bf16.mxu1 %v8472_v3  ;;  %v8391_v3 = vld [vmem:[%s11453_s5 + $0x160] sm:$0xff]  }
 0x2d1   : > { %3280 = vmatmul.mubr.bf16.gmra.mrb[20].mxu1 %v3004_v35  ;;  %v8392_v35 = vld [vmem:[%s11453_s5 + $0x120] sm:$0xff]  }
 0x2d2   : > { %3289 = vmatprep.mubr.bf16.mxu1 %v3010_v17  ;;  %7650 = vmatpush1.bf16.msra.mxu1 %v8473_v11  ;;  %v8399_v17 = vld [vmem:[%s11453_s5 + $0x170] sm:$0xff]   ;;  %v8402_v11 = vld [vmem:[%s11453_s5 + $0x138] sm:$0xff]  }
 0x2d3   : > { %7635 = vmatprep.subr.bf16.mxu1 %v8474_v46  ;;  %v8408_v46 = vld [vmem:[%s11453_s5 + $0x10] sm:$0xff]  }
 0x2d6   : > { %7651 = vmatpush1.bf16.msra.mxu1 %v8475_v32  ;;  %v8410_v32 = vld [vmem:[%s11453_s5 + $0x18] sm:$0xff]  }
 0x2d7   : > { %7636 = vmatprep.subr.bf16.mxu1 %v8476_v18  ;;  %v8411_v18 = vld [vmem:[%s11453_s5 + $0x60] sm:$0xff]  }
 0x2d9   : > { %3290 = vmatmul.mubr.bf16.gmra.mrb[24].mxu1 %v3008_v30  ;;  %v8415_v30 = vld [vmem:[%s11453_s5 + $0x240] sm:$0xff]  }
 0x2da   : > { %3299 = vmatprep.mubr.bf16.mxu1 %v3014_v37  ;;  %7652 = vmatpush1.bf16.msra.mxu1 %v8477_v29  ;;  %v8416_v37 = vld [vmem:[%s11453_s5 + $0x200] sm:$0xff]   ;;  %v8417_v29 = vld [vmem:[%s11453_s5 + $0x248] sm:$0xff]  }
 0x2db   : > { %7637 = vmatprep.subr.bf16.mxu1 %v8478_v20  ;;  %v8418_v20 = vld [vmem:[%s11453_s5 + $0x208] sm:$0xff]  }
 0x2de   : > { %7653 = vmatpush1.bf16.msra.mxu1 %v8479_v59  ;;  %v8423_v59 = vld [vmem:[%s11453_s5 + $0x258] sm:$0xff]  }
 0x2df   : > { %7638 = vmatprep.subr.bf16.mxu1 %v8480_v39  ;;  %v8424_v39 = vld [vmem:[%s11453_s5 + $0x218] sm:$0xff]  }
 0x2e1   : > { %3300 = vmatmul.mubr.bf16.gmra.mrb[28].mxu1 %v3012_v48  ;;  %v8413_v48 = vld [vmem:[%s11453_s5 + $0x68] sm:$0xff]  }
 0x2e2   : > { %3309 = vmatprep.mubr.bf16.mxu1 %v3018_v60  ;;  %7654 = vmatpush1.bf16.msra.mxu1 %v8481_v34  ;;  %v8414_v60 = vld [vmem:[%s11453_s5 + $0x28] sm:$0xff]   ;;  %v8428_v34 = vld [vmem:[%s11453_s5 + $0x220] sm:$0xff]  }
 0x2e3   : > { %7639 = vmatprep.subr.bf16.mxu1 %v8482_v55  ;;  %v8419_v55 = vld [vmem:[%s11453_s5 + $0x70] sm:$0xff]  }
 0x2e6   : > { %7655 = vmatpush1.bf16.msra.mxu1 %v8483_v38  ;;  %v8429_v38 = vld [vmem:[%s11453_s5 + $0x268] sm:$0xff]  }
 0x2e7   : > { %7396 = vmatprep.subr.bf16.mxu1 %v8375_v19  ;;  %v8420_v19 = vld [vmem:[%s11453_s5 + $0x30] sm:$0xff]  }
 0x2e9   : > { %3310 = vmatmul.mubr.bf16.gmra.mrb[32].mxu1 %v3016_v7  ;;  %v8430_v7 = vld [vmem:[%s11453_s5 + $0x228] sm:$0xff]  }
 0x2ea   : > { %3623 = vmatprep.mubr.bf16.mxu1 %v10183_v2  ;;  %v8383_v2 = vld [vmem:[%s11453_s5 + $0x150] sm:$0xff]  }
 0x2f1   : > { %3624 = vmatmul.mubr.bf16.vlgmr.msra.gmra.mrb[16].mxu1 %v10199_v58  ;;  %v8387_v58 = vld [vmem:[%s11453_s5 + $0x158] sm:$0xff]  }
 0x2f2   : > { %3633 = vmatprep.mubr.bf16.mxu1 %v10204_v26  ;;  %7397 = vmatpush3.bf16.msra.mxu1 %v8376_v41  ;;  %v8388_v26 = vld [vmem:[%s11453_s5 + $0x118] sm:$0xff]  }
 0x2f3   : > { %7398 = vmatprep.subr.bf16.mxu1 %v8379_v40  ;;  %v8425_v41 = vld [vmem:[%s11453_s5 + $0x78] sm:$0xff]   ;;  %v11572_v40 = vsub.s32 0, %v9295_v6 }
 0x2f6   : > { %7399 = vmatpush3.bf16.msra.mxu1 %v8380_v33  ;;  %v10443_v33 = vrot.slane %v3710_v13, %v11572_v40 }
 0x2f7   : > { %7400 = vmatprep.subr.bf16.mxu1 %v8383_v2  ;;  %v8427_v2 = vld [vmem:[%s11453_s5 + $0x38] sm:$0xff]  }
 0x2f9   : > { %3634 = vmatmul.mubr.bf16.gmra.mrb[20].mxu1 %v10220_v43  ;;  %v8396_v43 = vld [vmem:[%s11453_s5 + $0x128] sm:$0xff]  }
 0x2fa   : > { %8568 = vmatprep.mubr.msk.bf16.mxu1 %vm9866_vm7, %v8591_v27  ;;  %7401 = vmatpush3.bf16.msra.mxu1 %v8384_v54  ;;  %vm11568_vm7 = vcmp.gt.f32.partialorder %v9667_v62, 1.0  ;;  %v8403_v62 = vld [vmem:[%s11453_s5 + $0x40] sm:$0xff]   ;;  %v11573_v54 = vsub.s32 1, %v9295_v6 }
 0x2fb   : > { %7402 = vmatprep.subr.bf16.mxu1 %v8387_v58  ;;  %7320 = vmatprep.subr.bf16.mxu0 %v8403_v62  ;;  %v8433_v6 = vld [vmem:[%s11453_s5 + $0x1c0] sm:$0xff]  }
 0x2fc   : > { %v10450_v58 = vrot.slane %v3710_v13, %v11573_v54 }
 0x2fe   : > { %7403 = vmatpush3.bf16.msra.mxu1 %v8388_v26 }
 0x2ff   : > { %7404 = vmatprep.subr.bf16.mxu1 %v8391_v3  ;;  %v8431_v3 = vld [vmem:[%s11453_s5 + $0x270] sm:$0xff]  }
 0x301   : > { %8570 = vmatmul.mubr.msk.bf16.gmra.mrb[24].mxu1 %vm9883_vm11, %v8591_v27  ;;  %vm11569_vm11 = vnez %v11526_v22  ;;  %v8404_v22 = vld [vmem:[%s11453_s5] sm:$0xff]  }
 0x302   : > { %8572 = vmatprep.mubr.msk.bf16.mxu1 %vm10070_vm12, %v8591_v27  ;;  %7405 = vmatpush3.bf16.msra.mxu1 %v8392_v35  ;;  %vm8575_vm12 = vmpackc.low %vm11569_vm11, %vm11568_vm7 }
 0x303   : > { %7406 = vmatprep.subr.bf16.mxu1 %v8395_v53  ;;  %7321 = vmatpush3.bf16.msra.mxu0 %v8404_v22 }
 0x304   : > { %7322 = vmatprep.subr.bf16.mxu0 %v8405_v57 }
 0x306   : > { %7407 = vmatpush3.bf16.msra.mxu1 %v8396_v43  ;;  %v8432_v43 = vld [vmem:[%s11453_s5 + $0x230] sm:$0xff]  }
 0x307   : > { %7408 = vmatprep.subr.bf16.mxu1 %v8399_v17  ;;  %7323 = vmatpush3.bf16.msra.mxu0 %v8406_v36 }
 0x308   : > { %7324 = vmatprep.subr.bf16.mxu0 %v8407_v52 }
 0x309   : > { %8574 = vmatmul.mubr.msk.bf16.gmra.mrb[28].mxu1 %vm10104_vm9, %v8591_v27 }
 0x30a   : > { %8576 = vmatprep.mubr.msk.bf16.mxu1 %vm8575_vm12, %v8591_v27  ;;  %7409 = vmatpush3.bf16.msra.mxu1 %v8400_v23 }
 0x30b   : > { %7410 = vmatprep.subr.bf16.mxu1 %v8401_v4  ;;  %7325 = vmatpush3.bf16.msra.mxu0 %v8408_v46  ;;  %v8435_v4 = vld [vmem:[%s11453_s5 + $0x278] sm:$0xff]  }
 0x30c   : > { %7326 = vmatprep.subr.bf16.mxu0 %v8409_v25 }
 0x30e   : > { %7411 = vmatpush3.bf16.msra.mxu1 %v8402_v11 }
 0x30f   : > { %7327 = vmatpush3.bf16.msra.mxu0 %v8410_v32  ;;  %7548 = vmatprep.subr.bf16.mxu1 %v8415_v30 }
 0x310   : > { %7328 = vmatprep.subr.bf16.mxu0 %v8411_v18 }
 0x311   : > { %8578 = vmatmul.mubr.msk.bf16.gmra.mrb[32].mxu1 %vm8577_vm14, %v8591_v27 }
 0x312   : > { %5034 = vmatprep.mubr.bf16.mxu1 %v9890_v50 }
 0x313   : > { %7329 = vmatpush3.bf16.msra.mxu0 %v8412_v28 }
 0x314   : > { %7330 = vmatprep.subr.bf16.mxu0 %v8413_v48 }
 0x317   : > { %7331 = vmatpush3.bf16.msra.mxu0 %v8414_v60 }
 0x318   : > { %7332 = vmatprep.subr.bf16.mxu0 %v8419_v55 }
 0x319   : > { %5035 = vmatmul.mubr.bf16.vlgmr.msra.gmra.mrb[36].mxu1 %v9890_v50 }
 0x31a   : > { %7549 = vmatpush3.bf16.msra.mxu1 %v8416_v37 }
 0x31b   : > { %7550 = vmatprep.subr.bf16.mxu1 %v8417_v29  ;;  %7333 = vmatpush3.bf16.msra.mxu0 %v8420_v19 }
 0x31c   : > { %7334 = vmatprep.subr.bf16.mxu0 %v8425_v41 }
 0x31e   : > { %7551 = vmatpush3.bf16.msra.mxu1 %v8418_v20 }
 0x31f   : > { %7552 = vmatprep.subr.bf16.mxu1 %v8421_v61  ;;  %7335 = vmatpush3.bf16.msra.mxu0 %v8427_v2 }
 0x320   : > { %7472 = vmatprep.subr.bf16.mxu0 %v8433_v6 }
 0x322   : > { %7553 = vmatpush3.bf16.msra.mxu1 %v8422_v10 }
 0x323   : > { %7554 = vmatprep.subr.bf16.mxu1 %v8423_v59 }
 0x326   : > { %7555 = vmatpush3.bf16.msra.mxu1 %v8424_v39 }
 0x327   : > { %7556 = vmatprep.subr.bf16.mxu1 %v8426_v63 }
 0x32a   : > { %7557 = vmatpush3.bf16.msra.mxu1 %v8428_v34 }
 0x32b   : > { %7558 = vmatprep.subr.bf16.mxu1 %v8429_v38 }
 0x32e   : > { %7559 = vmatpush3.bf16.msra.mxu1 %v8430_v7 }
 0x32f   : > { %7560 = vmatprep.subr.bf16.mxu1 %v8431_v3 }
 0x332   : > { %7561 = vmatpush3.bf16.msra.mxu1 %v8432_v43 }
 0x333   : > { %7562 = vmatprep.subr.bf16.mxu1 %v8435_v4 }
 0x37c   : > { %v3231_v26 = vpop.f32.mrb[0].mxu1 }
 0x37d   : > { %v7688_v35 = vadd.f32 %v9981_v45, %v3231_v26  ;;  %v3233_v53 = vpop.f32.mrb[1].mxu1 }
 0x37e   : > { %v7689_v17 = vadd.f32 %v9986_v16, %v3233_v53  ;;  %v3235_v23 = vpop.f32.mrb[2].mxu1  ;;  %v8436_v16 = vld [vmem:[%s11453_s5 + $0x238] sm:$0xff]  }
 0x37f   : > { %v3722_v45 = vadd.f32 %v7688_v35, %v10443_v33  ;;  %v7690_v11 = vadd.f32 %v9988_v49, %v3235_v23  ;;  %v3237_v62 = vpop.f32.mrb[3].mxu1  ;;  %7563 = vmatpush3.bf16.msra.mxu1 %v8436_v16 }
 0x380   : > { %v3723_v22 = vadd.f32 %v7689_v17, %v10450_v58  ;;  %v7691_v57 = vadd.f32 %v9993_v14, %v3237_v62 }
 0x381   : > { %vm3760_vm9 = vcmp.gt.f32.partialorder %v3722_v45, 1.0  ;;  %v3766_v36 = vmul.f32 0.9, %v3722_v45  ;;  %v3724_v52 = vadd.f32 %v7690_v11, %v10443_v33 }
 0x382   : > { %v6629_v46 = vsel %vm3760_vm9, 1.0, %v8588_v31  ;;  %vm3761_vm15 = vcmp.gt.f32.partialorder %v3723_v22, 1.0  ;;  %v3767_v49 = vmul.f32 0.9, %v3723_v22  ;;  %v3725_v25 = vadd.f32 %v7691_v57, %v10450_v58 }
 0x383   : > { %v6630_v32 = vsel %vm3761_vm15, 1.0, %v8588_v31  ;;  %v3768_v18 = vadd.f32 %v3766_v36, %v3724_v52 }
 0x384   : > { %v3769_v30 = vadd.f32 %v3767_v49, %v3725_v25  ;;  %v3241_v14 = vpop.f32.mrb[4].mxu1  ;;  %v7017_v37 = vpack.c.bf16 %v6630_v32, %v6629_v46  ;;  %v11582_v25 = vmov 0 }
 0x385   : > { %v3770_v29 = vsub.f32 %v3768_v18, %v6629_v46  ;;  %v7692_v28 = vadd.f32 %v10016_v5, %v3241_v14  ;;  %v3243_v20 = vpop.f32.mrb[5].mxu1  ;;  %v11584_v14 = vmov 0 }
 0x386   : > { %v3771_v61 = vsub.f32 %v3769_v30, %v6630_v32  ;;  %v7693_v10 = vadd.f32 %v10032_v15, %v3243_v20  ;;  %v3245_v59 = vpop.f32.mrb[6].mxu1  ;;  %v10482_v39 = vcombine.high %v9890_v50, %v7017_v37  ;;  %v10485_v48 = vcombine.low %v9890_v50, %v7017_v37 }
 0x387   : > { %vm3772_vm2 = vcmp.gt.f32.partialorder %v3770_v29, 1.0  ;;  %v3726_v60 = vadd.f32 %v7692_v28, %v10443_v33  ;;  %v3778_v63 = vmul.f32 0.9, %v3770_v29  ;;  %v7694_v34 = vadd.f32 %v10037_v9, %v3245_v59  ;;  %v3247_v55 = vpop.f32.mrb[7].mxu1 }
 0x388   : > { %vm3773_vm5 = vcmp.gt.f32.partialorder %v3771_v61, 1.0  ;;  %v3727_v5 = vadd.f32 %v7693_v10, %v10450_v58  ;;  %v3779_v19 = vmul.f32 0.9, %v3771_v61  ;;  %5042 = vmatprep.mubr.bf16.mxu1 %v10482_v39  ;;  %vm10493_vm0 = vmpackc.low %vm3772_vm2, %vm3760_vm9  ;;  %v11574_v15 = vmov 0 }
 0x389   : > { %v11575_v15 = vsel %vm10493_vm0, 4294967295, %v11574_v15  ;;  %v3780_v50 = vadd.f32 %v3778_v63, %v3726_v60  ;;  %v7695_v13 = vadd.f32 %v10043_v21, %v3247_v55  ;;  %5043 = vmatmul.mubr.bf16.gmra.mrb[40].mxu1 %v10485_v48  ;;  %vm10501_vm4 = vmpackc.low %vm3773_vm5, %vm3761_vm15  ;;  %v11576_v9 = vmov 0 }
 0x38a   : > { %v11577_v9 = vsel %vm10501_vm4, 4294967295, %v11576_v9  ;;  %v6631_v38 = vsel %vm3772_vm2, 1.0, %v8588_v31  ;;  %v3781_v7 = vadd.f32 %v3779_v19, %v3727_v5  ;;  %7055 = vmatprep.mubr.msk.bf16.mxu0 %vm10501_vm4, %v8591_v27  ;;  %v6632_v21 = vsel %vm3773_vm5, 1.0, %v8588_v31 }
 0x38b   : > { %v3782_v41 = vsub.f32 %v3780_v50, %v6631_v38  ;;  %7057 = vmatmul.mubr.msk.bf16.gmra.mrb[68].mxu0 %vm10493_vm0, %v8591_v27  ;;  %v3728_v54 = vadd.f32 %v7694_v34, %v10443_v33  ;;  %v3729_v53 = vadd.f32 %v7695_v13, %v10450_v58 }
 0x38c   : > { %v3783_v40 = vsub.f32 %v3781_v7, %v6632_v21  ;;  %v3251_v2 = vpop.f32.mrb[8].mxu1 }
 0x38d   : > { %vm3784_vm6 = vcmp.gt.f32.partialorder %v3782_v41, 1.0  ;;  %v3790_v26 = vmul.f32 0.9, %v3782_v41  ;;  %v7696_v3 = vadd.f32 %v10083_v12, %v3251_v2  ;;  %v3253_v35 = vpop.f32.mrb[9].mxu1  ;;  %v8450_v12 = vld [vmem:[%s11453_s5 + $0x1b8] sm:$0xff]  }
 0x38e   : > { %vm3785_vm10 = vcmp.gt.f32.partialorder %v3783_v40, 1.0  ;;  %v3791_v43 = vmul.f32 0.9, %v3783_v40  ;;  %v7697_v17 = vadd.f32 %v10088_v8, %v3253_v35  ;;  %v3255_v23 = vpop.f32.mrb[10].mxu1  ;;  %vm10521_vm1 = vmpackc.low %vm3784_vm6, %vm3772_vm2  ;;  %v6633_v8 = vsel %vm3784_vm6, 1.0, %v8588_v31 }
 0x38f   : > { %v3792_v4 = vadd.f32 %v3790_v26, %v3728_v54  ;;  %v7698_v45 = vadd.f32 %v10090_v56, %v3255_v23  ;;  %v3257_v11 = vpop.f32.mrb[11].mxu1  ;;  %vm10528_vm3 = vmpackc.low %vm3785_vm10, %vm3773_vm5  ;;  %v6634_v56 = vsel %vm3785_vm10, 1.0, %v8588_v31  ;;  %v3730_v36 = vadd.f32 %v7696_v3, %v10443_v33 }
 0x390   : > { %v3793_v62 = vadd.f32 %v3791_v43, %v3729_v53  ;;  %v7699_v16 = vadd.f32 %v10095_v1, %v3257_v11  ;;  %7133 = vmatprep.mubr.msk.bf16.mxu1 %vm10528_vm3, %v8591_v27  ;;  %v3731_v1 = vadd.f32 %v7697_v17, %v10450_v58  ;;  %v11590_v26 = vmov 0 }
 0x391   : > { %v3794_v22 = vsub.f32 %v3792_v4, %v6633_v8  ;;  %7135 = vmatmul.mubr.msk.bf16.gmra.mrb[44].mxu1 %vm10521_vm1, %v8591_v27  ;;  %v11592_v35 = vmov 0 }
 0x392   : > { %v3795_v57 = vsub.f32 %v3793_v62, %v6634_v56  ;;  %v3733_v55 = vadd.f32 %v7699_v16, %v10450_v58 }
 0x393   : > { %vm3796_vm7 = vcmp.gt.f32.partialorder %v3794_v22, 1.0  ;;  %v3802_v52 = vmul.f32 0.9, %v3794_v22 }
 0x394   : > { %vm3797_vm11 = vcmp.gt.f32.partialorder %v3795_v57, 1.0  ;;  %v3803_v46 = vmul.f32 0.9, %v3795_v57  ;;  %v3261_v49 = vpop.f32.mrb[12].mxu1  ;;  %vm10547_vm12 = vmpackc.low %vm3796_vm7, %vm3784_vm6  ;;  %v6635_v37 = vsel %vm3796_vm7, 1.0, %v8588_v31 }
 0x395   : > { %v11583_v25 = vsel %vm10547_vm12, 4294967295, %v11582_v25  ;;  %v3804_v32 = vadd.f32 %v3802_v52, %v3730_v36  ;;  %v7700_v18 = vadd.f32 %v10127_v24, %v3261_v49  ;;  %v3263_v30 = vpop.f32.mrb[13].mxu1  ;;  %vm10554_vm13 = vmpackc.low %vm3797_vm11, %vm3785_vm10  ;;  %v6636_v24 = vsel %vm3797_vm11, 1.0, %v8588_v31 }
 0x396   : > { %v11585_v14 = vsel %vm10554_vm13, 4294967295, %v11584_v14  ;;  %v3805_v29 = vadd.f32 %v3803_v46, %v3731_v1  ;;  %v7701_v28 = vadd.f32 %v10136_v47, %v3263_v30  ;;  %v3265_v20 = vpop.f32.mrb[14].mxu1  ;;  %7059 = vmatprep.mubr.msk.bf16.mxu0 %vm10554_vm13, %v8591_v27  ;;  %v3732_v47 = vadd.f32 %v7698_v45, %v10443_v33 }
 0x397   : > { %v3806_v61 = vsub.f32 %v3804_v32, %v6635_v37  ;;  %v7702_v10 = vadd.f32 %v10141_v0, %v3265_v20  ;;  %v3267_v59 = vpop.f32.mrb[15].mxu1  ;;  %7061 = vmatmul.mubr.msk.bf16.gmra.mrb[72].mxu0 %vm10547_vm12, %v8591_v27  ;;  %v3734_v21 = vadd.f32 %v7700_v18, %v10443_v33  ;;  %v11598_v49 = vmov 0 }
 0x398   : > { %v3807_v60 = vsub.f32 %v3805_v29, %v6636_v24  ;;  %v7703_v63 = vadd.f32 %v10147_v44, %v3267_v59  ;;  %v3735_v2 = vadd.f32 %v7701_v28, %v10450_v58  ;;  %v11600_v32 = vmov 0 }
 0x399   : > { %vm3808_vm8 = vcmp.gt.f32.partialorder %v3806_v61, 1.0  ;;  %v3814_v34 = vmul.f32 0.9, %v3806_v61  ;;  %v3736_v45 = vadd.f32 %v7702_v10, %v10443_v33 }
 0x39a   : > { %vm3809_vm14 = vcmp.gt.f32.partialorder %v3807_v60, 1.0  ;;  %v3815_v5 = vmul.f32 0.9, %v3807_v60  ;;  %vm10575_vm9 = vmpackc.low %vm3808_vm8, %vm3796_vm7  ;;  %v6637_v44 = vsel %vm3808_vm8, 1.0, %v8588_v31  ;;  %v3737_v8 = vadd.f32 %v7703_v63, %v10450_v58 }
 0x39b   : > { %v3816_v19 = vadd.f32 %v3814_v34, %v3732_v47  ;;  %vm10581_vm15 = vmpackc.low %vm3809_vm14, %vm3797_vm11  ;;  %v6638_v7 = vsel %vm3809_vm14, 1.0, %v8588_v31 }
 0x39c   : > { %v3817_v13 = vadd.f32 %v3815_v5, %v3733_v55  ;;  %7137 = vmatprep.mubr.msk.bf16.mxu1 %vm10581_vm15, %v8591_v27 }
 0x39d   : > { %v3818_v38 = vsub.f32 %v3816_v19, %v6637_v44  ;;  %7139 = vmatmul.mubr.msk.bf16.gmra.mrb[48].mxu1 %vm10575_vm9, %v8591_v27 }
 0x39e   : > { %v3819_v41 = vsub.f32 %v3817_v13, %v6638_v7 }
 0x39f   : > { %vm3820_vm2 = vcmp.gt.f32.partialorder %v3818_v38, 1.0  ;;  %v3826_v40 = vmul.f32 0.9, %v3818_v38 }
 0x3a0   : > { %vm3821_vm5 = vcmp.gt.f32.partialorder %v3819_v41, 1.0  ;;  %v3827_v54 = vmul.f32 0.9, %v3819_v41  ;;  %vm10599_vm6 = vmpackc.low %vm3820_vm2, %vm3808_vm8  ;;  %v6639_v53 = vsel %vm3820_vm2, 1.0, %v8588_v31 }
 0x3a1   : > { %v11591_v26 = vsel %vm10599_vm6, 4294967295, %v11590_v26  ;;  %v3828_v3 = vadd.f32 %v3826_v40, %v3734_v21  ;;  %vm10605_vm10 = vmpackc.low %vm3821_vm5, %vm3809_vm14  ;;  %v6640_v23 = vsel %vm3821_vm5, 1.0, %v8588_v31 }
 0x3a2   : > { %v11593_v35 = vsel %vm10605_vm10, 4294967295, %v11592_v35  ;;  %v3829_v43 = vadd.f32 %v3827_v54, %v3735_v2  ;;  %7063 = vmatprep.mubr.msk.bf16.mxu0 %vm10605_vm10, %v8591_v27 }
 0x3a3   : > { %v3830_v17 = vsub.f32 %v3828_v3, %v6639_v53  ;;  %7065 = vmatmul.mubr.msk.bf16.gmra.mrb[76].mxu0 %vm10599_vm6, %v8591_v27 }
 0x3a4   : > { %v3831_v4 = vsub.f32 %v3829_v43, %v6640_v23 }
 0x3a5   : > { %v3838_v11 = vmul.f32 0.9, %v3830_v17  ;;  %vm3832_vm7 = vcmp.gt.f32.partialorder %v3830_v17, 1.0 }
 0x3a6   : > { %v3839_v62 = vmul.f32 0.9, %v3831_v4  ;;  %vm3833_vm11 = vcmp.gt.f32.partialorder %v3831_v4, 1.0  ;;  %vm10623_vm8 = vmpackc.low %vm3832_vm7, %vm3820_vm2  ;;  %v6641_v36 = vsel %vm3832_vm7, 1.0, %v8588_v31 }
 0x3a7   : > { %v3840_v22 = vadd.f32 %v3838_v11, %v3736_v45  ;;  %vm10628_vm14 = vmpackc.low %vm3833_vm11, %vm3821_vm5  ;;  %v6642_v52 = vsel %vm3833_vm11, 1.0, %v8588_v31 }
 0x3a8   : > { %v3841_v57 = vadd.f32 %v3839_v62, %v3737_v8  ;;  %7141 = vmatprep.mubr.msk.bf16.mxu1 %vm10628_vm14, %v8591_v27  ;;  %v11606_v8 = vmov 0 }
 0x3a9   : > { %7143 = vmatmul.mubr.msk.bf16.gmra.mrb[52].mxu1 %vm10623_vm8, %v8591_v27  ;;  %v3842_v1 = vsub.f32 %v3840_v22, %v6641_v36  ;;  %v11608_v22 = vmov 0 }
 0x3aa   : > { %v3843_v46 = vsub.f32 %v3841_v57, %v6642_v52 }
 0x3ab   : > { %vm3844_vm2 = vcmp.gt.f32.partialorder %v3842_v1, 1.0  ;;  %v3850_v37 = vmul.f32 0.9, %v3842_v1 }
 0x3ac   : > { %vm3845_vm5 = vcmp.gt.f32.partialorder %v3843_v46, 1.0  ;;  %vm10643_vm6 = vmpackc.low %vm3844_vm2, %vm3832_vm7  ;;  %v3851_v20 = vmul.f32 0.9, %v3843_v46  ;;  %v6643_v59 = vsel %vm3844_vm2, 1.0, %v8588_v31 }
 0x3ad   : > { %v11599_v49 = vsel %vm10643_vm6, 4294967295, %v11598_v49  ;;  %vm10648_vm10 = vmpackc.low %vm3845_vm5, %vm3833_vm11  ;;  %v6644_v47 = vsel %vm3845_vm5, 1.0, %v8588_v31 }
 0x3ae   : > { %v11601_v32 = vsel %vm10648_vm10, 4294967295, %v11600_v32  ;;  %7067 = vmatprep.mubr.msk.bf16.mxu0 %vm10648_vm10, %v8591_v27 }
 0x3af   : > { %7069 = vmatmul.mubr.msk.bf16.gmra.mrb[80].mxu0 %vm10643_vm6, %v8591_v27 }
 0x3c4   : > { %v3625_v18 = vpop.f32.mrb[16].mxu1 }
 0x3c5   : > { %v3738_v30 = vadd.f32 %v10443_v33, %v3625_v18  ;;  %v3627_v29 = vpop.f32.mrb[17].mxu1 }
 0x3c6   : > { %v3739_v28 = vadd.f32 %v10450_v58, %v3627_v29  ;;  %v3629_v61 = vpop.f32.mrb[18].mxu1 }
 0x3c7   : > { %v3852_v24 = vadd.f32 %v3850_v37, %v3738_v30  ;;  %v3631_v10 = vpop.f32.mrb[19].mxu1  ;;  %v3740_v55 = vadd.f32 %v10443_v33, %v3629_v61  ;;  %v7260_v30 = vpop.f32.mrb[60].mxu0 }
 0x3c8   : > { %v3853_v60 = vadd.f32 %v3851_v20, %v3739_v28  ;;  %v3741_v19 = vadd.f32 %v10450_v58, %v3631_v10  ;;  %v7261_v28 = vpop.f32.mrb[61].mxu0 }
 0x3c9   : > { %v3854_v63 = vsub.f32 %v3852_v24, %v6643_v59  ;;  %v10713_v10 = vadd.f32 %v7261_v28, %v7260_v30  ;;  %v7263_v59 = vpop.f32.mrb[62].mxu0 }
 0x3ca   : > { %v3855_v34 = vsub.f32 %v3853_v60, %v6644_v47  ;;  %v11610_v47 = vmov 0 }
 0x3cb   : > { %vm3856_vm7 = vcmp.gt.f32.partialorder %v3854_v63, 1.0  ;;  %v3862_v5 = vmul.f32 0.9, %v3854_v63 }
 0x3cc   : > { %vm3857_vm11 = vcmp.gt.f32.partialorder %v3855_v34, 1.0  ;;  %v3863_v44 = vmul.f32 0.9, %v3855_v34  ;;  %v3635_v13 = vpop.f32.mrb[20].mxu1  ;;  %vm10668_vm6 = vmpackc.low %vm3856_vm7, %vm3844_vm2  ;;  %v6645_v40 = vsel %vm3856_vm7, 1.0, %v8588_v31  ;;  %v7264_v34 = vpop.f32.mrb[63].mxu0 }
 0x3cd   : > { %v3864_v7 = vadd.f32 %v3862_v5, %v3740_v55  ;;  %v3637_v41 = vpop.f32.mrb[21].mxu1  ;;  %vm10674_vm10 = vmpackc.low %vm3857_vm11, %vm3845_vm5  ;;  %v6646_v53 = vsel %vm3857_vm11, 1.0, %v8588_v31  ;;  %v3742_v23 = vadd.f32 %v10443_v33, %v3635_v13 }
 0x3ce   : > { %v3865_v2 = vadd.f32 %v3863_v44, %v3741_v19  ;;  %v3639_v54 = vpop.f32.mrb[22].mxu1  ;;  %7145 = vmatprep.mubr.msk.bf16.mxu1 %vm10674_vm10, %v8591_v27  ;;  %v3743_v45 = vadd.f32 %v10450_v58, %v3637_v41  ;;  %v10728_v19 = vadd.f32 %v7264_v34, %v7263_v59  ;;  %v7266_v44 = vpop.f32.mrb[64].mxu0 }
 0x3cf   : > { %v3866_v3 = vsub.f32 %v3864_v7, %v6645_v40  ;;  %v3641_v43 = vpop.f32.mrb[23].mxu1  ;;  %7147 = vmatmul.mubr.msk.bf16.gmra.mrb[56].mxu1 %vm10668_vm6, %v8591_v27  ;;  %v3744_v20 = vadd.f32 %v10443_v33, %v3639_v54  ;;  %v7267_v41 = vpop.f32.mrb[65].mxu0 }
 0x3d0   : > { %v3867_v17 = vsub.f32 %v3865_v2, %v6646_v53  ;;  %v3745_v60 = vadd.f32 %v10450_v58, %v3641_v43  ;;  %v10740_v54 = vadd.f32 %v7267_v41, %v7266_v44  ;;  %v11620_v44 = vmov 0 }
 0x3d1   : > { %vm3868_vm2 = vcmp.gt.f32.partialorder %v3866_v3, 1.0  ;;  %v3874_v4 = vmul.f32 0.9, %v3866_v3  ;;  %v7269_v3 = vpop.f32.mrb[66].mxu0  ;;  %v11622_v41 = vmov 0 }
 0x3d2   : > { %vm11483_vm5 = vcmp.gt.f32.partialorder %v3867_v17, 1.0  ;;  %v3875_v11 = vmul.f32 0.9, %v3867_v17  ;;  %vm10692_vm12 = vmpackc.low %vm3868_vm2, %vm3856_vm7  ;;  %v6647_v57 = vsel %vm3868_vm2, 1.0, %v8588_v31 }
 0x3d3   : > { %v11607_v8 = vsel %vm10692_vm12, 4294967295, %v11606_v8  ;;  %v3876_v62 = vadd.f32 %v3874_v4, %v3742_v23  ;;  %vm10698_vm13 = vmpackc.low %vm11483_vm5, %vm3857_vm11  ;;  %v6648_v46 = vsel %vm11483_vm5, 1.0, %v8588_v31 }
 0x3d4   : > { %v11609_v22 = vsel %vm10698_vm13, 4294967295, %v11608_v22  ;;  %v3877_v36 = vadd.f32 %v3875_v11, %v3743_v45  ;;  %v3645_v52 = vpop.f32.mrb[24].mxu1  ;;  %7071 = vmatprep.mubr.msk.bf16.mxu0 %vm10698_vm13, %v8591_v27 }
 0x3d5   : > { %v3878_v1 = vsub.f32 %v3876_v62, %v6647_v57  ;;  %v3647_v18 = vpop.f32.mrb[25].mxu1  ;;  %7073 = vmatmul.mubr.msk.bf16.gmra.mrb[84].mxu0 %vm10692_vm12, %v8591_v27  ;;  %vm11612_vm12 = vcmp.gt.f32.partialorder %v3867_v17, 1.0  ;;  %v7270_v17 = vpop.f32.mrb[67].mxu0  ;;  %v3746_v23 = vadd.f32 %v10443_v33, %v3645_v52  ;;  %v11618_v52 = vmov 0 }
 0x3d6   : > { %v3879_v37 = vsub.f32 %v3877_v36, %v6648_v46  ;;  %v3649_v29 = vpop.f32.mrb[26].mxu1  ;;  %v10743_v11 = vadd.f32 %v7270_v17, %v7269_v3  ;;  %v3747_v62 = vadd.f32 %v10450_v58, %v3647_v18  ;;  %v11615_v46 = vmov 0 }
 0x3d7   : > { %vm3880_vm7 = vcmp.gt.f32.partialorder %v3878_v1, 1.0  ;;  %v3886_v61 = vmul.f32 0.9, %v3878_v1  ;;  %v3651_v24 = vpop.f32.mrb[27].mxu1  ;;  %v3748_v59 = vadd.f32 %v10443_v33, %v3649_v29 }
 0x3d8   : > { %vm11486_vm11 = vcmp.gt.f32.partialorder %v3879_v37, 1.0  ;;  %v3887_v63 = vmul.f32 0.9, %v3879_v37  ;;  %vm10718_vm5 = vmpackc.low %vm3880_vm7, %vm3868_vm2  ;;  %v6649_v13 = vsel %vm3880_vm7, 1.0, %v8588_v31  ;;  %vm11617_vm0 = vcmp.gt.f32.partialorder %v3879_v37, 1.0 }
 0x3d9   : > { %v11611_v47 = vsel %vm10718_vm5, 4294967295, %v11610_v47  ;;  %v3888_v55 = vadd.f32 %v3886_v61, %v3744_v20  ;;  %vm10724_vm13 = vmpackc.low %vm11486_vm11, %vm11612_vm12  ;;  %v6650_v2 = vsel %vm11486_vm11, 1.0, %v8588_v31 }
 0x3da   : > { %v3889_v7 = vadd.f32 %v3887_v63, %v3745_v60  ;;  %7149 = vmatprep.mubr.msk.bf16.mxu1 %vm10724_vm13, %v8591_v27  ;;  %v3749_v63 = vadd.f32 %v10450_v58, %v3651_v24 }
 0x3db   : > { %v3890_v40 = vsub.f32 %v3888_v55, %v6649_v13  ;;  %7151 = vmatmul.mubr.msk.bf16.gmra.mrb[60].mxu1 %vm10718_vm5, %v8591_v27 }
 0x3dc   : > { %v3891_v53 = vsub.f32 %v3889_v7, %v6650_v2  ;;  %v3655_v43 = vpop.f32.mrb[28].mxu1 }
 0x3dd   : > { %vm3892_vm12 = vcmp.gt.f32.partialorder %v3890_v40, 1.0  ;;  %v3898_v4 = vmul.f32 0.9, %v3890_v40  ;;  %v3657_v45 = vpop.f32.mrb[29].mxu1 }
 0x3de   : > { %vm3893_vm2 = vcmp.gt.f32.partialorder %v3891_v53, 1.0  ;;  %v3899_v57 = vmul.f32 0.9, %v3891_v53  ;;  %v3659_v36 = vpop.f32.mrb[30].mxu1  ;;  %vm10748_vm11 = vmpackc.low %vm3892_vm12, %vm3880_vm7  ;;  %v6651_v20 = vsel %vm3892_vm12, 1.0, %v8588_v31 }
 0x3df   : > { %v11616_v46 = vsel %vm10748_vm11, 4294967295, %v11615_v46  ;;  %v3900_v30 = vadd.f32 %v3898_v4, %v3746_v23  ;;  %v3661_v28 = vpop.f32.mrb[31].mxu1  ;;  %vm10754_vm4 = vmpackc.low %vm3893_vm2, %vm11617_vm0  ;;  %v6652_v61 = vsel %vm3893_vm2, 1.0, %v8588_v31  ;;  %v3750_v23 = vadd.f32 %v10443_v33, %v3655_v43 }
 0x3e0   : > { %v11619_v52 = vsel %vm10754_vm4, 4294967295, %v11618_v52  ;;  %v3901_v18 = vadd.f32 %v3899_v57, %v3747_v62  ;;  %7075 = vmatprep.mubr.msk.bf16.mxu0 %vm10754_vm4, %v8591_v27  ;;  %v3751_v62 = vadd.f32 %v10450_v58, %v3657_v45  ;;  %v11627_v43 = vmov 0 }
 0x3e1   : > { %v3902_v1 = vsub.f32 %v3900_v30, %v6651_v20  ;;  %7077 = vmatmul.mubr.msk.bf16.gmra.mrb[88].mxu0 %vm10748_vm11, %v8591_v27  ;;  %v11624_v30 = vmov 0 }
 0x3e2   : > { %v3903_v37 = vsub.f32 %v3901_v18, %v6652_v61 }
 0x3e3   : > { %vm3904_vm0 = vcmp.gt.f32.partialorder %v3902_v1, 1.0  ;;  %v3910_v60 = vmul.f32 0.9, %v3902_v1 }
 0x3e4   : > { %vm11491_vm7 = vcmp.gt.f32.partialorder %v3903_v37, 1.0  ;;  %v3911_v34 = vmul.f32 0.9, %v3903_v37  ;;  %v3665_v55 = vpop.f32.mrb[32].mxu1  ;;  %vm10772_vm4 = vmpackc.low %vm3904_vm0, %vm3892_vm12  ;;  %v6653_v29 = vsel %vm3904_vm0, 1.0, %v8588_v31 }
 0x3e5   : > { %v11621_v44 = vsel %vm10772_vm4, 4294967295, %v11620_v44  ;;  %v3912_v13 = vadd.f32 %v3910_v60, %v3748_v59  ;;  %v3667_v7 = vpop.f32.mrb[33].mxu1  ;;  %vm10778_vm11 = vmpackc.low %vm11491_vm7, %vm3893_vm2  ;;  %v6654_v3 = vsel %vm11491_vm7, 1.0, %v8588_v31 }
 0x3e6   : > { %v11623_v41 = vsel %vm10778_vm11, 4294967295, %v11622_v41  ;;  %v3913_v24 = vadd.f32 %v3911_v34, %v3749_v63  ;;  %v10784_v2 = vpop.f32.mrb[34].mxu1  ;;  %7153 = vmatprep.mubr.msk.bf16.mxu1 %vm10778_vm11, %v8591_v27 }
 0x3e7   : > { %v10789_v40 = vsub.f32 %v3912_v13, %v6653_v29  ;;  %v10793_v53 = vpop.f32.mrb[35].mxu1  ;;  %7155 = vmatmul.mubr.msk.bf16.gmra.mrb[64].mxu1 %vm10772_vm4, %v8591_v27  ;;  %vm11626_vm4 = vcmp.gt.f32.partialorder %v3903_v37, 1.0  ;;  %v3752_v13 = vadd.f32 %v10443_v33, %v3659_v36 }
 0x3e8   : > { %v10798_v17 = vsub.f32 %v3913_v24, %v6654_v3  ;;  %v3753_v3 = vadd.f32 %v10450_v58, %v3661_v28  ;;  %v11632_v28 = vmov 0 }
 0x3e9   : > { %vm11501_vm12 = vcmp.gt.f32.partialorder %v10789_v40, 1.0  ;;  %v3922_v4 = vmul.f32 0.9, %v10789_v40 }
 0x3ea   : > { %vm11496_vm2 = vcmp.gt.f32.partialorder %v10798_v17, 1.0  ;;  %v3923_v57 = vmul.f32 0.9, %v10798_v17  ;;  %vm10809_vm7 = vmpackc.low %vm11501_vm12, %vm3904_vm0  ;;  %v6655_v45 = vsel %vm11501_vm12, 1.0, %v8588_v31 }
 0x3eb   : > { %v11625_v30 = vsel %vm10809_vm7, 4294967295, %v11624_v30  ;;  %v3924_v20 = vadd.f32 %v3922_v4, %v3750_v23  ;;  %vm10816_vm11 = vmpackc.low %vm11496_vm2, %vm11626_vm4  ;;  %v6656_v37 = vsel %vm11496_vm2, 1.0, %v8588_v31  ;;  %v11629_v4 = vmov 0 }
 0x3ec   : > { %v11628_v43 = vsel %vm10816_vm11, 4294967295, %v11627_v43  ;;  %v3925_v18 = vadd.f32 %v3923_v57, %v3751_v62  ;;  %7079 = vmatprep.mubr.msk.bf16.mxu0 %vm10816_vm11, %v8591_v27  ;;  %v7412_v1 = vpop.f32.mrb[36].mxu1  ;;  %vm11631_vm11 = vcmp.gt.f32.partialorder %v10798_v17, 1.0 }
 0x3ed   : > { %v3926_v61 = vsub.f32 %v3924_v20, %v6655_v45  ;;  %7081 = vmatmul.mubr.msk.bf16.gmra.mrb[92].mxu0 %vm10809_vm7, %v8591_v27  ;;  %v7413_v59 = vpop.f32.mrb[37].mxu1 }
 0x3ee   : > { %v3927_v60 = vsub.f32 %v3925_v18, %v6656_v37  ;;  %v10832_v63 = vadd.f32 %v7413_v59, %v7412_v1  ;;  %v7415_v34 = vpop.f32.mrb[38].mxu1  ;;  %v3754_v37 = vadd.f32 %v10443_v33, %v3665_v55  ;;  %v11635_v55 = vmov 0 }
 0x3ef   : > { %vm11503_vm4 = vcmp.gt.f32.partialorder %v3926_v61, 1.0  ;;  %v3934_v29 = vmul.f32 0.9, %v3926_v61  ;;  %v7416_v24 = vpop.f32.mrb[39].mxu1 }
 0x3f0   : > { %vm11502_vm0 = vcmp.gt.f32.partialorder %v3927_v60, 1.0  ;;  %v3935_v23 = vmul.f32 0.9, %v3927_v60  ;;  %vm10839_vm2 = vmpackc.low %vm11503_vm4, %vm11501_vm12  ;;  %v10843_v62 = vadd.f32 %v7416_v24, %v7415_v34  ;;  %v6657_v36 = vsel %vm11503_vm4, 1.0, %v8588_v31 }
 0x3f1   : > { %v11630_v4 = vsel %vm10839_vm2, 4294967295, %v11629_v4  ;;  %v3936_v57 = vadd.f32 %v3934_v29, %v3752_v13  ;;  %vm7082_vm7 = vmpackc.low %vm11502_vm0, %vm11502_vm0  ;;  %v6658_v18 = vsel %vm11502_vm0, 1.0, %v8588_v31  ;;  %v3755_v34 = vadd.f32 %v10450_v58, %v3667_v7  ;;  %v8484_v29 = vld [vmem:[#allocation2 + $0x8] sm:$0xff] }
 0x3f2   : > { %v3937_v20 = vadd.f32 %v3935_v23, %v3753_v3  ;;  %7083 = vmatprep.mubr.msk.bf16.mxu0 %vm7082_vm7, %v8591_v27  ;;  %vm10853_vm5 = vmpackc.low %vm11502_vm0, %vm11631_vm11 }
 0x3f3   : > { %v11633_v28 = vsel %vm10853_vm5, 4294967295, %v11632_v28  ;;  %v3938_v45 = vsub.f32 %v3936_v57, %v6657_v36  ;;  %7157 = vmatprep.mubr.msk.bf16.mxu1 %vm10853_vm5, %v8591_v27  ;;  %vm7084_vm7 = vmpackc.low %vm11503_vm4, %vm11503_vm4  ;;  %vm11634_vm4 = vcmp.gt.f32.partialorder %v3927_v60, 1.0  ;;  %v11638_v36 = vmov 0  ;;  %v8434_v60 = vld [vmem:[%s11453_s5 + $0x180] sm:$0xff]  }
 0x3f4   : > { %v3939_v1 = vsub.f32 %v3937_v20, %v6658_v18  ;;  %7159 = vmatmul.mubr.msk.bf16.gmra.mrb[68].mxu1 %vm10839_vm2, %v8591_v27  ;;  %v3756_v18 = vadd.f32 %v10443_v33, %v10784_v2 }
 0x3f5   : > { %vm3940_vm11 = vcmp.gt.f32.partialorder %v3938_v45, 1.0  ;;  %v3946_v59 = vmul.f32 0.9, %v3938_v45  ;;  %7085 = vmatmul.mubr.msk.bf16.gmra.mrb[96].mxu0 %vm7084_vm7, %v8591_v27  ;;  %vm11637_vm7 = vcmp.gt.f32.partialorder %v3926_v61, 1.0  ;;  %v8437_v61 = vld [vmem:[%s11453_s5 + $0x1c8] sm:$0xff]  }
 0x3f6   : > { %vm11506_vm12 = vcmp.gt.f32.partialorder %v3939_v1, 1.0  ;;  %v3947_v13 = vmul.f32 0.9, %v3939_v1  ;;  %4677 = vmatprep.mubr.bf16.mxu0 %v8484_v29  ;;  %v6659_v3 = vsel %vm3940_vm11, 1.0, %v8588_v31  ;;  %vm10887_vm5 = vmpackc.low %vm3940_vm11, %vm11637_vm7  ;;  %v8438_v45 = vld [vmem:[%s11453_s5 + $0x188] sm:$0xff]  }
 0x3f7   : > { %v3948_v24 = vadd.f32 %v3946_v59, %v3754_v37  ;;  %vm7160_vm0 = vmpackc.low %vm11506_vm12, %vm11506_vm12  ;;  %v6660_v57 = vsel %vm11506_vm12, 1.0, %v8588_v31  ;;  %v11639_v36 = vsel %vm10887_vm5, 4294967295, %v11638_v36  ;;  %v3757_v59 = vadd.f32 %v10450_v58, %v10793_v53 }
 0x3f8   : > { %v3949_v23 = vadd.f32 %v3947_v13, %v3755_v34  ;;  %7161 = vmatprep.mubr.msk.bf16.mxu1 %vm7160_vm0, %v8591_v27  ;;  %vm10877_vm2 = vmpackc.low %vm11506_vm12, %vm11634_vm4  ;;  %vm11642_vm5 = vcmp.gt.f32.partialorder %v3939_v1, 1.0  ;;  %v8439_v1 = vld [vmem:[%s11453_s5 + $0x1d0] sm:$0xff]  }
 0x3f9   : > { %v11636_v55 = vsel %vm10877_vm2, 4294967295, %v11635_v55  ;;  %v10881_v7 = vsub.f32 %v3948_v24, %v6659_v3  ;;  %vm7162_vm4 = vmpackc.low %vm3940_vm11, %vm3940_vm11 }
 0x3fa   : > { %v10891_v20 = vsub.f32 %v3949_v23, %v6660_v57  ;;  %v8440_v57 = vld [vmem:[%s11453_s5 + $0x190] sm:$0xff]  }
 0x3fb   : > { %v3958_v37 = vmul.f32 0.9, %v10881_v7  ;;  %vm3952_vm0 = vcmp.gt.f32.partialorder %v10881_v7, 1.0 }
 0x3fc   : > { %v3959_v34 = vmul.f32 0.9, %v10891_v20  ;;  %7163 = vmatmul.mubr.msk.bf16.gmra.mrb[72].mxu1 %vm7162_vm4, %v8591_v27  ;;  %vm3953_vm7 = vcmp.gt.f32.partialorder %v10891_v20, 1.0  ;;  %vm10913_vm12 = vmpackc.low %vm3952_vm0, %vm3940_vm11  ;;  %v10935_v13 = vsel %vm3952_vm0, 1.0, %v8588_v31 }
 0x3fd   : > { %v10917_v2 = vadd.f32 %v3958_v37, %v3756_v18  ;;  %5786 = vmatprep.mubr.bf16.mxu1 %v10482_v39  ;;  %4678 = vmatmul.mubr.bf16.vlgmr.msra.gmra.mrb[100].mxu0 %v8484_v29  ;;  %vm10923_vm2 = vmpackc.low %vm3953_vm7, %vm11642_vm5  ;;  %v6662_v24 = vsel %vm3953_vm7, 1.0, %v8588_v31  ;;  %v8442_v18 = vld [vmem:[%s11453_s5 + $0x198] sm:$0xff]   ;;  %v8443_v37 = vld [vmem:[%s11453_s5 + $0x1e0] sm:$0xff]  }
 0x3fe   : > { %v10927_v53 = vadd.f32 %v3959_v34, %v3757_v59  ;;  %7473 = vmatpush3.bf16.msra.mxu0 %v8434_v60  ;;  %4685 = vmatprep.mubr.bf16.mxu0 %v8484_v29  ;;  %v8441_v60 = vld [vmem:[%s11453_s5 + $0x1d8] sm:$0xff]   ;;  %v8447_v59 = vld [vmem:[%s11453_s5 + $0x1f0] sm:$0xff]  }
 0x3ff   : > { %7474 = vmatprep.subr.bf16.mxu0 %v8437_v61  ;;  %v3962_v3 = vsub.f32 %v10917_v2, %v10935_v13  ;;  %v8444_v61 = vld [vmem:[%s11453_s5 + $0x1a0] sm:$0xff]   ;;  %v8448_v34 = vld [vmem:[%s11453_s5 + $0x1b0] sm:$0xff]  }
 0x400   : > { %v3963_v23 = vsub.f32 %v10927_v53, %v6662_v24 }
 0x401   : > { %vm3964_vm11 = vcmp.gt.f32.partialorder %v3962_v3, 1.0 }
 0x402   : > { %7475 = vmatpush3.bf16.msra.mxu0 %v8438_v45  ;;  %vm7242_vm4 = vmpackc.low %vm3964_vm11, %vm3964_vm11  ;;  %vm11664_vm11 = vnez %v11628_v43 }
 0x403   : > { %7476 = vmatprep.subr.bf16.mxu0 %v8439_v1 }
 0x404   : > { %5787 = vmatmul.mubr.bf16.vlgmr.msra.gmra.mrb[76].mxu1 %v10485_v48 }
 0x405   : > { %7209 = vmatprep.mubr.msk.bf16.mxu1 %vm10528_vm3, %v8591_v27  ;;  %4686 = vmatmul.mubr.bf16.gmra.mrb[104].mxu0 %v8484_v29  ;;  %v8446_v29 = vld [vmem:[%s11453_s5 + $0x1a8] sm:$0xff]  }
 0x406   : > { %4693 = vmatprep.mubr.bf16.mxu0 %v10482_v39  ;;  %7477 = vmatpush3.bf16.msra.mxu0 %v8440_v57  ;;  %v8445_v39 = vld [vmem:[%s11453_s5 + $0x1e8] sm:$0xff]  }
 0x407   : > { %7478 = vmatprep.subr.bf16.mxu0 %v8441_v60 }
 0x40a   : > { %7479 = vmatpush3.bf16.msra.mxu0 %v8442_v18 }
 0x40b   : > { %7480 = vmatprep.subr.bf16.mxu0 %v8443_v37 }
 0x40c   : > { %7211 = vmatmul.mubr.msk.bf16.gmra.mrb[80].mxu1 %vm10521_vm1, %v8591_v27 }
 0x40d   : > { %7213 = vmatprep.mubr.msk.bf16.mxu1 %vm10581_vm15, %v8591_v27  ;;  %4694 = vmatmul.mubr.bf16.gmra.mrb[108].mxu0 %v10485_v48  ;;  %v8449_v48 = vld [vmem:[%s11453_s5 + $0x1f8] sm:$0xff]  }
 0x40e   : > { %7101 = vmatprep.mubr.msk.bf16.mxu0 %vm10528_vm3, %v8591_v27  ;;  %7481 = vmatpush3.bf16.msra.mxu0 %v8444_v61  ;;  %vm11646_vm3 = vnez %v11623_v41 }
 0x40f   : > { %7482 = vmatprep.subr.bf16.mxu0 %v8445_v39 }
 0x412   : > { %7483 = vmatpush3.bf16.msra.mxu0 %v8446_v29 }
 0x413   : > { %7484 = vmatprep.subr.bf16.mxu0 %v8447_v59 }
 0x414   : > { %7215 = vmatmul.mubr.msk.bf16.gmra.mrb[84].mxu1 %vm10575_vm9, %v8591_v27 }
 0x415   : > { %7217 = vmatprep.mubr.msk.bf16.mxu1 %vm10628_vm14, %v8591_v27  ;;  %7103 = vmatmul.mubr.msk.bf16.gmra.mrb[112].mxu0 %vm10521_vm1, %v8591_v27  ;;  %vm11645_vm1 = vnez %v11611_v47 }
 0x416   : > { %7105 = vmatprep.mubr.msk.bf16.mxu0 %vm10581_vm15, %v8591_v27  ;;  %7485 = vmatpush3.bf16.msra.mxu0 %v8448_v34  ;;  %vm11648_vm15 = vnez %v11633_v28 }
 0x417   : > { %7486 = vmatprep.subr.bf16.mxu0 %v8449_v48 }
 0x41a   : > { %7487 = vmatpush3.bf16.msra.mxu0 %v8450_v12 }
 0x41c   : > { %7219 = vmatmul.mubr.msk.bf16.gmra.mrb[88].mxu1 %vm10623_vm8, %v8591_v27 }
 0x41d   : > { %7221 = vmatprep.mubr.msk.bf16.mxu1 %vm10674_vm10, %v8591_v27  ;;  %7107 = vmatmul.mubr.msk.bf16.gmra.mrb[116].mxu0 %vm10575_vm9, %v8591_v27  ;;  %vm11647_vm9 = vnez %v11621_v44 }
 0x41e   : > { %7109 = vmatprep.mubr.msk.bf16.mxu0 %vm10628_vm14, %v8591_v27  ;;  %vm11651_vm14 = vcmp.gt.f32.partialorder %v10789_v40, 1.0 }
 0x41f   : > { %vm7126_vm5 = vmpackc.low %vm11651_vm14, %vm11651_vm14  ;;  %vm11661_vm14 = vnez %v11607_v8 }
 0x424   : > { %7223 = vmatmul.mubr.msk.bf16.gmra.mrb[92].mxu1 %vm10668_vm6, %v8591_v27 }
 0x425   : > { %7225 = vmatprep.mubr.msk.bf16.mxu1 %vm10724_vm13, %v8591_v27  ;;  %7111 = vmatmul.mubr.msk.bf16.gmra.mrb[120].mxu0 %vm10623_vm8, %v8591_v27  ;;  %vm3965_vm8 = vcmp.gt.f32.partialorder %v3963_v23, 1.0 }
 0x426   : > { %7113 = vmatprep.mubr.msk.bf16.mxu0 %vm10674_vm10, %v8591_v27 }
 0x42c   : > { %7227 = vmatmul.mubr.msk.bf16.gmra.mrb[96].mxu1 %vm11645_vm1, %v8591_v27 }
 0x42d   : > { %7229 = vmatprep.mubr.msk.bf16.mxu1 %vm11646_vm3, %v8591_v27  ;;  %7115 = vmatmul.mubr.msk.bf16.gmra.mrb[124].mxu0 %vm10668_vm6, %v8591_v27  ;;  %vm11649_vm6 = vnez %v11630_v4 }
 0x42e   : > { %7117 = vmatprep.mubr.msk.bf16.mxu0 %vm10724_vm13, %v8591_v27  ;;  %vm11650_vm13 = vcmp.gt.f32.partialorder %v10798_v17, 1.0 }
 0x42f   : > { %vm7124_vm10 = vmpackc.low %vm11650_vm13, %vm11650_vm13  ;;  %vm11658_vm13 = vnez %v11601_v32 }
 0x434   : > { %7231 = vmatmul.mubr.msk.bf16.gmra.mrb[100].mxu1 %vm11647_vm9, %v8591_v27 }
 0x435   : > { %7233 = vmatprep.mubr.msk.bf16.mxu1 %vm11648_vm15, %v8591_v27  ;;  %7119 = vmatmul.mubr.msk.bf16.gmra.mrb[128].mxu0 %vm11645_vm1, %v8591_v27  ;;  %vm11652_vm1 = vnez %v11577_v9  ;;  %vm11656_vm15 = vnez %v11593_v35 }
 0x436   : > { %7121 = vmatprep.mubr.msk.bf16.mxu0 %vm11646_vm3, %v8591_v27  ;;  %vm11654_vm3 = vnez %v11585_v14 }
 0x43c   : > { %7235 = vmatmul.mubr.msk.bf16.gmra.mrb[104].mxu1 %vm11649_vm6, %v8591_v27  ;;  %vm11657_vm6 = vnez %v11591_v26 }
 0x43d   : > { %7237 = vmatprep.mubr.msk.bf16.mxu1 %vm10923_vm2, %v8591_v27  ;;  %7123 = vmatmul.mubr.msk.bf16.gmra.mrb[132].mxu0 %vm11647_vm9, %v8591_v27  ;;  %vm7240_vm2 = vmpackc.low %vm3965_vm8, %vm3965_vm8  ;;  %vm11655_vm9 = vnez %v11583_v25  ;;  %vm11660_vm8 = vnez %v11609_v22 }
 0x43e   : > { %7125 = vmatprep.mubr.msk.bf16.mxu0 %vm7124_vm10, %v8591_v27  ;;  %vm11659_vm10 = vnez %v11599_v49 }
 0x444   : > { %7239 = vmatmul.mubr.msk.bf16.gmra.mrb[108].mxu1 %vm10913_vm12, %v8591_v27  ;;  %vm11653_vm12 = vnez %v11575_v15 }
 0x445   : > { %7241 = vmatprep.mubr.msk.bf16.mxu1 %vm7240_vm2, %v8591_v27  ;;  %7127 = vmatmul.mubr.msk.bf16.gmra.mrb[136].mxu0 %vm7126_vm5, %v8591_v27  ;;  %vm11662_vm5 = vnez %v11619_v52  ;;  %vm11663_vm2 = vnez %v11616_v46 }
 0x446   : > { %5410 = vmatprep.mubr.bf16.mxu0 %v10145_v42 }
 0x44c   : > { %7243 = vmatmul.mubr.msk.bf16.gmra.mrb[112].mxu1 %vm7242_vm4, %v8591_v27  ;;  %vm11665_vm4 = vnez %v11625_v30 }
 0x44d   : > { %5411 = vmatmul.mubr.bf16.vlgmr.msra.gmra.mrb[140].mxu0 %v10160_v51 }
 0x44e   : > { %7169 = vmatprep.mubr.msk.bf16.mxu0 %vm11652_vm1, %v8591_v27  ;;  %vm11666_vm1 = vnez %v11636_v55 }
 0x455   : > { %7171 = vmatmul.mubr.msk.bf16.gmra.mrb[144].mxu0 %vm11653_vm12, %v8591_v27  ;;  %vm11667_vm12 = vnez %v11639_v36 }
 0x456   : > { %7173 = vmatprep.mubr.msk.bf16.mxu0 %vm11654_vm3, %v8591_v27  ;;  %vm7200_vm3 = vmpackc.low %vm3953_vm7, %vm3953_vm7 }
 0x45c   : > { %v7418_v42 = vpop.f32.mrb[40].mxu1 }
 0x45d   : > { %v7419_v6 = vpop.f32.mrb[41].mxu1  ;;  %7175 = vmatmul.mubr.msk.bf16.gmra.mrb[148].mxu0 %vm11655_vm9, %v8591_v27  ;;  %vm7202_vm9 = vmpackc.low %vm3952_vm0, %vm3952_vm0 }
 0x45e   : > { %v11093_v0 = vadd.f32 %v7419_v6, %v7418_v42  ;;  %v7272_v51 = vpop.f32.mrb[68].mxu0  ;;  %v7421_v50 = vpop.f32.mrb[42].mxu1  ;;  %7177 = vmatprep.mubr.msk.bf16.mxu0 %vm11656_vm15, %v8591_v27 }
 0x45f   : > { %v7273_v15 = vpop.f32.mrb[69].mxu0  ;;  %v7422_v9 = vpop.f32.mrb[43].mxu1 }
 0x460   : > { %v11098_v16 = vadd.f32 %v7273_v15, %v7272_v51  ;;  %v11100_v14 = vadd.f32 %v7422_v9, %v7421_v50  ;;  %v7275_v56 = vpop.f32.mrb[70].mxu0 }
 0x461   : > { %v7276_v38 = vpop.f32.mrb[71].mxu0 }
 0x462   : > { %v11102_v21 = vadd.f32 %v7276_v38, %v7275_v56 }
 0x464   : > { %v7424_v25 = vpop.f32.mrb[44].mxu1 }
 0x465   : > { %v7425_v47 = vpop.f32.mrb[45].mxu1  ;;  %7179 = vmatmul.mubr.msk.bf16.gmra.mrb[152].mxu0 %vm11657_vm6, %v8591_v27 }
 0x466   : > { %v11107_v5 = vadd.f32 %v7425_v47, %v7424_v25  ;;  %v7427_v35 = vpop.f32.mrb[46].mxu1  ;;  %7181 = vmatprep.mubr.msk.bf16.mxu0 %vm11658_vm13, %v8591_v27 }
 0x467   : > { %v7428_v44 = vpop.f32.mrb[47].mxu1 }
 0x468   : > { %v11112_v41 = vadd.f32 %v7428_v44, %v7427_v35 }
 0x46a   : > { %v7278_v40 = vpop.f32.mrb[72].mxu0 }
 0x46b   : > { %v7279_v17 = vpop.f32.mrb[73].mxu0 }
 0x46c   : > { %v11114_v4 = vadd.f32 %v7279_v17, %v7278_v40  ;;  %v7281_v28 = vpop.f32.mrb[74].mxu0 }
 0x46d   : > { %v7282_v33 = vpop.f32.mrb[75].mxu0  ;;  %7183 = vmatmul.mubr.msk.bf16.gmra.mrb[156].mxu0 %vm11659_vm10, %v8591_v27 }
 0x46e   : > { %v11119_v26 = vadd.f32 %v7282_v33, %v7281_v28  ;;  %7185 = vmatprep.mubr.msk.bf16.mxu0 %vm11660_vm8, %v8591_v27 }
 0x470   : > { %v7430_v32 = vpop.f32.mrb[48].mxu1 }
 0x471   : > { %v7431_v2 = vpop.f32.mrb[49].mxu1 }
 0x472   : > { %v11124_v58 = vadd.f32 %v7431_v2, %v7430_v32  ;;  %v7433_v53 = vpop.f32.mrb[50].mxu1 }
 0x473   : > { %v7434_v45 = vpop.f32.mrb[51].mxu1 }
 0x474   : > { %v11126_v13 = vadd.f32 %v7434_v45, %v7433_v53 }
 0x475   : > { %7187 = vmatmul.mubr.msk.bf16.gmra.mrb[160].mxu0 %vm11661_vm14, %v8591_v27 }
 0x476   : > { %v7284_v49 = vpop.f32.mrb[76].mxu0  ;;  %7189 = vmatprep.mubr.msk.bf16.mxu0 %vm11662_vm5, %v8591_v27 }
 0x477   : > { %v7285_v1 = vpop.f32.mrb[77].mxu0 }
 0x478   : > { %v11134_v22 = vadd.f32 %v7285_v1, %v7284_v49  ;;  %v7287_v24 = vpop.f32.mrb[78].mxu0 }
 0x479   : > { %v7288_v3 = vpop.f32.mrb[79].mxu0 }
 0x47a   : > { %v11136_v23 = vadd.f32 %v7288_v3, %v7287_v24 }
 0x47c   : > { %v7436_v57 = vpop.f32.mrb[52].mxu1 }
 0x47d   : > { %v7437_v60 = vpop.f32.mrb[53].mxu1  ;;  %7191 = vmatmul.mubr.msk.bf16.gmra.mrb[164].mxu0 %vm11663_vm2, %v8591_v27 }
 0x47e   : > { %v11141_v8 = vadd.f32 %v7437_v60, %v7436_v57  ;;  %v7439_v18 = vpop.f32.mrb[54].mxu1  ;;  %7193 = vmatprep.mubr.msk.bf16.mxu0 %vm11664_vm11, %v8591_v27 }
 0x47f   : > { %v7440_v52 = vpop.f32.mrb[55].mxu1 }
 0x480   : > { %v11146_v37 = vadd.f32 %v7440_v52, %v7439_v18 }
 0x482   : > { %v7290_v61 = vpop.f32.mrb[80].mxu0 }
 0x483   : > { %v7291_v39 = vpop.f32.mrb[81].mxu0 }
 0x484   : > { %v11148_v29 = vadd.f32 %v7291_v39, %v7290_v61  ;;  %v7293_v59 = vpop.f32.mrb[82].mxu0 }
 0x485   : > { %v7294_v34 = vpop.f32.mrb[83].mxu0  ;;  %7195 = vmatmul.mubr.msk.bf16.gmra.mrb[168].mxu0 %vm11665_vm4, %v8591_v27 }
 0x486   : > { %v11153_v46 = vadd.f32 %v7294_v34, %v7293_v59  ;;  %7197 = vmatprep.mubr.msk.bf16.mxu0 %vm11666_vm1, %v8591_v27 }
 0x48d   : > { %7199 = vmatmul.mubr.msk.bf16.gmra.mrb[172].mxu0 %vm11667_vm12, %v8591_v27 }
 0x48e   : > { %7201 = vmatprep.mubr.msk.bf16.mxu0 %vm7200_vm3, %v8591_v27 }
 0x495   : > { %7203 = vmatmul.mubr.msk.bf16.gmra.mrb[176].mxu0 %vm7202_vm9, %v8591_v27 }
 0x4a2   : > { %v7442_v30 = vpop.f32.mrb[56].mxu1 }
 0x4a3   : > { %v7443_v43 = vpop.f32.mrb[57].mxu1 }
 0x4a4   : > { %v11169_v55 = vadd.f32 %v7443_v43, %v7442_v30  ;;  %v7445_v48 = vpop.f32.mrb[58].mxu1 }
 0x4a5   : > { %v7446_v12 = vpop.f32.mrb[59].mxu1 }
 0x4a6   : > { %v11171_v36 = vadd.f32 %v7446_v12, %v7445_v48 }
 0x4a8   : > { %v7296_v42 = vpop.f32.mrb[84].mxu0 }
 0x4a9   : > { %v7297_v20 = vpop.f32.mrb[85].mxu0 }
 0x4aa   : > { %v11173_v6 = vadd.f32 %v7297_v20, %v7296_v42  ;;  %v7299_v51 = vpop.f32.mrb[86].mxu0 }
 0x4ab   : > { %v7300_v50 = vpop.f32.mrb[87].mxu0 }
 0x4ac   : > { %v11175_v15 = vadd.f32 %v7300_v50, %v7299_v51 }
 0x4ae   : > { %v7448_v7 = vpop.f32.mrb[60].mxu1 }
 0x4af   : > { %v7449_v9 = vpop.f32.mrb[61].mxu1 }
 0x4b0   : > { %v11177_v56 = vadd.f32 %v7449_v9, %v7448_v7  ;;  %v7451_v27 = vpop.f32.mrb[62].mxu1 }
 0x4b1   : > { %v7452_v38 = vpop.f32.mrb[63].mxu1 }
 0x4b2   : > { %v11179_v25 = vadd.f32 %v7452_v38, %v7451_v27 }
 0x4b4   : > { %v7302_v47 = vpop.f32.mrb[88].mxu0 }
 0x4b5   : > { %v7303_v35 = vpop.f32.mrb[89].mxu0 }
 0x4b6   : > { %v11181_v44 = vadd.f32 %v7303_v35, %v7302_v47  ;;  %v7305_v40 = vpop.f32.mrb[90].mxu0 }
 0x4b7   : > { %v7306_v17 = vpop.f32.mrb[91].mxu0 }
 0x4b8   : > { %v11183_v28 = vadd.f32 %v7306_v17, %v7305_v40 }
 0x4ba   : > { %v7454_v33 = vpop.f32.mrb[64].mxu1 }
 0x4bb   : > { %v7455_v32 = vpop.f32.mrb[65].mxu1 }
 0x4bc   : > { %v11185_v2 = vadd.f32 %v7455_v32, %v7454_v33  ;;  %v7457_v53 = vpop.f32.mrb[66].mxu1 }
 0x4bd   : > { %v7458_v45 = vpop.f32.mrb[67].mxu1 }
 0x4be   : > { %v11187_v49 = vadd.f32 %v7458_v45, %v7457_v53 }
 0x4c0   : > { %v7308_v1 = vpop.f32.mrb[92].mxu0 }
 0x4c1   : > { %v7309_v24 = vpop.f32.mrb[93].mxu0 }
 0x4c2   : > { %v11189_v3 = vadd.f32 %v7309_v24, %v7308_v1  ;;  %v7311_v57 = vpop.f32.mrb[94].mxu0 }
 0x4c3   : > { %v7312_v60 = vpop.f32.mrb[95].mxu0 }
 0x4c4   : > { %v11191_v18 = vadd.f32 %v7312_v60, %v7311_v57 }
 0x4c7   : > { %v7460_v52 = vpop.f32.mrb[68].mxu1 }
 0x4c8   : > { %v7461_v61 = vpop.f32.mrb[69].mxu1  ;;  %v7314_v39 = vpop.f32.mrb[96].mxu0 }
 0x4c9   : > { %v11193_v59 = vadd.f32 %v7461_v61, %v7460_v52  ;;  %v7463_v34 = vpop.f32.mrb[70].mxu1  ;;  %v7315_v30 = vpop.f32.mrb[97].mxu0 }
 0x4ca   : > { %v11195_v43 = vadd.f32 %v7315_v30, %v7314_v39  ;;  %v7464_v48 = vpop.f32.mrb[71].mxu1  ;;  %v7317_v12 = vpop.f32.mrb[98].mxu0 }
 0x4cb   : > { %v11197_v42 = vadd.f32 %v7464_v48, %v7463_v34  ;;  %v7318_v20 = vpop.f32.mrb[99].mxu0 }
 0x4cf   : > { %v7466_v51 = vpop.f32.mrb[72].mxu1 }
 0x4d0   : > { %v7467_v50 = vpop.f32.mrb[73].mxu1  ;;  %v7336_v7 = vpop.f32.mrb[100].mxu0 }
 0x4d1   : > { %v11199_v9 = vadd.f32 %v7467_v50, %v7466_v51  ;;  %v7469_v27 = vpop.f32.mrb[74].mxu1  ;;  %v7337_v38 = vpop.f32.mrb[101].mxu0 }
 0x4d2   : > { %v7338_v47 = vadd.f32 %v7337_v38, %v7336_v7  ;;  %v7470_v35 = vpop.f32.mrb[75].mxu1  ;;  %v7339_v40 = vpop.f32.mrb[102].mxu0 }
 0x4d3   : > { %v7340_v17 = vpop.f32.mrb[103].mxu0 }
 0x4d4   : > { %v4680_v33 = vadd.f32 %v7338_v47, %v10713_v10  ;;  %v7341_v32 = vadd.f32 %v7340_v17, %v7339_v40 }
 0x4d6   : > { %v4683_v53 = vadd.f32 %v7341_v32, %v10728_v19  ;;  %v11204_v45 = vadd.f32 %v10832_v63, %v4680_v33 }
 0x4d7   : > { %v7564_v1 = vpop.f32.mrb[76].mxu1 }
 0x4d8   : > { %v7565_v24 = vpop.f32.mrb[77].mxu1  ;;  %v7342_v57 = vpop.f32.mrb[104].mxu0  ;;  %v11207_v60 = vadd.f32 %v10843_v62, %v4683_v53 }
 0x4d9   : > { %v11209_v52 = vadd.f32 %v7565_v24, %v7564_v1  ;;  %v7567_v61 = vpop.f32.mrb[78].mxu1  ;;  %v7343_v39 = vpop.f32.mrb[105].mxu0 }
 0x4da   : > { %v7344_v34 = vadd.f32 %v7343_v39, %v7342_v57  ;;  %v7568_v30 = vpop.f32.mrb[79].mxu1  ;;  %v7345_v48 = vpop.f32.mrb[106].mxu0 }
 0x4db   : > { %v11211_v10 = vadd.f32 %v7568_v30, %v7567_v61  ;;  %v7346_v12 = vpop.f32.mrb[107].mxu0 }
 0x4dc   : > { %v4688_v19 = vadd.f32 %v7344_v34, %v10740_v54  ;;  %v7347_v63 = vadd.f32 %v7346_v12, %v7345_v48 }
 0x4de   : > { %v4691_v20 = vadd.f32 %v7347_v63, %v10743_v11  ;;  %v11216_v51 = vadd.f32 %v11093_v0, %v4688_v19 }
 0x4df   : > { %v7570_v62 = vpop.f32.mrb[80].mxu1 }
 0x4e0   : > { %v7571_v50 = vpop.f32.mrb[81].mxu1  ;;  %v7348_v7 = vpop.f32.mrb[108].mxu0  ;;  %v11219_v27 = vadd.f32 %v11100_v14, %v4691_v20 }
 0x4e1   : > { %v11221_v38 = vadd.f32 %v7571_v50, %v7570_v62  ;;  %v7573_v47 = vpop.f32.mrb[82].mxu1  ;;  %v7349_v35 = vpop.f32.mrb[109].mxu0 }
 0x4e2   : > { %v7350_v40 = vadd.f32 %v7349_v35, %v7348_v7  ;;  %v7574_v17 = vpop.f32.mrb[83].mxu1  ;;  %v7351_v33 = vpop.f32.mrb[110].mxu0 }
 0x4e3   : > { %v11223_v54 = vadd.f32 %v7574_v17, %v7573_v47  ;;  %v7352_v32 = vpop.f32.mrb[111].mxu0 }
 0x4e4   : > { %v4696_v11 = vadd.f32 %v7350_v40, %v11098_v16  ;;  %v7353_v0 = vadd.f32 %v7352_v32, %v7351_v33 }
 0x4e6   : > { %v4699_v53 = vadd.f32 %v7353_v0, %v11102_v21  ;;  %v11228_v1 = vadd.f32 %v11107_v5, %v4696_v11 }
 0x4e7   : > { %v7576_v14 = vpop.f32.mrb[84].mxu1 }
 0x4e8   : > { %v7577_v24 = vpop.f32.mrb[85].mxu1  ;;  %v7354_v57 = vpop.f32.mrb[112].mxu0  ;;  %v11231_v61 = vadd.f32 %v11112_v41, %v4699_v53 }
 0x4e9   : > { %v11233_v39 = vadd.f32 %v7577_v24, %v7576_v14  ;;  %v7579_v34 = vpop.f32.mrb[86].mxu1  ;;  %v7355_v30 = vpop.f32.mrb[113].mxu0 }
 0x4ea   : > { %v7356_v48 = vadd.f32 %v7355_v30, %v7354_v57  ;;  %v7580_v12 = vpop.f32.mrb[87].mxu1  ;;  %v7357_v19 = vpop.f32.mrb[114].mxu0 }
 0x4eb   : > { %v11235_v16 = vadd.f32 %v7580_v12, %v7579_v34  ;;  %v7358_v63 = vpop.f32.mrb[115].mxu0 }
 0x4ec   : > { %v4704_v21 = vadd.f32 %v7356_v48, %v11114_v4  ;;  %v7359_v5 = vadd.f32 %v7358_v63, %v7357_v19 }
 0x4ee   : > { %v4707_v20 = vadd.f32 %v7359_v5, %v11119_v26  ;;  %v11240_v62 = vadd.f32 %v11124_v58, %v4704_v21 }
 0x4ef   : > { %v7582_v41 = vpop.f32.mrb[88].mxu1 }
 0x4f0   : > { %v7583_v50 = vpop.f32.mrb[89].mxu1  ;;  %v7360_v7 = vpop.f32.mrb[116].mxu0  ;;  %v11243_v47 = vadd.f32 %v11126_v13, %v4707_v20 }
 0x4f1   : > { %v11245_v35 = vadd.f32 %v7583_v50, %v7582_v41  ;;  %v7585_v40 = vpop.f32.mrb[90].mxu1  ;;  %v7361_v17 = vpop.f32.mrb[117].mxu0 }
 0x4f2   : > { %v7362_v33 = vadd.f32 %v7361_v17, %v7360_v7  ;;  %v7586_v32 = vpop.f32.mrb[91].mxu1  ;;  %v7363_v11 = vpop.f32.mrb[118].mxu0 }
 0x4f3   : > { %v11247_v4 = vadd.f32 %v7586_v32, %v7585_v40  ;;  %v7364_v0 = vpop.f32.mrb[119].mxu0 }
 0x4f4   : > { %v4712_v26 = vadd.f32 %v7362_v33, %v11134_v22  ;;  %v7365_v58 = vadd.f32 %v7364_v0, %v7363_v11 }
 0x4f6   : > { %v4715_v53 = vadd.f32 %v7365_v58, %v11136_v23  ;;  %v11252_v14 = vadd.f32 %v11141_v8, %v4712_v26 }
 0x4f7   : > { %v7588_v13 = vpop.f32.mrb[92].mxu1 }
 0x4f8   : > { %v7589_v24 = vpop.f32.mrb[93].mxu1  ;;  %v7366_v57 = vpop.f32.mrb[120].mxu0  ;;  %v11255_v34 = vadd.f32 %v11146_v37, %v4715_v53 }
 0x4f9   : > { %v11257_v30 = vadd.f32 %v7589_v24, %v7588_v13  ;;  %v7591_v48 = vpop.f32.mrb[94].mxu1  ;;  %v7367_v12 = vpop.f32.mrb[121].mxu0 }
 0x4fa   : > { %v7368_v19 = vadd.f32 %v7367_v12, %v7366_v57  ;;  %v7592_v63 = vpop.f32.mrb[95].mxu1  ;;  %v7369_v21 = vpop.f32.mrb[122].mxu0 }
 0x4fb   : > { %v11259_v22 = vadd.f32 %v7592_v63, %v7591_v48  ;;  %v7370_v5 = vpop.f32.mrb[123].mxu0 }
 0x4fc   : > { %v4720_v23 = vadd.f32 %v7368_v19, %v11148_v29  ;;  %v7371_v8 = vadd.f32 %v7370_v5, %v7369_v21 }
 0x4fe   : > { %v4723_v20 = vadd.f32 %v7371_v8, %v11153_v46  ;;  %v11264_v41 = vadd.f32 %v11169_v55, %v4720_v23 }
 0x4ff   : > { %v7594_v37 = vpop.f32.mrb[96].mxu1 }
 0x500   : > { %v7595_v50 = vpop.f32.mrb[97].mxu1  ;;  %v7372_v7 = vpop.f32.mrb[124].mxu0  ;;  %v11267_v40 = vadd.f32 %v11171_v36, %v4723_v20 }
 0x501   : > { %v11269_v17 = vadd.f32 %v7595_v50, %v7594_v37  ;;  %v7597_v33 = vpop.f32.mrb[98].mxu1  ;;  %v7373_v32 = vpop.f32.mrb[125].mxu0 }
 0x502   : > { %v7374_v11 = vadd.f32 %v7373_v32, %v7372_v7  ;;  %v7598_v0 = vpop.f32.mrb[99].mxu1  ;;  %v7375_v26 = vpop.f32.mrb[126].mxu0 }
 0x503   : > { %v11271_v29 = vadd.f32 %v7598_v0, %v7597_v33  ;;  %v7376_v58 = vpop.f32.mrb[127].mxu0 }
 0x504   : > { %v4728_v46 = vadd.f32 %v7374_v11, %v11173_v6  ;;  %v7377_v55 = vadd.f32 %v7376_v58, %v7375_v26 }
 0x506   : > { %v4731_v53 = vadd.f32 %v7377_v55, %v11175_v15  ;;  %v11276_v13 = vadd.f32 %v11177_v56, %v4728_v46 }
 0x507   : > { %v7600_v36 = vpop.f32.mrb[100].mxu1 }
 0x508   : > { %v7601_v24 = vpop.f32.mrb[101].mxu1  ;;  %v7378_v57 = vpop.f32.mrb[128].mxu0  ;;  %v11279_v48 = vadd.f32 %v11179_v25, %v4731_v53 }
 0x509   : > { %v11281_v12 = vadd.f32 %v7601_v24, %v7600_v36  ;;  %v7603_v19 = vpop.f32.mrb[102].mxu1  ;;  %v7379_v63 = vpop.f32.mrb[129].mxu0 }
 0x50a   : > { %v7380_v21 = vadd.f32 %v7379_v63, %v7378_v57  ;;  %v7604_v5 = vpop.f32.mrb[103].mxu1  ;;  %v7381_v23 = vpop.f32.mrb[130].mxu0 }
 0x50b   : > { %v11283_v6 = vadd.f32 %v7604_v5, %v7603_v19  ;;  %v7382_v8 = vpop.f32.mrb[131].mxu0 }
 0x50c   : > { %v4736_v15 = vadd.f32 %v7380_v21, %v11181_v44  ;;  %v7383_v56 = vadd.f32 %v7382_v8, %v7381_v23 }
 0x50e   : > { %v4739_v20 = vadd.f32 %v7383_v56, %v11183_v28  ;;  %v11288_v37 = vadd.f32 %v11185_v2, %v4736_v15 }
 0x50f   : > { %v7606_v25 = vpop.f32.mrb[104].mxu1 }
 0x510   : > { %v7607_v50 = vpop.f32.mrb[105].mxu1  ;;  %v7384_v7 = vpop.f32.mrb[132].mxu0  ;;  %v11291_v33 = vadd.f32 %v11187_v49, %v4739_v20 }
 0x511   : > { %v11293_v32 = vadd.f32 %v7607_v50, %v7606_v25  ;;  %v7609_v11 = vpop.f32.mrb[106].mxu1  ;;  %v7385_v0 = vpop.f32.mrb[133].mxu0 }
 0x512   : > { %v7386_v26 = vadd.f32 %v7385_v0, %v7384_v7  ;;  %v7610_v58 = vpop.f32.mrb[107].mxu1  ;;  %v7387_v46 = vpop.f32.mrb[134].mxu0 }
 0x513   : > { %v11295_v44 = vadd.f32 %v7610_v58, %v7609_v11  ;;  %v7388_v55 = vpop.f32.mrb[135].mxu0 }
 0x514   : > { %v4744_v28 = vadd.f32 %v7386_v26, %v11189_v3  ;;  %v7389_v2 = vadd.f32 %v7388_v55, %v7387_v46 }
 0x516   : > { %v4747_v53 = vadd.f32 %v7389_v2, %v11191_v18  ;;  %v11300_v36 = vadd.f32 %v11193_v59, %v4744_v28 }
 0x517   : > { %v7612_v49 = vpop.f32.mrb[108].mxu1 }
 0x518   : > { %v7613_v24 = vpop.f32.mrb[109].mxu1  ;;  %v7390_v57 = vpop.f32.mrb[136].mxu0  ;;  %v11303_v19 = vadd.f32 %v11197_v42, %v4747_v53 }
 0x519   : > { %v11305_v63 = vadd.f32 %v7613_v24, %v7612_v49  ;;  %v7615_v21 = vpop.f32.mrb[110].mxu1  ;;  %v7391_v5 = vpop.f32.mrb[137].mxu0 }
 0x51a   : > { %v7392_v23 = vadd.f32 %v7391_v5, %v7390_v57  ;;  %v7616_v8 = vpop.f32.mrb[111].mxu1  ;;  %v7393_v3 = vpop.f32.mrb[138].mxu0 }
 0x51b   : > { %v11307_v15 = vadd.f32 %v7616_v8, %v7615_v21  ;;  %v7394_v18 = vpop.f32.mrb[139].mxu0 }
 0x51c   : > { %v4752_v59 = vadd.f32 %v7392_v23, %v11195_v43  ;;  %v11320_v43 = vld [vmem:[%s11454_s6] ss:$0 sm:$0xff] }
 0x51e   : > { %v11311_v56 = vadd.f32 %v11199_v9, %v4752_v59 }
 0x51f   : > { %v7618_v20 = vpop.f32.mrb[112].mxu1 }
 0x520   : > { %v7619_v25 = vpop.f32.mrb[113].mxu1  ;;  %v7488_v42 = vpop.f32.mrb[140].mxu0 }
 0x521   : > { %v11313_v50 = vadd.f32 %v7619_v25, %v7618_v20  ;;  %v7621_v7 = vpop.f32.mrb[114].mxu1  ;;  %v7489_v11 = vpop.f32.mrb[141].mxu0 }
 0x522   : > { %v7490_v0 = vadd.f32 %v7489_v11, %v7488_v42  ;;  %v7622_v26 = vpop.f32.mrb[115].mxu1  ;;  %v7491_v58 = vpop.f32.mrb[142].mxu0 }
 0x523   : > { %v7492_v46 = vpop.f32.mrb[143].mxu0 }
 0x524   : > { %v5490_v55 = vadd.f32 %v7490_v0, %v11204_v45  ;;  %v7493_v28 = vadd.f32 %v7492_v46, %v7491_v58 }
 0x526   : > { %v5866_v9 = vadd.f32 %v11209_v52, %v5490_v55  ;;  %v5491_v2 = vadd.f32 %v7493_v28, %v11207_v60 }
 0x528   : > { %v5892_v53 = vadd.f32 %v11320_v43, %v5866_v9  ;;  %v5867_v45 = vadd.f32 %v11211_v10, %v5491_v2  ;;  %v7494_v49 = vpop.f32.mrb[144].mxu0 }
 0x529   : > { %v7495_v52 = vpop.f32.mrb[145].mxu0 }
 0x52a   : > { %vm5912_vm0 = vcmp.gt.f32.partialorder %v5892_v53, 1.0  ;;  %6042 = vst [vmem:[%s11327_s30] sm:$0xff] %v5892_v53  ;;  %v5893_v60 = vadd.f32 %v11320_v43, %v5867_v45  ;;  %v5915_v24 = vmul.f32 0.9, %v5892_v53  ;;  %v7496_v57 = vadd.f32 %v7495_v52, %v7494_v49  ;;  %v7497_v21 = vpop.f32.mrb[146].mxu0 }
 0x52b   : > { %v6995_v5 = vsel %vm5912_vm0, 1.0, %v8588_v31  ;;  %v7498_v23 = vpop.f32.mrb[147].mxu0 }
 0x52c   : > { %6023 = vst [vmem:[%s11334_s10] sm:$0xff] %v6995_v5  ;;  %v5916_v10 = vadd.f32 %v5915_v24, %v5893_v60  ;;  %v5492_v8 = vadd.f32 %v7496_v57, %v11216_v51  ;;  %v7499_v3 = vadd.f32 %v7498_v23, %v7497_v21 }
 0x52e   : > { %v5917_v18 = vsub.f32 %v5916_v10, %v6995_v5  ;;  %v5868_v59 = vadd.f32 %v11221_v38, %v5492_v8  ;;  %v5493_v20 = vadd.f32 %v7499_v3, %v11219_v27 }
 0x530   : > { %vm5918_vm7 = vcmp.gt.f32.partialorder %v5917_v18, 1.0  ;;  %6043 = vst [vmem:[%s11327_s30 + $0x8] sm:$0xff] %v5917_v18  ;;  %v5894_v25 = vadd.f32 %v11320_v43, %v5868_v59  ;;  %v5921_v42 = vmul.f32 0.9, %v5917_v18  ;;  %v5869_v7 = vadd.f32 %v11223_v54, %v5493_v20  ;;  %v7500_v11 = vpop.f32.mrb[148].mxu0 }
 0x531   : > { %v6996_v0 = vsel %vm5918_vm7, 1.0, %v8588_v31  ;;  %v7501_v26 = vpop.f32.mrb[149].mxu0 }
 0x532   : > { %6024 = vst [vmem:[%s11334_s10 + $0x8] sm:$0xff] %v6996_v0  ;;  %v5922_v51 = vadd.f32 %v5921_v42, %v5894_v25  ;;  %v7502_v58 = vadd.f32 %v7501_v26, %v7500_v11  ;;  %v7503_v46 = vpop.f32.mrb[150].mxu0  ;;  %v5895_v9 = vadd.f32 %v11320_v43, %v5869_v7 }
 0x533   : > { %v7504_v38 = vpop.f32.mrb[151].mxu0 }
 0x534   : > { %v5923_v55 = vsub.f32 %v5922_v51, %v6996_v0  ;;  %v5494_v27 = vadd.f32 %v7502_v58, %v11228_v1  ;;  %v7505_v28 = vadd.f32 %v7504_v38, %v7503_v46 }
 0x536   : > { %vm5924_vm15 = vcmp.gt.f32.partialorder %v5923_v55, 1.0  ;;  %6044 = vst [vmem:[%s11327_s30 + $0x10] sm:$0xff] %v5923_v55  ;;  %v5927_v54 = vmul.f32 0.9, %v5923_v55  ;;  %v5870_v2 = vadd.f32 %v11233_v39, %v5494_v27  ;;  %v5495_v53 = vadd.f32 %v7505_v28, %v11231_v61 }
 0x537   : > { %v6997_v45 = vsel %vm5924_vm15, 1.0, %v8588_v31 }
 0x538   : > { %v5928_v49 = vadd.f32 %v5927_v54, %v5895_v9  ;;  %6025 = vst [vmem:[%s11334_s10 + $0x10] sm:$0xff] %v6997_v45  ;;  %v5871_v52 = vadd.f32 %v11235_v16, %v5495_v53  ;;  %v7506_v60 = vpop.f32.mrb[152].mxu0  ;;  %v5896_v5 = vadd.f32 %v11320_v43, %v5870_v2 }
 0x539   : > { %v7507_v1 = vpop.f32.mrb[153].mxu0 }
 0x53a   : > { %v5929_v24 = vsub.f32 %v5928_v49, %v6997_v45  ;;  %v7508_v57 = vadd.f32 %v7507_v1, %v7506_v60  ;;  %v7509_v21 = vpop.f32.mrb[154].mxu0  ;;  %v5897_v7 = vadd.f32 %v11320_v43, %v5871_v52 }
 0x53b   : > { %v7510_v23 = vpop.f32.mrb[155].mxu0 }
 0x53c   : > { %6045 = vst [vmem:[%s11327_s30 + $0x18] sm:$0xff] %v5929_v24  ;;  %vm5930_vm6 = vcmp.gt.f32.partialorder %v5929_v24, 1.0  ;;  %v5933_v39 = vmul.f32 0.9, %v5929_v24  ;;  %v5496_v61 = vadd.f32 %v7508_v57, %v11240_v62  ;;  %v7511_v10 = vadd.f32 %v7510_v23, %v7509_v21 }
 0x53d   : > { %v6998_v8 = vsel %vm5930_vm6, 1.0, %v8588_v31 }
 0x53e   : > { %v5934_v3 = vadd.f32 %v5933_v39, %v5896_v5  ;;  %6026 = vst [vmem:[%s11334_s10 + $0x18] sm:$0xff] %v6998_v8  ;;  %v5872_v16 = vadd.f32 %v11245_v35, %v5496_v61  ;;  %v5497_v18 = vadd.f32 %v7511_v10, %v11243_v47 }
 0x540   : > { %v5935_v59 = vsub.f32 %v5934_v3, %v6998_v8  ;;  %v5873_v20 = vadd.f32 %v11247_v4, %v5497_v18  ;;  %v7512_v25 = vpop.f32.mrb[156].mxu0  ;;  %v5898_v55 = vadd.f32 %v11320_v43, %v5872_v16 }
 0x541   : > { %v7513_v42 = vpop.f32.mrb[157].mxu0 }
 0x542   : > { %6046 = vst [vmem:[%s11327_s30 + $0x20] sm:$0xff] %v5935_v59  ;;  %vm5936_vm13 = vcmp.gt.f32.partialorder %v5935_v59, 1.0  ;;  %v5939_v62 = vmul.f32 0.9, %v5935_v59  ;;  %v7514_v11 = vadd.f32 %v7513_v42, %v7512_v25  ;;  %v7515_v0 = vpop.f32.mrb[158].mxu0  ;;  %v5899_v60 = vadd.f32 %v11320_v43, %v5873_v20 }
 0x543   : > { %v6999_v26 = vsel %vm5936_vm13, 1.0, %v8588_v31  ;;  %v7516_v51 = vpop.f32.mrb[159].mxu0 }
 0x544   : > { %v5940_v58 = vadd.f32 %v5939_v62, %v5897_v7  ;;  %6027 = vst [vmem:[%s11334_s10 + $0x20] sm:$0xff] %v6999_v26  ;;  %v5498_v47 = vadd.f32 %v7514_v11, %v11252_v14  ;;  %v7517_v35 = vadd.f32 %v7516_v51, %v7515_v0 }
 0x546   : > { %v5941_v4 = vsub.f32 %v5940_v58, %v6999_v26  ;;  %v5874_v46 = vadd.f32 %v11257_v30, %v5498_v47  ;;  %v5499_v38 = vadd.f32 %v7517_v35, %v11255_v34 }
 0x548   : > { %6047 = vst [vmem:[%s11327_s30 + $0x28] sm:$0xff] %v5941_v4  ;;  %vm5942_vm10 = vcmp.gt.f32.partialorder %v5941_v4, 1.0  ;;  %v5945_v27 = vmul.f32 0.9, %v5941_v4  ;;  %v5875_v28 = vadd.f32 %v11259_v22, %v5499_v38  ;;  %v7518_v9 = vpop.f32.mrb[160].mxu0  ;;  %v5900_v8 = vadd.f32 %v11320_v43, %v5874_v46 }
 0x549   : > { %v7000_v54 = vsel %vm5942_vm10, 1.0, %v8588_v31  ;;  %v7519_v2 = vpop.f32.mrb[161].mxu0 }
 0x54a   : > { %v5946_v53 = vadd.f32 %v5945_v27, %v5898_v55  ;;  %6028 = vst [vmem:[%s11334_s10 + $0x28] sm:$0xff] %v7000_v54  ;;  %v7520_v14 = vadd.f32 %v7519_v2, %v7518_v9  ;;  %v7521_v45 = vpop.f32.mrb[162].mxu0  ;;  %v5901_v11 = vadd.f32 %v11320_v43, %v5875_v28 }
 0x54b   : > { %v7522_v30 = vpop.f32.mrb[163].mxu0 }
 0x54c   : > { %v5947_v49 = vsub.f32 %v5946_v53, %v7000_v54  ;;  %v5500_v34 = vadd.f32 %v7520_v14, %v11264_v41  ;;  %v7523_v52 = vadd.f32 %v7522_v30, %v7521_v45 }
 0x54e   : > { %6048 = vst [vmem:[%s11327_s30 + $0x30] sm:$0xff] %v5947_v49  ;;  %vm5948_vm8 = vcmp.gt.f32.partialorder %v5947_v49, 1.0  ;;  %v5951_v22 = vmul.f32 0.9, %v5947_v49  ;;  %v5876_v1 = vadd.f32 %v11269_v17, %v5500_v34  ;;  %v5501_v24 = vadd.f32 %v7523_v52, %v11267_v40 }
 0x54f   : > { %v7001_v57 = vsel %vm5948_vm8, 1.0, %v8588_v31 }
 0x550   : > { %v5952_v21 = vadd.f32 %v5951_v22, %v5899_v60  ;;  %6029 = vst [vmem:[%s11334_s10 + $0x30] sm:$0xff] %v7001_v57  ;;  %v5877_v5 = vadd.f32 %v11271_v29, %v5501_v24  ;;  %v7524_v23 = vpop.f32.mrb[164].mxu0  ;;  %v5902_v46 = vadd.f32 %v11320_v43, %v5876_v1 }
 0x551   : > { %v7525_v41 = vpop.f32.mrb[165].mxu0 }
 0x552   : > { %v5953_v39 = vsub.f32 %v5952_v21, %v7001_v57  ;;  %v7526_v61 = vadd.f32 %v7525_v41, %v7524_v23  ;;  %v7527_v10 = vpop.f32.mrb[166].mxu0  ;;  %v5903_v45 = vadd.f32 %v11320_v43, %v5877_v5 }
 0x553   : > { %v7528_v3 = vpop.f32.mrb[167].mxu0 }
 0x554   : > { %6049 = vst [vmem:[%s11327_s30 + $0x38] sm:$0xff] %v5953_v39  ;;  %vm5954_vm14 = vcmp.gt.f32.partialorder %v5953_v39, 1.0  ;;  %v5957_v17 = vmul.f32 0.9, %v5953_v39  ;;  %v5502_v40 = vadd.f32 %v7526_v61, %v11276_v13  ;;  %v7529_v16 = vadd.f32 %v7528_v3, %v7527_v10 }
 0x555   : > { %v7002_v18 = vsel %vm5954_vm14, 1.0, %v8588_v31 }
 0x556   : > { %v5958_v59 = vadd.f32 %v5957_v17, %v5900_v8  ;;  %6030 = vst [vmem:[%s11334_s10 + $0x38] sm:$0xff] %v7002_v18  ;;  %v5878_v29 = vadd.f32 %v11281_v12, %v5502_v40  ;;  %v5503_v20 = vadd.f32 %v7529_v16, %v11279_v48 }
 0x558   : > { %v5959_v25 = vsub.f32 %v5958_v59, %v7002_v18  ;;  %v5879_v42 = vadd.f32 %v11283_v6, %v5503_v20  ;;  %v7530_v7 = vpop.f32.mrb[168].mxu0 }
 0x559   : > { %v7531_v62 = vpop.f32.mrb[169].mxu0 }
 0x55a   : > { %6050 = vst [vmem:[%s11327_s30 + $0x40] sm:$0xff] %v5959_v25  ;;  %vm5960_vm5 = vcmp.gt.f32.partialorder %v5959_v25, 1.0  ;;  %v5963_v13 = vmul.f32 0.9, %v5959_v25  ;;  %v7532_v0 = vadd.f32 %v7531_v62, %v7530_v7  ;;  %v7533_v26 = vpop.f32.mrb[170].mxu0  ;;  %v5905_v61 = vadd.f32 %v11320_v43, %v5879_v42 }
 0x55b   : > { %v7003_v51 = vsel %vm5960_vm5, 1.0, %v8588_v31  ;;  %v7534_v58 = vpop.f32.mrb[171].mxu0 }
 0x55c   : > { %v5964_v47 = vadd.f32 %v5963_v13, %v5901_v11  ;;  %6031 = vst [vmem:[%s11334_s10 + $0x40] sm:$0xff] %v7003_v51  ;;  %v5504_v48 = vadd.f32 %v7532_v0, %v11288_v37  ;;  %v7535_v12 = vadd.f32 %v7534_v58, %v7533_v26 }
 0x55e   : > { %v5965_v6 = vsub.f32 %v5964_v47, %v7003_v51  ;;  %v5880_v35 = vadd.f32 %v11293_v32, %v5504_v48  ;;  %v5505_v4 = vadd.f32 %v7535_v12, %v11291_v33 }
 0x560   : > { %6051 = vst [vmem:[%s11327_s30 + $0x48] sm:$0xff] %v5965_v6  ;;  %vm5966_vm2 = vcmp.gt.f32.partialorder %v5965_v6, 1.0  ;;  %v5969_v38 = vmul.f32 0.9, %v5965_v6  ;;  %v5881_v55 = vadd.f32 %v11295_v44, %v5505_v4  ;;  %v7536_v27 = vpop.f32.mrb[172].mxu0  ;;  %v5906_v17 = vadd.f32 %v11320_v43, %v5880_v35 }
 0x561   : > { %v7004_v28 = vsel %vm5966_vm2, 1.0, %v8588_v31  ;;  %v7537_v9 = vpop.f32.mrb[173].mxu0 }
 0x562   : > { %v5970_v54 = vadd.f32 %v5969_v38, %v5902_v46  ;;  %6032 = vst [vmem:[%s11334_s10 + $0x48] sm:$0xff] %v7004_v28  ;;  %v7538_v37 = vadd.f32 %v7537_v9, %v7536_v27  ;;  %v7539_v2 = vpop.f32.mrb[174].mxu0  ;;  %v5907_v59 = vadd.f32 %v11320_v43, %v5881_v55 }
 0x563   : > { %v7540_v32 = vpop.f32.mrb[175].mxu0 }
 0x564   : > { %v5971_v53 = vsub.f32 %v5970_v54, %v7004_v28  ;;  %v5506_v33 = vadd.f32 %v7538_v37, %v11300_v36  ;;  %v7541_v14 = vadd.f32 %v7540_v32, %v7539_v2 }
 0x566   : > { %6052 = vst [vmem:[%s11327_s30 + $0x50] sm:$0xff] %v5971_v53  ;;  %vm5972_vm11 = vcmp.gt.f32.partialorder %v5971_v53, 1.0  ;;  %v5975_v44 = vmul.f32 0.9, %v5971_v53  ;;  %v5882_v30 = vadd.f32 %v11305_v63, %v5506_v33  ;;  %v5507_v49 = vadd.f32 %v7541_v14, %v11303_v19 }
 0x567   : > { %v7005_v34 = vsel %vm5972_vm11, 1.0, %v8588_v31  ;;  %v5904_v63 = vadd.f32 %v11320_v43, %v5878_v29 }
 0x568   : > { %v5976_v52 = vadd.f32 %v5975_v44, %v5903_v45  ;;  %6033 = vst [vmem:[%s11334_s10 + $0x50] sm:$0xff] %v7005_v34  ;;  %v5883_v60 = vadd.f32 %v11307_v15, %v5507_v49  ;;  %v7542_v22 = vpop.f32.mrb[176].mxu0  ;;  %v5908_v7 = vadd.f32 %v11320_v43, %v5882_v30 }
 0x569   : > { %v7543_v36 = vpop.f32.mrb[177].mxu0 }
 0x56a   : > { %v5977_v1 = vsub.f32 %v5976_v52, %v7005_v34  ;;  %v7544_v24 = vadd.f32 %v7543_v36, %v7542_v22  ;;  %v7545_v57 = vpop.f32.mrb[178].mxu0  ;;  %v5909_v26 = vadd.f32 %v11320_v43, %v5883_v60 }
 0x56b   : > { %v7546_v21 = vpop.f32.mrb[179].mxu0 }
 0x56c   : > { %6053 = vst [vmem:[%s11327_s30 + $0x58] sm:$0xff] %v5977_v1  ;;  %vm5978_vm4 = vcmp.gt.f32.partialorder %v5977_v1, 1.0  ;;  %v5981_v19 = vmul.f32 0.9, %v5977_v1  ;;  %v5508_v5 = vadd.f32 %v7544_v24, %v11311_v56 }
 0x56d   : > { %v7006_v23 = vsel %vm5978_vm4, 1.0, %v8588_v31 }
 0x56e   : > { %v5982_v41 = vadd.f32 %v5981_v19, %v5904_v63  ;;  %6034 = vst [vmem:[%s11334_s10 + $0x58] sm:$0xff] %v7006_v23  ;;  %v5884_v15 = vadd.f32 %v11313_v50, %v5508_v5 }
 0x570   : > { %v5983_v39 = vsub.f32 %v5982_v41, %v7006_v23  ;;  %v5910_v12 = vadd.f32 %v11320_v43, %v5884_v15 }
 0x572   : > { %6054 = vst [vmem:[%s11327_s30 + $0x60] sm:$0xff] %v5983_v39  ;;  %vm5984_vm1 = vcmp.gt.f32.partialorder %v5983_v39, 1.0  ;;  %v5987_v10 = vmul.f32 0.9, %v5983_v39 }
 0x573   : > { %v7007_v8 = vsel %vm5984_vm1, 1.0, %v8588_v31 }
 0x574   : > { %v5988_v3 = vadd.f32 %v5987_v10, %v5905_v61  ;;  %6035 = vst [vmem:[%s11334_s10 + $0x60] sm:$0xff] %v7007_v8 }
 0x576   : > { %v5989_v56 = vsub.f32 %v5988_v3, %v7007_v8 }
 0x578   : > { %6055 = vst [vmem:[%s11327_s30 + $0x68] sm:$0xff] %v5989_v56  ;;  %vm5990_vm12 = vcmp.gt.f32.partialorder %v5989_v56, 1.0  ;;  %v5993_v50 = vmul.f32 0.9, %v5989_v56 }
 0x579   : > { %v7008_v40 = vsel %vm5990_vm12, 1.0, %v8588_v31 }
 0x57a   : > { %v5994_v16 = vadd.f32 %v5993_v50, %v5906_v17  ;;  %6036 = vst [vmem:[%s11334_s10 + $0x68] sm:$0xff] %v7008_v40 }
 0x57c   : > { %v5995_v18 = vsub.f32 %v5994_v16, %v7008_v40 }
 0x57e   : > { %6056 = vst [vmem:[%s11327_s30 + $0x70] sm:$0xff] %v5995_v18  ;;  %vm5996_vm3 = vcmp.gt.f32.partialorder %v5995_v18, 1.0  ;;  %v5999_v29 = vmul.f32 0.9, %v5995_v18 }
 0x57f   : > { %v7009_v20 = vsel %vm5996_vm3, 1.0, %v8588_v31 }
 0x580   : > { %v6000_v25 = vadd.f32 %v5999_v29, %v5907_v59  ;;  %6037 = vst [vmem:[%s11334_s10 + $0x70] sm:$0xff] %v7009_v20 }
 0x582   : > { %v6001_v42 = vsub.f32 %v6000_v25, %v7009_v20 }
 0x584   : > { %6057 = vst [vmem:[%s11327_s30 + $0x78] sm:$0xff] %v6001_v42  ;;  %vm6002_vm9 = vcmp.gt.f32.partialorder %v6001_v42, 1.0  ;;  %v6005_v62 = vmul.f32 0.9, %v6001_v42 }
 0x585   : > { %v7010_v11 = vsel %vm6002_vm9, 1.0, %v8588_v31 }
 0x586   : > { %v6006_v13 = vadd.f32 %v6005_v62, %v5908_v7  ;;  %6038 = vst [vmem:[%s11334_s10 + $0x78] sm:$0xff] %v7010_v11 }
 0x588   : > { %v6007_v0 = vsub.f32 %v6006_v13, %v7010_v11 }
 0x58a   : > { %6058 = vst [vmem:[%s11327_s30 + $0x80] sm:$0xff] %v6007_v0  ;;  %vm6008_vm0 = vcmp.gt.f32.partialorder %v6007_v0, 1.0  ;;  %v6011_v51 = vmul.f32 0.9, %v6007_v0 }
 0x58b   : > { %v7011_v58 = vsel %vm6008_vm0, 1.0, %v8588_v31 }
 0x58c   : > { %v6012_v47 = vadd.f32 %v6011_v51, %v5909_v26  ;;  %6039 = vst [vmem:[%s11334_s10 + $0x80] sm:$0xff] %v7011_v58 }
 0x58e   : > { %v6013_v48 = vsub.f32 %v6012_v47, %v7011_v58 }
 0x590   : > { %6059 = vst [vmem:[%s11327_s30 + $0x88] sm:$0xff] %v6013_v48  ;;  %vm6014_vm7 = vcmp.gt.f32.partialorder %v6013_v48, 1.0  ;;  %v6017_v6 = vmul.f32 0.9, %v6013_v48 }
 0x591   : > { %v7012_v35 = vsel %vm6014_vm7, 1.0, %v8588_v31 }
 0x592   : > { %v6018_v4 = vadd.f32 %v6017_v6, %v5910_v12  ;;  %6040 = vst [vmem:[%s11334_s10 + $0x88] sm:$0xff] %v7012_v35 }
 0x594   : > { %v6019_v46 = vsub.f32 %v6018_v4, %v7012_v35 }
 0x596   : > { %vm6020_vm15 = vcmp.gt.f32.partialorder %v6019_v46, 1.0  ;;  %6060 = vst [vmem:[%s11327_s30 + $0x90] sm:$0xff] %v6019_v46 }
 0x597   : > { %v7013_v38 = vsel %vm6020_vm15, 1.0, %v8588_v31 }
 0x598   : > { %6041 = vst [vmem:[%s11334_s10 + $0x90] sm:$0xff] %v7013_v38 }
 0x599 PF: > { %s19_s27 = sadd.s32 1, %s8585_s27  }
 0x59a   : > { %p16_p4 = scmp.ge.s32.totalorder %s19_s27, 4  }
 0x59c   :  { %18 = sbr.rel (!%p16_p4) target bundleno = 1 (0x1), region = 98 }

</bundles_post_ra>
